<compile_context>
chip_gen: v7x
topology: tpu7x:2x2x1
jax: 0.10.0
libtpu: 0.0.40
codegen_flags: <defaults>
</compile_context>

<pallas_src>
import math

import jax
import jax.numpy as jnp
from jax.experimental import pallas as pl
from jax.experimental.pallas import tpu as pltpu

POSTERIOR_MU_INIT = 0.0
POSTERIOR_RHO_INIT = -3.0
PRIOR_MU = 0.0
PRIOR_SIGMA = 1.0
N_LEVEL = 6
LENGTHSCALE = 1.0
M_RAW = 2 ** N_LEVEL - 1      # 63 dyadic design points per input dimension
M_PAD = 64                    # lane-friendly padded feature width per dimension
HIDDEN = 16                   # w1 = w2 = 16 hard-wired in the reference module
# TODO(synk): `design_class` / `kernel` are external ctor args of the original
# module; dyadic design + Laplace (Markov) kernel with unit lengthscale assumed.


def _softplus(x):
    # overflow-safe softplus, usable both in wrappers and inside kernels
    return jnp.maximum(x, 0.0) + jnp.log1p(jnp.exp(-jnp.abs(x)))


def _round_up(n, k):
    return ((n + k - 1) // k) * k


# ------------------------------ Pallas kernels ------------------------------

def fused_forward_kernel(x_ref,
                         e1_ref, u1_ref, m1_ref, b1_ref,
                         e2_ref, u2_ref, m2_ref, b2_ref,
                         e3_ref, u3_ref, m3_ref, b3_ref,
                         o_ref):
    """Whole SDGPadditive forward for one batch tile: 3 x (AMGP + Bayesian fc),
    final ReLU.  GP features stay in VMEM/vregs; never written to HBM."""
    inv_ell = 1.0 / LENGTHSCALE

    def gp_fc(h, e_ref, u_ref, m_ref, b_ref):
        # replicate each input dim across its 64-lane feature block via an MXU
        # matmul with a 0/1 matrix (avoids in-kernel reshapes / lane shuffles)
        x_exp = jnp.dot(h, e_ref[...], preferred_element_type=jnp.float32)
        # Markov / Laplace kernel against the dyadic design points (f32 EUP)
        k = jnp.exp(-jnp.abs(x_exp - u_ref[...]) * inv_ell)
        # whitening folded into the sampled weights: one lane-dense bf16 matmul
        y = jnp.dot(k.astype(jnp.bfloat16), m_ref[...],
                    preferred_element_type=jnp.float32)
        return y + b_ref[...]

    h = gp_fc(x_ref[...], e1_ref, u1_ref, m1_ref, b1_ref)   # gp1 + fc1
    h = gp_fc(h, e2_ref, u2_ref, m2_ref, b2_ref)            # gp2 + fc2
    h = gp_fc(h, e3_ref, u3_ref, m3_ref, b3_ref)            # gp3 + fc3
    o_ref[...] = jnp.maximum(h, 0.0).astype(o_ref.dtype)    # activation (ReLU)


def kl_kernel(mu_ref, rho_ref, o_ref):
    """Single fused KL( N(mu, softplus(rho)^2) || N(prior) ) over ALL params."""
    mu = mu_ref[...]
    sigma = _softplus(rho_ref[...])
    kl = (math.log(PRIOR_SIGMA) - jnp.log(sigma)
          + (sigma * sigma + (mu - PRIOR_MU) ** 2) / (2.0 * PRIOR_SIGMA ** 2)
          - 0.5)
    o_ref[...] = jnp.sum(kl, keepdims=True)                 # (1, 1)


# ------------------------------ wrappers (glue) ------------------------------

def make_amgp_constants():
    u = jnp.arange(1, M_RAW + 1, dtype=jnp.float32) / (2.0 ** N_LEVEL)
    K = jnp.exp(-jnp.abs(u[:, None] - u[None, :]) / LENGTHSCALE)
    L = jnp.linalg.cholesky(K + 1e-6 * jnp.eye(M_RAW, dtype=jnp.float32))
    # triangular solve (better conditioned / cheaper than inv(L))
    cinv = jax.scipy.linalg.solve_triangular(
        L, jnp.eye(M_RAW, dtype=jnp.float32), lower=True)    # L^{-1}
    cinv_t = cinv.T                                          # (63, 63) whitener
    u_pad = jnp.pad(u, (0, M_PAD - M_RAW))                   # (64,), pad unused
    return u_pad, cinv_t


def _layer_operands(d_in, w, b, cinv_t, u_pad):
    """Build lane-dense operands for one fused GP+fc layer.

    Folds the whitening into the sampled weight:
      M[d*64+i, o] = sum_n cinv_t[i, n] * W[o, d*63 + n]   (row i=63 is zero)
    so the kernel only needs exp(-|x-u|) followed by a single matmul.
    """
    out_f = w.shape[0]
    e = jnp.repeat(jnp.eye(d_in, dtype=jnp.float32), M_PAD, axis=1)  # (D, D*64)
    u_row = jnp.tile(u_pad, d_in).reshape(1, d_in * M_PAD)           # (1, D*64)
    wt = w.T.reshape(d_in, M_RAW, out_f)                             # (D,63,out)
    m_eff = jnp.einsum('in,dno->dio', cinv_t, wt)                    # (D,63,out)
    m_eff = jnp.pad(m_eff, ((0, 0), (0, M_PAD - M_RAW), (0, 0)))
    m_eff = m_eff.reshape(d_in * M_PAD, out_f).astype(jnp.bfloat16)
    return e, u_row, m_eff, b.reshape(1, out_f).astype(jnp.float32)


def _sample_linear(p, key):
    kw, kb = jax.random.split(key)
    w = p["mu_w"] + _softplus(p["rho_w"]) * jax.random.normal(
        kw, p["mu_w"].shape, jnp.float32)
    b = p["mu_b"] + _softplus(p["rho_b"]) * jax.random.normal(
        kb, p["mu_b"].shape, jnp.float32)
    return w, b


def _kl_all(params):
    names = ("fc1", "fc2", "fc3")
    mus = jnp.concatenate([params[n][k].reshape(-1)
                           for n in names for k in ("mu_w", "mu_b")])
    rhos = jnp.concatenate([params[n][k].reshape(-1)
                            for n in names for k in ("rho_w", "rho_b")])
    out = pl.pallas_call(
        kl_kernel,
        out_shape=jax.ShapeDtypeStruct((1, 1), jnp.float32),
    )(mus.reshape(1, -1), rhos.reshape(1, -1))
    return out[0, 0]


def init_linear(key, in_f, out_f):
    k = jax.random.split(key, 4)
    return dict(
        mu_w=POSTERIOR_MU_INIT
        + 0.1 * jax.random.normal(k[0], (out_f, in_f), jnp.float32),
        rho_w=POSTERIOR_RHO_INIT
        + 0.1 * jax.random.normal(k[1], (out_f, in_f), jnp.float32),
        mu_b=POSTERIOR_MU_INIT
        + 0.1 * jax.random.normal(k[2], (out_f,), jnp.float32),
        rho_b=POSTERIOR_RHO_INIT
        + 0.1 * jax.random.normal(k[3], (out_f,), jnp.float32),
    )


def init_sdgp_additive(key, input_dim, output_dim):
    k1, k2, k3 = jax.random.split(key, 3)
    return dict(
        fc1=init_linear(k1, input_dim * M_RAW, HIDDEN),
        fc2=init_linear(k2, HIDDEN * M_RAW, HIDDEN),
        fc3=init_linear(k3, HIDDEN * M_RAW, output_dim),
    )


def sdgp_additive_forward(params, x, u_pad, cinv_t, sample_key, tile_b=256):
    b, d_in = x.shape
    ks = jax.random.split(sample_key, 3)
    w1, b1 = _sample_linear(params["fc1"], ks[0])
    w2, b2 = _sample_linear(params["fc2"], ks[1])
    w3, b3 = _sample_linear(params["fc3"], ks[2])
    out_dim = w3.shape[0]

    ops1 = _layer_operands(d_in,   w1, b1, cinv_t, u_pad)
    ops2 = _layer_operands(HIDDEN, w2, b2, cinv_t, u_pad)
    ops3 = _layer_operands(HIDDEN, w3, b3, cinv_t, u_pad)

    # batch tiling (sublane-aligned); pad batch, slice back afterwards
    tile_b = min(tile_b, _round_up(b, 8))
    b_pad = _round_up(b, tile_b)
    x_p = jnp.pad(x.astype(jnp.float32), ((0, b_pad - b), (0, 0)))

    def const(shape):
        return pl.BlockSpec(shape, lambda i: (0, 0))

    in_specs = [pl.BlockSpec((tile_b, d_in), lambda i: (i, 0))]
    operands = [x_p]
    for (e, u_row, m_eff, bias) in (ops1, ops2, ops3):
        in_specs += [const(e.shape), const(u_row.shape),
                     const(m_eff.shape), const(bias.shape)]
        operands += [e, u_row, m_eff, bias]

    y = pl.pallas_call(
        fused_forward_kernel,
        out_shape=jax.ShapeDtypeStruct((b_pad, out_dim), jnp.float32),
        grid=(b_pad // tile_b,),
        in_specs=in_specs,
        out_specs=pl.BlockSpec((tile_b, out_dim), lambda i: (i, 0)),
        compiler_params=pltpu.CompilerParams(
            dimension_semantics=("parallel",)),
    )(*operands)

    kl = _kl_all(params)
    return jnp.squeeze(y[:b]), kl                            # torch.squeeze


# ----------------------------------- main -----------------------------------

if __name__ == "__main__":
    key = jax.random.PRNGKey(0)
    k_param, k_data, k_sample = jax.random.split(key, 3)

    input_dim, output_dim, batch = 4, 3, 8
    u_pad, cinv_t = make_amgp_constants()
    params = init_sdgp_additive(k_param, input_dim, output_dim)
    x = jax.random.normal(k_data, (batch, input_dim), jnp.float32)

    fwd = jax.jit(sdgp_additive_forward)
    out, kl = fwd(params, x, u_pad, cinv_t, k_sample)
    out = jax.block_until_ready(out)
    kl = jax.block_until_ready(kl)

    assert out.shape == (batch, output_dim)
    assert jnp.isfinite(out).all() and jnp.isfinite(kl)
    print("KERNEL_OK")
</pallas_src>

<mosaic_0001>
module attributes {stable_mosaic.version = 11 : i64} {
  func.func @kl_kernel(%arg0: memref<1x23219xf32, #tpu.memory_space<vmem>>, %arg1: memref<1x23219xf32, #tpu.memory_space<vmem>>, %arg2: memref<1x1xf32, #tpu.memory_space<vmem>>) attributes {dimension_semantics = [], scalar_prefetch = 0 : i64, scratch_operands = 0 : i64, tpu.core_type = #tpu.core_type<tc>} {
    %c0 = arith.constant 0 : index
    %c0_0 = arith.constant 0 : index
    %0 = vector.load %arg0[%c0, %c0_0] : memref<1x23219xf32, #tpu.memory_space<vmem>>, vector<1x23219xf32>
    %c0_1 = arith.constant 0 : index
    %c0_2 = arith.constant 0 : index
    %1 = vector.load %arg1[%c0_1, %c0_2] : memref<1x23219xf32, #tpu.memory_space<vmem>>, vector<1x23219xf32>
    %cst = arith.constant 0.000000e+00 : f32
    %2 = vector.broadcast %cst : f32 to vector<1x23219xf32>
    %3 = arith.maximumf %1, %2 : vector<1x23219xf32>
    %4 = math.absf %1 : vector<1x23219xf32>
    %cst_3 = arith.constant 0.000000e+00 : f32
    %5 = vector.broadcast %cst_3 : f32 to vector<1x23219xf32>
    %6 = arith.subf %5, %4 : vector<1x23219xf32>
    %7 = math.exp %6 : vector<1x23219xf32>
    %8 = math.log1p %7 : vector<1x23219xf32>
    %9 = arith.addf %3, %8 : vector<1x23219xf32>
    %10 = math.log %9 : vector<1x23219xf32>
    %cst_4 = arith.constant 0.000000e+00 : f32
    %11 = vector.broadcast %cst_4 : f32 to vector<1x23219xf32>
    %12 = arith.subf %11, %10 : vector<1x23219xf32>
    %13 = arith.mulf %9, %9 : vector<1x23219xf32>
    %cst_5 = arith.constant 0.000000e+00 : f32
    %14 = vector.broadcast %cst_5 : f32 to vector<1x23219xf32>
    %15 = arith.subf %0, %14 : vector<1x23219xf32>
    %16 = arith.mulf %15, %15 : vector<1x23219xf32>
    %17 = arith.addf %13, %16 : vector<1x23219xf32>
    %cst_6 = arith.constant 2.000000e+00 : f32
    %18 = vector.broadcast %cst_6 : f32 to vector<1x23219xf32>
    %19 = arith.divf %17, %18 : vector<1x23219xf32>
    %20 = arith.addf %12, %19 : vector<1x23219xf32>
    %cst_7 = arith.constant 5.000000e-01 : f32
    %21 = vector.broadcast %cst_7 : f32 to vector<1x23219xf32>
    %22 = arith.subf %20, %21 : vector<1x23219xf32>
    %23 = vector.shape_cast %22 : vector<1x23219xf32> to vector<1x1x23219xf32>
    %cst_8 = arith.constant dense<0.000000e+00> : vector<1xf32>
    %24 = vector.multi_reduction <add>, %23, %cst_8 [1, 2] : vector<1x1x23219xf32> to vector<1xf32>
    %25 = vector.shape_cast %24 : vector<1xf32> to vector<1x1x1xf32>
    %26 = vector.extract %25[0, 0, 0] : f32 from vector<1x1x1xf32>
    %27 = vector.broadcast %26 : f32 to vector<1x1xf32>
    %c0_9 = arith.constant 0 : index
    %c0_10 = arith.constant 0 : index
    %28 = vector.load %arg2[%c0_9, %c0_10] : memref<1x1xf32, #tpu.memory_space<vmem>>, vector<1x1xf32>
    tpu.vector_store %arg2[%c0_9, %c0_10], %27 {strides = array<i32>} : memref<1x1xf32, #tpu.memory_space<vmem>>, vector<1x1xf32>,
    return
  }
}

module attributes {stable_mosaic.version = 11 : i64} {
  func.func @fused_forward_kernel(%arg0: i32, %arg1: memref<8x4xf32, #tpu.memory_space<vmem>>, %arg2: memref<4x256xf32, #tpu.memory_space<vmem>>, %arg3: memref<1x256xf32, #tpu.memory_space<vmem>>, %arg4: memref<256x16xbf16, #tpu.memory_space<vmem>>, %arg5: memref<1x16xf32, #tpu.memory_space<vmem>>, %arg6: memref<16x1024xf32, #tpu.memory_space<vmem>>, %arg7: memref<1x1024xf32, #tpu.memory_space<vmem>>, %arg8: memref<1024x16xbf16, #tpu.memory_space<vmem>>, %arg9: memref<1x16xf32, #tpu.memory_space<vmem>>, %arg10: memref<16x1024xf32, #tpu.memory_space<vmem>>, %arg11: memref<1x1024xf32, #tpu.memory_space<vmem>>, %arg12: memref<1024x3xbf16, #tpu.memory_space<vmem>>, %arg13: memref<1x3xf32, #tpu.memory_space<vmem>>, %arg14: memref<8x3xf32, #tpu.memory_space<vmem>>) attributes {dimension_semantics = [#tpu.dimension_semantics<parallel>], iteration_bounds = array<i64: 1>, scalar_prefetch = 0 : i64, scratch_operands = 0 : i64, tpu.core_type = #tpu.core_type<tc>, window_params = [{transform_indices = @transform_0, window_bounds = array<i64: 8, 4>}, {pipeline_mode = #tpu.pipeline_mode<synchronous>, transform_indices = @transform_1, window_bounds = array<i64: 4, 256>}, {pipeline_mode = #tpu.pipeline_mode<synchronous>, transform_indices = @transform_2, window_bounds = array<i64: 1, 256>}, {pipeline_mode = #tpu.pipeline_mode<synchronous>, transform_indices = @transform_3, window_bounds = array<i64: 256, 16>}, {pipeline_mode = #tpu.pipeline_mode<synchronous>, transform_indices = @transform_4, window_bounds = array<i64: 1, 16>}, {pipeline_mode = #tpu.pipeline_mode<synchronous>, transform_indices = @transform_5, window_bounds = array<i64: 16, 1024>}, {pipeline_mode = #tpu.pipeline_mode<synchronous>, transform_indices = @transform_6, window_bounds = array<i64: 1, 1024>}, {pipeline_mode = #tpu.pipeline_mode<synchronous>, transform_indices = @transform_7, window_bounds = array<i64: 1024, 16>}, {pipeline_mode = #tpu.pipeline_mode<synchronous>, transform_indices = @transform_8, window_bounds = array<i64: 1, 16>}, {pipeline_mode = #tpu.pipeline_mode<synchronous>, transform_indices = @transform_9, window_bounds = array<i64: 16, 1024>}, {pipeline_mode = #tpu.pipeline_mode<synchronous>, transform_indices = @transform_10, window_bounds = array<i64: 1, 1024>}, {pipeline_mode = #tpu.pipeline_mode<synchronous>, transform_indices = @transform_11, window_bounds = array<i64: 1024, 3>}, {pipeline_mode = #tpu.pipeline_mode<synchronous>, transform_indices = @transform_12, window_bounds = array<i64: 1, 3>}, {transform_indices = @transform_13, window_bounds = array<i64: 8, 3>}]} {
    %c0 = arith.constant 0 : index
    %c0_0 = arith.constant 0 : index
    %0 = vector.load %arg1[%c0, %c0_0] : memref<8x4xf32, #tpu.memory_space<vmem>>, vector<8x4xf32>
    %c0_1 = arith.constant 0 : index
    %c0_2 = arith.constant 0 : index
    %1 = vector.load %arg2[%c0_1, %c0_2] : memref<4x256xf32, #tpu.memory_space<vmem>>, vector<4x256xf32>
    %cst = arith.constant dense<0.000000e+00> : vector<8x256xf32>
    %2 = tpu.matmul %0, %1, %cst {dimension_numbers = #tpu.dot_dimension_numbers<[1], [0], [0], [1], [0, 0, 1, 1], [], []>} : vector<8x4xf32>, vector<4x256xf32>, vector<8x256xf32> -> vector<8x256xf32>
    %c0_3 = arith.constant 0 : index
    %c0_4 = arith.constant 0 : index
    %3 = vector.load %arg3[%c0_3, %c0_4] : memref<1x256xf32, #tpu.memory_space<vmem>>, vector<1x256xf32>
    %4 = vector.broadcast %3 : vector<1x256xf32> to vector<8x256xf32>
    %5 = arith.subf %2, %4 : vector<8x256xf32>
    %6 = math.absf %5 : vector<8x256xf32>
    %cst_5 = arith.constant 0.000000e+00 : f32
    %7 = vector.broadcast %cst_5 : f32 to vector<8x256xf32>
    %8 = arith.subf %7, %6 : vector<8x256xf32>
    %cst_6 = arith.constant 1.000000e+00 : f32
    %9 = vector.broadcast %cst_6 : f32 to vector<8x256xf32>
    %10 = arith.mulf %8, %9 : vector<8x256xf32>
    %11 = math.exp %10 : vector<8x256xf32>
    %12 = arith.truncf %11 : vector<8x256xf32> to vector<8x256xbf16>
    %c0_7 = arith.constant 0 : index
    %c0_8 = arith.constant 0 : index
    %13 = vector.load %arg4[%c0_7, %c0_8] : memref<256x16xbf16, #tpu.memory_space<vmem>>, vector<256x16xbf16>
    %cst_9 = arith.constant dense<0.000000e+00> : vector<8x16xf32>
    %14 = tpu.matmul %12, %13, %cst_9 {dimension_numbers = #tpu.dot_dimension_numbers<[1], [0], [0], [1], [0, 0, 1, 1], [], []>} : vector<8x256xbf16>, vector<256x16xbf16>, vector<8x16xf32> -> vector<8x16xf32>
    %c0_10 = arith.constant 0 : index
    %c0_11 = arith.constant 0 : index
    %15 = vector.load %arg5[%c0_10, %c0_11] : memref<1x16xf32, #tpu.memory_space<vmem>>, vector<1x16xf32>
    %16 = vector.broadcast %15 : vector<1x16xf32> to vector<8x16xf32>
    %17 = arith.addf %14, %16 : vector<8x16xf32>
    %c0_12 = arith.constant 0 : index
    %c0_13 = arith.constant 0 : index
    %18 = vector.load %arg6[%c0_12, %c0_13] : memref<16x1024xf32, #tpu.memory_space<vmem>>, vector<16x1024xf32>
    %cst_14 = arith.constant dense<0.000000e+00> : vector<8x1024xf32>
    %19 = tpu.matmul %17, %18, %cst_14 {dimension_numbers = #tpu.dot_dimension_numbers<[1], [0], [0], [1], [0, 0, 1, 1], [], []>} : vector<8x16xf32>, vector<16x1024xf32>, vector<8x1024xf32> -> vector<8x1024xf32>
    %c0_15 = arith.constant 0 : index
    %c0_16 = arith.constant 0 : index
    %20 = vector.load %arg7[%c0_15, %c0_16] : memref<1x1024xf32, #tpu.memory_space<vmem>>, vector<1x1024xf32>
    %21 = vector.broadcast %20 : vector<1x1024xf32> to vector<8x1024xf32>
    %22 = arith.subf %19, %21 : vector<8x1024xf32>
    %23 = math.absf %22 : vector<8x1024xf32>
    %cst_17 = arith.constant 0.000000e+00 : f32
    %24 = vector.broadcast %cst_17 : f32 to vector<8x1024xf32>
    %25 = arith.subf %24, %23 : vector<8x1024xf32>
    %cst_18 = arith.constant 1.000000e+00 : f32
    %26 = vector.broadcast %cst_18 : f32 to vector<8x1024xf32>
    %27 = arith.mulf %25, %26 : vector<8x1024xf32>
    %28 = math.exp %27 : vector<8x1024xf32>
    %29 = arith.truncf %28 : vector<8x1024xf32> to vector<8x1024xbf16>
    %c0_19 = arith.constant 0 : index
    %c0_20 = arith.constant 0 : index
    %30 = vector.load %arg8[%c0_19, %c0_20] : memref<1024x16xbf16, #tpu.memory_space<vmem>>, vector<1024x16xbf16>
    %cst_21 = arith.constant dense<0.000000e+00> : vector<8x16xf32>
    %31 = tpu.matmul %29, %30, %cst_21 {dimension_numbers = #tpu.dot_dimension_numbers<[1], [0], [0], [1], [0, 0, 1, 1], [], []>} : vector<8x1024xbf16>, vector<1024x16xbf16>, vector<8x16xf32> -> vector<8x16xf32>
    %c0_22 = arith.constant 0 : index
    %c0_23 = arith.constant 0 : index
    %32 = vector.load %arg9[%c0_22, %c0_23] : memref<1x16xf32, #tpu.memory_space<vmem>>, vector<1x16xf32>
    %33 = vector.broadcast %32 : vector<1x16xf32> to vector<8x16xf32>
    %34 = arith.addf %31, %33 : vector<8x16xf32>
    %c0_24 = arith.constant 0 : index
    %c0_25 = arith.constant 0 : index
    %35 = vector.load %arg10[%c0_24, %c0_25] : memref<16x1024xf32, #tpu.memory_space<vmem>>, vector<16x1024xf32>
    %cst_26 = arith.constant dense<0.000000e+00> : vector<8x1024xf32>
    %36 = tpu.matmul %34, %35, %cst_26 {dimension_numbers = #tpu.dot_dimension_numbers<[1], [0], [0], [1], [0, 0, 1, 1], [], []>} : vector<8x16xf32>, vector<16x1024xf32>, vector<8x1024xf32> -> vector<8x1024xf32>
    %c0_27 = arith.constant 0 : index
    %c0_28 = arith.constant 0 : index
    %37 = vector.load %arg11[%c0_27, %c0_28] : memref<1x1024xf32, #tpu.memory_space<vmem>>, vector<1x1024xf32>
    %38 = vector.broadcast %37 : vector<1x1024xf32> to vector<8x1024xf32>
    %39 = arith.subf %36, %38 : vector<8x1024xf32>
    %40 = math.absf %39 : vector<8x1024xf32>
    %cst_29 = arith.constant 0.000000e+00 : f32
    %41 = vector.broadcast %cst_29 : f32 to vector<8x1024xf32>
    %42 = arith.subf %41, %40 : vector<8x1024xf32>
    %cst_30 = arith.constant 1.000000e+00 : f32
    %43 = vector.broadcast %cst_30 : f32 to vector<8x1024xf32>
    %44 = arith.mulf %42, %43 : vector<8x1024xf32>
    %45 = math.exp %44 : vector<8x1024xf32>
    %46 = arith.truncf %45 : vector<8x1024xf32> to vector<8x1024xbf16>
    %c0_31 = arith.constant 0 : index
    %c0_32 = arith.constant 0 : index
    %47 = vector.load %arg12[%c0_31, %c0_32] : memref<1024x3xbf16, #tpu.memory_space<vmem>>, vector<1024x3xbf16>
    %cst_33 = arith.constant dense<0.000000e+00> : vector<8x3xf32>
    %48 = tpu.matmul %46, %47, %cst_33 {dimension_numbers = #tpu.dot_dimension_numbers<[1], [0], [0], [1], [0, 0, 1, 1], [], []>} : vector<8x1024xbf16>, vector<1024x3xbf16>, vector<8x3xf32> -> vector<8x3xf32>
    %c0_34 = arith.constant 0 : index
    %c0_35 = arith.constant 0 : index
    %49 = vector.load %arg13[%c0_34, %c0_35] : memref<1x3xf32, #tpu.memory_space<vmem>>, vector<1x3xf32>
    %50 = vector.broadcast %49 : vector<1x3xf32> to vector<8x3xf32>
    %51 = arith.addf %48, %50 : vector<8x3xf32>
    %cst_36 = arith.constant 0.000000e+00 : f32
    %52 = vector.broadcast %cst_36 : f32 to vector<8x3xf32>
    %53 = arith.maximumf %51, %52 : vector<8x3xf32>
    %c0_37 = arith.constant 0 : index
    %c0_38 = arith.constant 0 : index
    %54 = vector.load %arg14[%c0_37, %c0_38] : memref<8x3xf32, #tpu.memory_space<vmem>>, vector<8x3xf32>
    tpu.vector_store %arg14[%c0_37, %c0_38], %53 {strides = array<i32>} : memref<8x3xf32, #tpu.memory_space<vmem>>, vector<8x3xf32>,
    return
  }
  func.func @transform_0(%arg0: i32) -> (i32, i32) {
    %c0_i32 = arith.constant 0 : i32
    %c0_i32_0 = arith.constant 0 : i32
    return %arg0, %c0_i32 : i32, i32
  }
  func.func @transform_1(%arg0: i32) -> (i32, i32) {
    %c0_i32 = arith.constant 0 : i32
    %c0_i32_0 = arith.constant 0 : i32
    %c0_i32_1 = arith.constant 0 : i32
    return %c0_i32, %c0_i32_0 : i32, i32
  }
  func.func @transform_2(%arg0: i32) -> (i32, i32) {
    %c0_i32 = arith.constant 0 : i32
    %c0_i32_0 = arith.constant 0 : i32
    %c0_i32_1 = arith.constant 0 : i32
    return %c0_i32, %c0_i32_0 : i32, i32
  }
  func.func @transform_3(%arg0: i32) -> (i32, i32) {
    %c0_i32 = arith.constant 0 : i32
    %c0_i32_0 = arith.constant 0 : i32
    %c0_i32_1 = arith.constant 0 : i32
    return %c0_i32, %c0_i32_0 : i32, i32
  }
  func.func @transform_4(%arg0: i32) -> (i32, i32) {
    %c0_i32 = arith.constant 0 : i32
    %c0_i32_0 = arith.constant 0 : i32
    %c0_i32_1 = arith.constant 0 : i32
    return %c0_i32, %c0_i32_0 : i32, i32
  }
  func.func @transform_5(%arg0: i32) -> (i32, i32) {
    %c0_i32 = arith.constant 0 : i32
    %c0_i32_0 = arith.constant 0 : i32
    %c0_i32_1 = arith.constant 0 : i32
    return %c0_i32, %c0_i32_0 : i32, i32
  }
  func.func @transform_6(%arg0: i32) -> (i32, i32) {
    %c0_i32 = arith.constant 0 : i32
    %c0_i32_0 = arith.constant 0 : i32
    %c0_i32_1 = arith.constant 0 : i32
    return %c0_i32, %c0_i32_0 : i32, i32
  }
  func.func @transform_7(%arg0: i32) -> (i32, i32) {
    %c0_i32 = arith.constant 0 : i32
    %c0_i32_0 = arith.constant 0 : i32
    %c0_i32_1 = arith.constant 0 : i32
    return %c0_i32, %c0_i32_0 : i32, i32
  }
  func.func @transform_8(%arg0: i32) -> (i32, i32) {
    %c0_i32 = arith.constant 0 : i32
    %c0_i32_0 = arith.constant 0 : i32
    %c0_i32_1 = arith.constant 0 : i32
    return %c0_i32, %c0_i32_0 : i32, i32
  }
  func.func @transform_9(%arg0: i32) -> (i32, i32) {
    %c0_i32 = arith.constant 0 : i32
    %c0_i32_0 = arith.constant 0 : i32
    %c0_i32_1 = arith.constant 0 : i32
    return %c0_i32, %c0_i32_0 : i32, i32
  }
  func.func @transform_10(%arg0: i32) -> (i32, i32) {
    %c0_i32 = arith.constant 0 : i32
    %c0_i32_0 = arith.constant 0 : i32
    %c0_i32_1 = arith.constant 0 : i32
    return %c0_i32, %c0_i32_0 : i32, i32
  }
  func.func @transform_11(%arg0: i32) -> (i32, i32) {
    %c0_i32 = arith.constant 0 : i32
    %c0_i32_0 = arith.constant 0 : i32
    %c0_i32_1 = arith.constant 0 : i32
    return %c0_i32, %c0_i32_0 : i32, i32
  }
  func.func @transform_12(%arg0: i32) -> (i32, i32) {
    %c0_i32 = arith.constant 0 : i32
    %c0_i32_0 = arith.constant 0 : i32
    %c0_i32_1 = arith.constant 0 : i32
    return %c0_i32, %c0_i32_0 : i32, i32
  }
  func.func @transform_13(%arg0: i32) -> (i32, i32) {
    %c0_i32 = arith.constant 0 : i32
    %c0_i32_0 = arith.constant 0 : i32
    return %arg0, %c0_i32 : i32, i32
  }
}

</mosaic_0001>

<bundles_post_ra>
// kernel: tile.23
= control target key start
LH: loop header
LB: loop body
LE: loop exit
PB: predicated region body
PF: predicated region fallthrough
CT: control target
= control target key end

     0   :  { %s28_s0 = inlined_call_operand.vmem [shape: f32[64], index: 0, kind: input, shape index: {}]   ;;  %s29_s1 = inlined_call_operand.vmem [shape: f32[16,64], index: 1, kind: output, shape index: {}]  }
   0x1   :  { %v4_v0 = vld [vmem:[%s28_s0] ss:$0 sm:$0xff] }
   0x2   :  { %5 = vst [vmem:[%s29_s1] sm:$0xff] %v4_v0  ;;  %8 = vst [vmem:[%s29_s1 + $0x8] sm:$0xff] %v4_v0 }

// kernel: tile.24
= control target key start
LH: loop header
LB: loop body
LE: loop exit
PB: predicated region body
PF: predicated region fallthrough
CT: control target
= control target key end

     0   :  { %vm3_vm0 = vcmask 523264   ;;  %vm10_vm1 = vcmask 1048064   ;;  %s116_s0 = inlined_call_operand.vmem [shape: f32[16,64], index: 0, kind: input, shape index: {}]   ;;  %s117_s1 = inlined_call_operand.vmem [shape: f32[1,1024], index: 1, kind: output, shape index: {}]  }
   0x1   :  { %v66_v0 = vld [vmem:[%s116_s0 + $0x1] ss:$2 sm:$0xff]   ;;  %v2_v1 = vld [vmem:[%s116_s0] ss:$2 sm:$0xff]   ;;  %s75_s0 = smov 64  }
   0x2   :  { %8 = vrot.lane.b32.xlu0 %v66_v0, %s75_s0  ;;  %4 = vst.msk [vmem:[#allocation0] ss:$8 sm:$0xf] %vm3_vm0, %v2_v1   ;;  %5 = vst.msk [vmem:[#allocation0] ss:$8 sm:$0xf0] %vm3_vm0, %v2_v1  }
  0x74   :  { %v9_v2 = vpop.permute.xlu0 %8  }
  0x75   :  { %11 = vst.msk [vmem:[#allocation0] ss:$8 sm:$0xf] %vm10_vm1, %v9_v2   ;;  %12 = vst.msk [vmem:[#allocation0] ss:$8 sm:$0xf0] %vm10_vm1, %v9_v2  }
  0x7c   :  { %v16_v3 = vld [vmem:[#allocation0] sm:$0x1]  ;;  %v20_v4 = vld [vmem:[#allocation0 + $0x8] sm:$0x1]  ;;  %v25_v5 = vld [vmem:[#allocation0 + $0x10] sm:$0x1] }
  0x7d   :  { %18 = vst [vmem:[%s117_s1] sm:$0x1] %v16_v3  ;;  %67 = vst [vmem:[%s117_s1 + $0x1] sm:$0x1] %v20_v4  ;;  %v31_v6 = vld [vmem:[#allocation0 + $0x18] sm:$0x1] }
  0x7e   :  { %68 = vst [vmem:[%s117_s1 + $0x2] sm:$0x1] %v25_v5  ;;  %v37_v7 = vld [vmem:[#allocation0 + $0x20] sm:$0x1]  ;;  %v43_v8 = vld [vmem:[#allocation0 + $0x28] sm:$0x1] }
  0x7f   :  { %69 = vst [vmem:[%s117_s1 + $0x3] sm:$0x1] %v31_v6  ;;  %70 = vst [vmem:[%s117_s1 + $0x4] sm:$0x1] %v37_v7  ;;  %v49_v9 = vld [vmem:[#allocation0 + $0x30] sm:$0x1] }
  0x80   :  { %71 = vst [vmem:[%s117_s1 + $0x5] sm:$0x1] %v43_v8  ;;  %v55_v10 = vld [vmem:[#allocation0 + $0x38] sm:$0x1]  ;;  %72 = vst [vmem:[%s117_s1 + $0x6] sm:$0x1] %v49_v9 }
  0x81   :  { %73 = vst [vmem:[%s117_s1 + $0x7] sm:$0x1] %v55_v10 }

// kernel: tile.18
= control target key start
LH: loop header
LB: loop body
LE: loop exit
PB: predicated region body
PF: predicated region fallthrough
CT: control target
= control target key end

     0   :  { %s22_s0 = inlined_call_operand.vmem [shape: f32[64], index: 0, kind: input, shape index: {}]   ;;  %s23_s1 = inlined_call_operand.vmem [shape: f32[4,64], index: 1, kind: output, shape index: {}]  }
   0x1   :  { %v4_v0 = vld [vmem:[%s22_s0] ss:$0 sm:$0xff] }
   0x2   :  { %5 = vst [vmem:[%s23_s1] sm:$0xf] %v4_v0 }

// kernel: tile.19
= control target key start
LH: loop header
LB: loop body
LE: loop exit
PB: predicated region body
PF: predicated region fallthrough
CT: control target
= control target key end

     0   :  { %s6_s8 = smov 3  ;;  %vm8_vm0 = vcmask 523264   ;;  %s30_s9 = smov 64   ;;  %vm15_vm1 = vcmask 1048064   ;;  %s50_s0 = inlined_call_operand.vmem [shape: f32[4,64], index: 0, kind: input, shape index: {}]   ;;  %s51_s1 = inlined_call_operand.vmem [shape: f32[1,256], index: 1, kind: output, shape index: {}]  }
   0x1   :  { %v4_v0 = vld [vmem:[%s50_s0] sm:$0xf]  ;;  %s11_s0 = smov 3 }
   0x2   :  { %5 = vst [vmem:[#allocation1] sm:$0xf] %v4_v0 }
   0x9   :  { %v12_v1 = vld [vmem:[#allocation1 + $0x1] ss:$2 sm:%s11_s0]   ;;  %v7_v2 = vld [vmem:[#allocation1] ss:$2 sm:%s6_s8]  }
   0xa   :  { %13 = vrot.lane.b32.xlu0 %v12_v1, %s30_s9  ;;  %9 = vst.msk [vmem:[#allocation0] ss:$8 sm:$0x3] %vm8_vm0, %v7_v2  }
  0x7c   :  { %v14_v3 = vpop.permute.xlu0 %13  }
  0x7d   :  { %16 = vst.msk [vmem:[#allocation0] ss:$8 sm:$0x3] %vm15_vm1, %v14_v3  }
  0x84   :  { %v20_v4 = vld [vmem:[#allocation0] sm:$0x1]  ;;  %v24_v5 = vld [vmem:[#allocation0 + $0x8] sm:$0x1] }
  0x85   :  { %22 = vst [vmem:[%s51_s1] sm:$0x1] %v20_v4  ;;  %28 = vst [vmem:[%s51_s1 + $0x1] sm:$0x1] %v24_v5 }

// kernel: sdgp_additive_forward.13
= control target key start
LH: loop header
LB: loop body
LE: loop exit
PB: predicated region body
PF: predicated region fallthrough
CT: control target
= control target key end

     0   :  { %7 = vsyncpa [#allocation3], 0  ;;  %v634_v56 = vlaneseq  ;;  %vm1544_vm3 = vcmask 1040384   ;;  %s3176_s0 = inlined_call_operand.vmem [shape: f32[1,23219], index: 0, kind: input, shape index: {}]   ;;  %s3177_s1 = inlined_call_operand.vmem [shape: f32[1,23219], index: 1, kind: input, shape index: {}]   ;;  %s3178_s2 = inlined_call_operand.hbm [shape: f32[1,1], index: 2, kind: output, shape index: {}]  }
   0x1   :  { %v35_v0 = vld [vmem:[%s3177_s1] sm:$0xff]  ;;  %v36_v3 = vld [vmem:[%s3177_s1 + $0x8] sm:$0xff]  ;;  %v2148_v9 = vld [vmem:[%s3177_s1 + $0x10] sm:$0xff] }
   0x2   :  { %v81_v1 = vand.u32 2147483647, %v35_v0  ;;  %v82_v5 = vand.u32 2147483647, %v36_v3  ;;  %v83_v11 = vand.u32 2147483647, %v2148_v9 }
   0x3   :  { %v2154_v20 = vld [vmem:[%s3177_s1 + $0x18] sm:$0xff]  ;;  %v58_v24 = vmax.f32 %v35_v0, 0.0  ;;  %v2160_v37 = vld [vmem:[%s3177_s1 + $0x20] sm:$0xff]  ;;  %v59_v38 = vmax.f32 %v36_v3, 0.0  ;;  %v13_v57 = vld [vmem:[%s3176_s0 + $0x8] sm:$0xff]  ;;  %v60_v63 = vmax.f32 %v2148_v9, 0.0 }
   0x4   :  { %v104_v2 = vsub.f32 0.0, %v81_v1  ;;  %v105_v6 = vsub.f32 0.0, %v82_v5  ;;  %v106_v12 = vsub.f32 0.0, %v83_v11  ;;  %v84_v23 = vand.u32 2147483647, %v2154_v20  ;;  %v12_v40 = vld [vmem:[%s3176_s0] sm:$0xff] }
   0x5   :  { %v85_v41 = vand.u32 2147483647, %v2160_v37  ;;  %v495_v45 = vmul.f32 %v12_v40, %v12_v40  ;;  %v2172_v62 = vld [vmem:[%s3177_s1 + $0x28] sm:$0xff]  ;;  %v496_v1 = vmul.f32 %v13_v57, %v13_v57  ;;  %v635_v5 = vshrl.u32 %v634_v56, 7 }
   0x6   :  { %v127_v4 = vmul.f32 1.442695, %v104_v2  ;;  %v129_v7 = vmul.f32 1.442695, %v105_v6  ;;  %v131_v15 = vmul.f32 1.442695, %v106_v12 }
   0x7   :  { %v107_v27 = vsub.f32 0.0, %v84_v23  ;;  %v108_v47 = vsub.f32 0.0, %v85_v41  ;;  %v86_v6 = vand.u32 2147483647, %v2172_v62 }
   0x8   :  { %1961 = vpow2.f32 %v127_v4 }
   0x9   :  { %1963 = vpow2.f32 %v129_v7  ;;  %v133_v33 = vmul.f32 1.442695, %v107_v27  ;;  %v135_v53 = vmul.f32 1.442695, %v108_v47  ;;  %v109_v9 = vsub.f32 0.0, %v86_v6 }
   0xa   :  { %v2194_v27 = vsub.s32 4, %v635_v5 }
  0x12   :  { %v1962_v8 = vpop.eup %1961 }
  0x13   :  { %v173_v10 = vadd.f32 1.0, %v1962_v8  ;;  %v1964_v13 = vpop.eup %1963  ;;  %v176_v14 = vmul.f32 -0.5, %v1962_v8  ;;  %v179_v19 = vand.u32 2147483647, %v1962_v8 }
  0x14   :  { %v182_v16 = vadd.f32 1.0, %v1964_v13  ;;  %v185_v25 = vmul.f32 -0.5, %v1964_v13  ;;  %v188_v32 = vand.u32 2147483647, %v1964_v13 }
  0x15   :  { %1965 = vlog2.f32 %v173_v10  ;;  %v177_v17 = vadd.f32 1.0, %v176_v14  ;;  %vm180_vm0 = vcmp.lt.f32.partialorder %v179_v19, 0.0004427343  ;;  %v2180_v14 = vsub.s32 1, %v635_v5 }
  0x16   :  { %1967 = vpow2.f32 %v131_v15  ;;  %v186_v29 = vadd.f32 1.0, %v185_v25  ;;  %vm189_vm1 = vcmp.lt.f32.partialorder %v188_v32, 0.0004427343  ;;  %v2182_v15 = vsub.s32 2, %v635_v5 }
  0x17   :  { %1969 = vlog2.f32 %v182_v16  ;;  %v178_v22 = vmul.f32 %v1962_v8, %v177_v17  ;;  %v2184_v17 = vsub.s32 3, %v635_v5  ;;  %v2201_v32 = vsub.s32 6, %v635_v5 }
  0x18   :  { %v187_v35 = vmul.f32 %v1964_v13, %v186_v29  ;;  %v2178_v13 = vsub.s32 0, %v635_v5 }
  0x1f   :  { %v1966_v18 = vpop.eup %1965 }
  0x20   :  { %v175_v21 = vmul.f32 0.6931472, %v1966_v18  ;;  %v1968_v28 = vpop.eup %1967 }
  0x21   :  { %v1970_v31 = vpop.eup %1969  ;;  %v191_v36 = vadd.f32 1.0, %v1968_v28  ;;  %v194_v43 = vmul.f32 -0.5, %v1968_v28  ;;  %v197_v54 = vand.u32 2147483647, %v1968_v28 }
  0x22   :  { %v181_v26 = vsel %vm180_vm0, %v178_v22, %v175_v21  ;;  %v184_v34 = vmul.f32 0.6931472, %v1970_v31  ;;  %v2199_v31 = vsub.s32 5, %v635_v5 }
  0x23   :  { %v380_v30 = vadd.f32 %v181_v26, %v58_v24  ;;  %v195_v49 = vadd.f32 1.0, %v194_v43  ;;  %vm198_vm2 = vcmp.lt.f32.partialorder %v197_v54, 0.0004427343 }
  0x24   :  { %v190_v39 = vsel %vm189_vm1, %v187_v35, %v184_v34 }
  0x25   :  { %1971 = vlog2.f32 %v380_v30  ;;  %v381_v42 = vadd.f32 %v190_v39, %v59_v38  ;;  %v472_v44 = vmul.f32 %v380_v30, %v380_v30  ;;  %v196_v59 = vmul.f32 %v1968_v28, %v195_v49  ;;  %v14_v38 = vld [vmem:[%s3176_s0 + $0x10] sm:$0xff] }
  0x26   :  { %1973 = vpow2.f32 %v133_v33  ;;  %v137_v28 = vmul.f32 1.442695, %v109_v9 }
  0x27   :  { %1975 = vlog2.f32 %v191_v36  ;;  %v518_v51 = vadd.f32 %v495_v45, %v472_v44  ;;  %v473_v0 = vmul.f32 %v381_v42, %v381_v42  ;;  %v2218_v44 = vld [vmem:[%s3177_s1 + $0x30] sm:$0xff] }
  0x28   :  { %1977 = vlog2.f32 %v381_v42  ;;  %v87_v57 = vand.u32 2147483647, %v2218_v44 }
  0x29   :  { %v542_v61 = vmul.f32 0.5, %v518_v51  ;;  %1979 = vpow2.f32 %v135_v53  ;;  %v519_v11 = vadd.f32 %v496_v1, %v473_v0 }
  0x2b   :  { %v543_v22 = vmul.f32 0.5, %v519_v11 }
  0x2f   :  { %v1972_v46 = vpop.eup %1971 }
  0x30   :  { %v1974_v48 = vpop.eup %1973  ;;  %v404_v50 = vmul.f32 0.6931472, %v1972_v46  ;;  %v2222_v46 = vsub.s32 7, %v635_v5 }
  0x31   :  { %v1976_v52 = vpop.eup %1975  ;;  %v200_v55 = vadd.f32 1.0, %v1974_v48  ;;  %v203_v7 = vmul.f32 -0.5, %v1974_v48  ;;  %v206_v16 = vand.u32 2147483647, %v1974_v48 }
  0x32   :  { %v193_v58 = vmul.f32 0.6931472, %v1976_v52  ;;  %v449_v60 = vsub.f32 0.0, %v404_v50  ;;  %v1978_v2 = vpop.eup %1977  ;;  %v497_v50 = vmul.f32 %v14_v38, %v14_v38 }
  0x33   :  { %1981 = vlog2.f32 %v200_v55  ;;  %v406_v10 = vmul.f32 0.6931472, %v1978_v2  ;;  %v2186_v18 = vpop.eup %1979  ;;  %v204_v19 = vadd.f32 1.0, %v203_v7  ;;  %vm2203_vm4 = vcmp.lt.f32.partialorder %v206_v16, 0.0004427343 }
  0x34   :  { %v199_v3 = vsel %vm198_vm2, %v196_v59, %v193_v58  ;;  %v565_v4 = vadd.f32 %v542_v61, %v449_v60  ;;  %v209_v29 = vadd.f32 1.0, %v2186_v18  ;;  %v212_v60 = vmul.f32 -0.5, %v2186_v18 }
  0x35   :  { %v382_v8 = vadd.f32 %v199_v3, %v60_v63  ;;  %v450_v21 = vsub.f32 0.0, %v406_v10  ;;  %v205_v34 = vmul.f32 %v1974_v48, %v204_v19  ;;  %v61_v48 = vmax.f32 %v2154_v20, 0.0 }
  0x36   :  { %v2176_v12 = vadd.f32 -0.5, %v565_v4  ;;  %v110_v4 = vsub.f32 0.0, %v87_v57  ;;  %v213_v10 = vadd.f32 1.0, %v212_v60  ;;  %v215_v11 = vand.u32 2147483647, %v2186_v18 }
  0x37   :  { %1983 = vlog2.f32 %v382_v8  ;;  %v566_v36 = vadd.f32 %v543_v22, %v450_v21  ;;  %v474_v52 = vmul.f32 %v382_v8, %v382_v8 }
  0x38   :  { %v637_v24 = vrot.slane %v2176_v12, %v2178_v13  ;;  %v641_v25 = vrot.slane %v2176_v12, %v2180_v14  ;;  %v645_v26 = vrot.slane %v2176_v12, %v2182_v15  ;;  %v649_v30 = vrot.slane %v2176_v12, %v2184_v17 }
  0x39   :  { %v653_v39 = vrot.slane %v2176_v12, %v2194_v27  ;;  %1985 = vpow2.f32 %v137_v28  ;;  %v657_v45 = vrot.slane %v2176_v12, %v2199_v31  ;;  %v2228_v53 = vadd.f32 -0.5, %v566_v36 }
  0x3a   :  { %v1545_v40 = vsel %vm1544_vm3, %v637_v24, 0.0  ;;  %v1546_v41 = vsel %vm1544_vm3, %v641_v25, 0.0  ;;  %v1548_v42 = vsel %vm1544_vm3, %v645_v26, 0.0  ;;  %1987 = vlog2.f32 %v209_v29 }
  0x3b   :  { %v1547_v43 = vadd.f32 %v1546_v41, %v1545_v40  ;;  %v1550_v47 = vsel %vm1544_vm3, %v649_v30, 0.0  ;;  %v661_v54 = vrot.slane %v2176_v12, %v2201_v32  ;;  %v1552_v55 = vsel %vm1544_vm3, %v653_v39, 0.0 }
  0x3c   :  { %v665_v20 = vrot.slane %v2176_v12, %v2222_v46  ;;  %v1554_v59 = vsel %vm1544_vm3, %v657_v45, 0.0  ;;  %v520_v1 = vadd.f32 %v497_v50, %v474_v52  ;;  %v669_v2 = vrot.slane %v2228_v53, %v2178_v13 }
  0x3d   :  { %v1982_v23 = vpop.eup %1981  ;;  %v1549_v51 = vadd.f32 %v1548_v42, %v1547_v43  ;;  %v1556_v3 = vsel %vm1544_vm3, %v661_v54, 0.0  ;;  %v673_v6 = vrot.slane %v2228_v53, %v2180_v14  ;;  %v677_v21 = vrot.slane %v2228_v53, %v2182_v15 }
  0x3e   :  { %v202_v33 = vmul.f32 0.6931472, %v1982_v23  ;;  %v1558_v7 = vsel %vm1544_vm3, %v665_v20, 0.0  ;;  %v544_v19 = vmul.f32 0.5, %v520_v1  ;;  %v1560_v22 = vsel %vm1544_vm3, %v669_v2, 0.0 }
  0x3f   :  { %v1551_v58 = vadd.f32 %v1550_v47, %v1549_v51  ;;  %v139_v23 = vmul.f32 1.442695, %v110_v4  ;;  %v681_v26 = vrot.slane %v2228_v53, %v2184_v17  ;;  %v1562_v28 = vsel %vm1544_vm3, %v673_v6, 0.0 }
  0x40   :  { %v208_v49 = vsel %vm2203_vm4, %v205_v34, %v202_v33  ;;  %v214_v30 = vmul.f32 %v2186_v18, %v213_v10  ;;  %v15_v34 = vld [vmem:[%s3176_s0 + $0x18] sm:$0xff]  ;;  %vm2258_vm5 = vcmp.lt.f32.partialorder %v215_v11, 0.0004427343  ;;  %v685_v38 = vrot.slane %v2228_v53, %v2194_v27 }
  0x41   :  { %v1984_v56 = vpop.eup %1983  ;;  %v383_v61 = vadd.f32 %v208_v49, %v61_v48  ;;  %v1553_v63 = vadd.f32 %v1552_v55, %v1551_v58  ;;  %v1564_v39 = vsel %vm1544_vm3, %v677_v21, 0.0  ;;  %v2268_v18 = vld [vmem:[%s3177_s1 + $0x38] sm:$0xff]  ;;  %v689_v41 = vrot.slane %v2228_v53, %v2199_v31 }
  0x42   :  { %v408_v0 = vmul.f32 0.6931472, %v1984_v56  ;;  %v1566_v42 = vsel %vm1544_vm3, %v681_v26, 0.0  ;;  %v62_v43 = vmax.f32 %v2160_v37, 0.0  ;;  %v498_v47 = vmul.f32 %v15_v34, %v15_v34 }
  0x43   :  { %v1555_v5 = vadd.f32 %v1554_v59, %v1553_v63  ;;  %v2244_v8 = vpop.eup %1985  ;;  %1989 = vlog2.f32 %v383_v61  ;;  %v475_v49 = vmul.f32 %v383_v61, %v383_v61  ;;  %v693_v51 = vrot.slane %v2228_v53, %v2201_v32 }
  0x44   :  { %v1988_v9 = vpop.eup %1987  ;;  %v451_v16 = vsub.f32 0.0, %v408_v0  ;;  %v218_v25 = vadd.f32 1.0, %v2244_v8  ;;  %1991 = vpow2.f32 %v139_v23  ;;  %v1568_v52 = vsel %vm1544_vm3, %v685_v38, 0.0 }
  0x45   :  { %v1557_v12 = vadd.f32 %v1556_v3, %v1555_v5  ;;  %v211_v29 = vmul.f32 0.6931472, %v1988_v9  ;;  %v88_v55 = vand.u32 2147483647, %v2268_v18  ;;  %v697_v37 = vrot.slane %v2228_v53, %v2222_v46 }
  0x46   :  { %v567_v36 = vadd.f32 %v544_v19, %v451_v16  ;;  %1993 = vlog2.f32 %v218_v25  ;;  %v1570_v57 = vsel %vm1544_vm3, %v689_v41, 0.0  ;;  %v221_v58 = vmul.f32 -0.5, %v2244_v8 }
  0x47   :  { %v1559_v24 = vadd.f32 %v1558_v7, %v1557_v12  ;;  %v217_v45 = vsel %vm2258_vm5, %v214_v30, %v211_v29  ;;  %v521_v61 = vadd.f32 %v498_v47, %v475_v49  ;;  %v1572_v0 = vsel %vm1544_vm3, %v693_v51, 0.0  ;;  %v16_v29 = vld [vmem:[%s3176_s0 + $0x20] sm:$0xff] }
  0x48   :  { %v2276_v50 = vadd.f32 -0.5, %v567_v36  ;;  %v384_v20 = vadd.f32 %v217_v45, %v62_v43  ;;  %v111_v1 = vsub.f32 0.0, %v88_v55  ;;  %v1574_v53 = vsel %vm1544_vm3, %v697_v37, 0.0 }
  0x49   :  { %v1561_v33 = vadd.f32 %v1560_v22, %v1559_v24  ;;  %v222_v5 = vadd.f32 1.0, %v221_v58  ;;  %v224_v6 = vand.u32 2147483647, %v2244_v8  ;;  %v545_v12 = vmul.f32 0.5, %v521_v61 }
  0x4a   :  { %v701_v63 = vrot.slane %v2276_v50, %v2178_v13  ;;  %v705_v3 = vrot.slane %v2276_v50, %v2180_v14  ;;  %1995 = vlog2.f32 %v384_v20  ;;  %v709_v9 = vrot.slane %v2276_v50, %v2182_v15 }
  0x4b   :  { %v1563_v40 = vadd.f32 %v1562_v28, %v1561_v33  ;;  %v141_v19 = vmul.f32 1.442695, %v111_v1  ;;  %v713_v23 = vrot.slane %v2276_v50, %v2184_v17  ;;  %v223_v26 = vmul.f32 %v2244_v8, %v222_v5  ;;  %v2316_v8 = vld [vmem:[%s3177_s1 + $0x40] sm:$0xff] }
  0x4c   :  { %v1576_v16 = vsel %vm1544_vm3, %v701_v63, 0.0  ;;  %v1578_v24 = vsel %vm1544_vm3, %v705_v3, 0.0  ;;  %vm2306_vm6 = vcmp.lt.f32.partialorder %v224_v6, 0.0004427343  ;;  %v717_v34 = vrot.slane %v2276_v50, %v2194_v27 }
  0x4d   :  { %v1565_v48 = vadd.f32 %v1564_v39, %v1563_v40  ;;  %v1990_v54 = vpop.eup %1989  ;;  %v1580_v35 = vsel %vm1544_vm3, %v709_v9, 0.0  ;;  %1997 = vpow2.f32 %v141_v19  ;;  %v721_v38 = vrot.slane %v2276_v50, %v2199_v31 }
  0x4e   :  { %v410_v60 = vmul.f32 0.6931472, %v1990_v54  ;;  %v2292_v4 = vpop.eup %1991  ;;  %v1582_v39 = vsel %vm1544_vm3, %v713_v23, 0.0  ;;  %v63_v40 = vmax.f32 %v2172_v62, 0.0  ;;  %v476_v45 = vmul.f32 %v384_v20, %v384_v20 }
  0x4f   :  { %v1567_v56 = vadd.f32 %v1566_v42, %v1565_v48  ;;  %v227_v22 = vadd.f32 1.0, %v2292_v4  ;;  %v499_v42 = vmul.f32 %v16_v29, %v16_v29  ;;  %v725_v48 = vrot.slane %v2276_v50, %v2201_v32 }
  0x50   :  { %v1994_v10 = vpop.eup %1993  ;;  %v452_v11 = vsub.f32 0.0, %v410_v60  ;;  %v1584_v49 = vsel %vm1544_vm3, %v717_v34, 0.0  ;;  %v729_v62 = vrot.slane %v2276_v50, %v2222_v46  ;;  %v1586_v55 = vsel %vm1544_vm3, %v721_v38, 0.0 }
  0x51   :  { %v1569_v59 = vadd.f32 %v1568_v52, %v1567_v56  ;;  %v220_v25 = vmul.f32 0.6931472, %v1994_v10  ;;  %1999 = vlog2.f32 %v227_v22  ;;  %v89_v52 = vand.u32 2147483647, %v2316_v8 }
  0x52   :  { %v568_v33 = vadd.f32 %v545_v12, %v452_v11  ;;  %v230_v56 = vmul.f32 -0.5, %v2292_v4  ;;  %v522_v20 = vadd.f32 %v499_v42, %v476_v45  ;;  %v1588_v60 = vsel %vm1544_vm3, %v725_v48, 0.0 }
  0x53   :  { %v1571_v2 = vadd.f32 %v1570_v57, %v1569_v59  ;;  %v226_v41 = vsel %vm2306_vm6, %v223_v26, %v220_v25  ;;  %v112_v61 = vsub.f32 0.0, %v89_v52  ;;  %v1590_v50 = vsel %vm1544_vm3, %v729_v62, 0.0  ;;  %v17_v25 = vld [vmem:[%s3176_s0 + $0x28] sm:$0xff] }
  0x54   :  { %v2324_v47 = vadd.f32 -0.5, %v568_v33  ;;  %v1996_v51 = vpop.eup %1995  ;;  %v385_v37 = vadd.f32 %v226_v41, %v63_v40  ;;  %v233_v3 = vand.u32 2147483647, %v2292_v4 }
  0x55   :  { %v1573_v7 = vadd.f32 %v1572_v0, %v1571_v2  ;;  %v412_v58 = vmul.f32 0.6931472, %v1996_v51  ;;  %v231_v2 = vadd.f32 1.0, %v230_v56  ;;  %v143_v12 = vmul.f32 1.442695, %v112_v61 }
  0x56   :  { %v733_v59 = vrot.slane %v2324_v47, %v2178_v13  ;;  %v737_v0 = vrot.slane %v2324_v47, %v2180_v14  ;;  %2001 = vlog2.f32 %v385_v37  ;;  %v741_v10 = vrot.slane %v2324_v47, %v2182_v15 }
  0x57   :  { %v1575_v21 = vadd.f32 %v1574_v53, %v1573_v7  ;;  %v2340_v1 = vpop.eup %1997  ;;  %v453_v6 = vsub.f32 0.0, %v412_v58  ;;  %v546_v7 = vmul.f32 0.5, %v522_v20  ;;  %v745_v19 = vrot.slane %v2324_v47, %v2184_v17 }
  0x58   :  { %v1592_v11 = vsel %vm1544_vm3, %v733_v59, 0.0  ;;  %v232_v23 = vmul.f32 %v2292_v4, %v231_v2  ;;  %vm2354_vm7 = vcmp.lt.f32.partialorder %v233_v3, 0.0004427343  ;;  %v749_v29 = vrot.slane %v2324_v47, %v2194_v27  ;;  %v2364_v4 = vld [vmem:[%s3177_s1 + $0x48] sm:$0xff] }
  0x59   :  { %v1577_v28 = vadd.f32 %v1576_v16, %v1575_v21  ;;  %v236_v16 = vadd.f32 1.0, %v2340_v1  ;;  %v1594_v21 = vsel %vm1544_vm3, %v737_v0, 0.0  ;;  %v1596_v30 = vsel %vm1544_vm3, %v741_v10, 0.0 }
  0x5a   :  { %2003 = vpow2.f32 %v143_v12  ;;  %v753_v34 = vrot.slane %v2324_v47, %v2199_v31  ;;  %v477_v41 = vmul.f32 %v385_v37, %v385_v37  ;;  %v1600_v45 = vsel %vm1544_vm3, %v749_v29, 0.0 }
  0x5b   :  { %v1579_v36 = vadd.f32 %v1578_v24, %v1577_v28  ;;  %v2000_v5 = vpop.eup %1999  ;;  %v569_v28 = vadd.f32 %v546_v7, %v453_v6  ;;  %2005 = vlog2.f32 %v236_v16  ;;  %v242_v0 = vand.u32 2147483647, %v2340_v1 }
  0x5c   :  { %v229_v22 = vmul.f32 0.6931472, %v2000_v5  ;;  %v1602_v52 = vsel %vm1544_vm3, %v753_v34, 0.0 }
  0x5d   :  { %v1581_v43 = vadd.f32 %v1580_v35, %v1579_v36  ;;  %v1598_v35 = vsel %vm1544_vm3, %v745_v19, 0.0  ;;  %v64_v36 = vmax.f32 %v2218_v44, 0.0  ;;  %v2372_v42 = vadd.f32 -0.5, %v569_v28 }
  0x5e   :  { %v235_v38 = vsel %vm2354_vm7, %v232_v23, %v229_v22  ;;  %v761_v44 = vrot.slane %v2324_v47, %v2222_v46  ;;  %v18_v22 = vld [vmem:[%s3176_s0 + $0x30] sm:$0xff]  ;;  %vm2402_vm8 = vcmp.lt.f32.partialorder %v242_v0, 0.0004427343 }
  0x5f   :  { %v1583_v54 = vadd.f32 %v1582_v39, %v1581_v43  ;;  %v500_v39 = vmul.f32 %v17_v25, %v17_v25  ;;  %v757_v43 = vrot.slane %v2324_v47, %v2201_v32  ;;  %v386_v62 = vadd.f32 %v235_v38, %v64_v36 }
  0x60   :  { %v2002_v48 = vpop.eup %2001  ;;  %v1606_v47 = vsel %vm1544_vm3, %v761_v44, 0.0  ;;  %v773_v5 = vrot.slane %v2372_v42, %v2182_v15  ;;  %v777_v12 = vrot.slane %v2372_v42, %v2184_v17  ;;  %v781_v25 = vrot.slane %v2372_v42, %v2194_v27 }
  0x61   :  { %v1585_v57 = vadd.f32 %v1584_v49, %v1583_v54  ;;  %v90_v49 = vand.u32 2147483647, %v2364_v4  ;;  %v239_v54 = vmul.f32 -0.5, %v2340_v1  ;;  %v414_v56 = vmul.f32 0.6931472, %v2002_v48 }
  0x62   :  { %v523_v37 = vadd.f32 %v500_v39, %v477_v41  ;;  %v1604_v58 = vsel %vm1544_vm3, %v757_v43, 0.0  ;;  %2007 = vlog2.f32 %v386_v62  ;;  %v1612_v26 = vsel %vm1544_vm3, %v773_v5, 0.0 }
  0x63   :  { %v1587_v63 = vadd.f32 %v1586_v55, %v1585_v57  ;;  %v765_v57 = vrot.slane %v2372_v42, %v2178_v13  ;;  %v113_v20 = vsub.f32 0.0, %v90_v49  ;;  %v454_v3 = vsub.f32 0.0, %v414_v56 }
  0x64   :  { %v2388_v61 = vpop.eup %2003  ;;  %v785_v29 = vrot.slane %v2372_v42, %v2199_v31  ;;  %v478_v38 = vmul.f32 %v386_v62, %v386_v62  ;;  %v1616_v41 = vsel %vm1544_vm3, %v781_v25, 0.0 }
  0x65   :  { %v1589_v53 = vadd.f32 %v1588_v60, %v1587_v63  ;;  %v769_v60 = vrot.slane %v2372_v42, %v2180_v14  ;;  %v240_v63 = vadd.f32 1.0, %v239_v54  ;;  %v2006_v2 = vpop.eup %2005  ;;  %v1608_v6 = vsel %vm1544_vm3, %v765_v57, 0.0 }
  0x66   :  { %v145_v7 = vmul.f32 1.442695, %v113_v20  ;;  %v238_v16 = vmul.f32 0.6931472, %v2006_v2  ;;  %v1618_v49 = vsel %vm1544_vm3, %v785_v29, 0.0 }
  0x67   :  { %v1591_v9 = vadd.f32 %v1590_v50, %v1589_v53  ;;  %v547_v53 = vmul.f32 0.5, %v523_v37  ;;  %v241_v19 = vmul.f32 %v2340_v1, %v240_v63  ;;  %v2412_v1 = vld [vmem:[%s3177_s1 + $0x50] sm:$0xff] }
  0x68   :  { %2009 = vpow2.f32 %v145_v7 }
  0x69   :  { %v1593_v24 = vadd.f32 %v1592_v11, %v1591_v9  ;;  %v245_v11 = vadd.f32 1.0, %v2388_v61  ;;  %v1610_v9 = vsel %vm1544_vm3, %v769_v60, 0.0  ;;  %v244_v34 = vsel %vm2402_vm8, %v241_v19, %v238_v16  ;;  %v19_v16 = vld [vmem:[%s3176_s0 + $0x38] sm:$0xff] }
  0x6a   :  { %v251_v60 = vand.u32 2147483647, %v2388_v61 }
  0x6b   :  { %v1595_v33 = vadd.f32 %v1594_v21, %v1593_v24  ;;  %v570_v24 = vadd.f32 %v547_v53, %v454_v3  ;;  %2011 = vlog2.f32 %v245_v11 }
  0x6c   :  { %v2008_v43 = vpop.eup %2007  ;;  %vm2450_vm9 = vcmp.lt.f32.partialorder %v251_v60, 0.0004427343 }
  0x6d   :  { %v1597_v40 = vadd.f32 %v1596_v30, %v1595_v33  ;;  %v1614_v30 = vsel %vm1544_vm3, %v777_v12, 0.0  ;;  %v65_v33 = vmax.f32 %v2268_v18, 0.0  ;;  %v2420_v39 = vadd.f32 -0.5, %v570_v24 }
  0x6e   :  { %v793_v18 = vrot.slane %v2372_v42, %v2222_v46  ;;  %v416_v54 = vmul.f32 0.6931472, %v2008_v43 }
  0x6f   :  { %v1599_v51 = vadd.f32 %v1598_v35, %v1597_v40  ;;  %v501_v35 = vmul.f32 %v18_v22, %v18_v22  ;;  %v789_v40 = vrot.slane %v2372_v42, %v2201_v32  ;;  %v387_v44 = vadd.f32 %v244_v34, %v65_v33 }
  0x70   :  { %v1622_v42 = vsel %vm1544_vm3, %v793_v18, 0.0  ;;  %v455_v0 = vsub.f32 0.0, %v416_v54  ;;  %v805_v2 = vrot.slane %v2420_v39, %v2182_v15  ;;  %v809_v7 = vrot.slane %v2420_v39, %v2184_v17 }
  0x71   :  { %v1601_v55 = vadd.f32 %v1600_v45, %v1599_v51  ;;  %v91_v45 = vand.u32 2147483647, %v2412_v1  ;;  %v248_v51 = vmul.f32 -0.5, %v2388_v61  ;;  %v524_v62 = vadd.f32 %v501_v35, %v478_v38 }
  0x72   :  { %v1620_v56 = vsel %vm1544_vm3, %v789_v40, 0.0  ;;  %v2436_v20 = vpop.eup %2009  ;;  %2013 = vlog2.f32 %v387_v44  ;;  %v813_v22 = vrot.slane %v2420_v39, %v2194_v27  ;;  %v1628_v23 = vsel %vm1544_vm3, %v805_v2, 0.0 }
  0x73   :  { %v1603_v59 = vadd.f32 %v1602_v52, %v1601_v55  ;;  %v797_v55 = vrot.slane %v2420_v39, %v2178_v13  ;;  %v114_v37 = vsub.f32 0.0, %v91_v45  ;;  %v817_v25 = vrot.slane %v2420_v39, %v2199_v31 }
  0x74   :  { %v479_v34 = vmul.f32 %v387_v44, %v387_v44  ;;  %v1632_v38 = vsel %vm1544_vm3, %v813_v22, 0.0 }
  0x75   :  { %v1605_v50 = vadd.f32 %v1604_v58, %v1603_v59  ;;  %v801_v58 = vrot.slane %v2420_v39, %v2180_v14  ;;  %v249_v59 = vadd.f32 1.0, %v248_v51  ;;  %v2012_v63 = vpop.eup %2011  ;;  %v1624_v3 = vsel %vm1544_vm3, %v797_v55, 0.0 }
  0x76   :  { %v147_v53 = vmul.f32 1.442695, %v114_v37  ;;  %v247_v11 = vmul.f32 0.6931472, %v2012_v63  ;;  %v1634_v45 = vsel %vm1544_vm3, %v817_v25, 0.0 }
  0x77   :  { %v1607_v10 = vadd.f32 %v1606_v47, %v1605_v50  ;;  %v548_v50 = vmul.f32 0.5, %v524_v62  ;;  %v250_v12 = vmul.f32 %v2388_v61, %v249_v59  ;;  %v2460_v61 = vld [vmem:[%s3177_s1 + $0x58] sm:$0xff] }
  0x78   :  { %2015 = vpow2.f32 %v147_v53 }
  0x79   :  { %v1609_v21 = vadd.f32 %v1608_v6, %v1607_v10  ;;  %v254_v6 = vadd.f32 1.0, %v2436_v20  ;;  %v1626_v10 = vsel %vm1544_vm3, %v801_v58, 0.0  ;;  %v253_v29 = vsel %vm2450_vm9, %v250_v12, %v247_v11  ;;  %v20_v11 = vld [vmem:[%s3176_s0 + $0x40] sm:$0xff] }
  0x7a   :  { %v260_v58 = vand.u32 2147483647, %v2436_v20  ;;  %vm1906_vm9 = vcmask 409600  }
  0x7b   :  { %v1611_v28 = vadd.f32 %v1610_v9, %v1609_v21  ;;  %v571_v21 = vadd.f32 %v548_v50, %v455_v0  ;;  %2017 = vlog2.f32 %v254_v6 }
  0x7c   :  { %v2014_v40 = vpop.eup %2013  ;;  %vm2498_vm10 = vcmp.lt.f32.partialorder %v260_v58, 0.0004427343 }
  0x7d   :  { %v1613_v36 = vadd.f32 %v1612_v26, %v1611_v28  ;;  %v1630_v26 = vsel %vm1544_vm3, %v809_v7, 0.0  ;;  %v66_v28 = vmax.f32 %v2316_v8, 0.0  ;;  %v2468_v35 = vadd.f32 -0.5, %v571_v21 }
  0x7e   :  { %v825_v8 = vrot.slane %v2420_v39, %v2222_v46  ;;  %v418_v51 = vmul.f32 0.6931472, %v2014_v40 }
  0x7f   :  { %v1615_v48 = vadd.f32 %v1614_v30, %v1613_v36  ;;  %v502_v30 = vmul.f32 %v19_v16, %v19_v16  ;;  %v821_v36 = vrot.slane %v2420_v39, %v2201_v32  ;;  %v388_v18 = vadd.f32 %v253_v29, %v66_v28 }
  0x80   :  { %v1638_v39 = vsel %vm1544_vm3, %v825_v8, 0.0  ;;  %v456_v60 = vsub.f32 0.0, %v418_v51  ;;  %v837_v63 = vrot.slane %v2468_v35, %v2182_v15  ;;  %v841_v53 = vrot.slane %v2468_v35, %v2184_v17 }
  0x81   :  { %v1617_v52 = vadd.f32 %v1616_v41, %v1615_v48  ;;  %v92_v41 = vand.u32 2147483647, %v2460_v61  ;;  %v257_v48 = vmul.f32 -0.5, %v2436_v20  ;;  %v525_v44 = vadd.f32 %v502_v30, %v479_v34 }
  0x82   :  { %v1636_v54 = vsel %vm1544_vm3, %v821_v36, 0.0  ;;  %v2484_v37 = vpop.eup %2015  ;;  %2019 = vlog2.f32 %v388_v18  ;;  %v845_v16 = vrot.slane %v2468_v35, %v2194_v27  ;;  %v1644_v19 = vsel %vm1544_vm3, %v837_v63, 0.0 }
  0x83   :  { %v1619_v57 = vadd.f32 %v1618_v49, %v1617_v52  ;;  %v829_v52 = vrot.slane %v2468_v35, %v2178_v13  ;;  %v115_v62 = vsub.f32 0.0, %v92_v41  ;;  %v849_v22 = vrot.slane %v2468_v35, %v2199_v31 }
  0x84   :  { %v480_v29 = vmul.f32 %v388_v18, %v388_v18  ;;  %v1648_v34 = vsel %vm1544_vm3, %v845_v16, 0.0 }
  0x85   :  { %v1621_v47 = vadd.f32 %v1620_v56, %v1619_v57  ;;  %v833_v56 = vrot.slane %v2468_v35, %v2180_v14  ;;  %v258_v57 = vadd.f32 1.0, %v257_v48  ;;  %v2018_v59 = vpop.eup %2017  ;;  %v1640_v0 = vsel %vm1544_vm3, %v829_v52, 0.0 }
  0x86   :  { %v149_v50 = vmul.f32 1.442695, %v115_v62  ;;  %v256_v6 = vmul.f32 0.6931472, %v2018_v59  ;;  %v1650_v41 = vsel %vm1544_vm3, %v849_v22, 0.0 }
  0x87   :  { %v1623_v5 = vadd.f32 %v1622_v42, %v1621_v47  ;;  %v549_v47 = vmul.f32 0.5, %v525_v44  ;;  %v259_v7 = vmul.f32 %v2436_v20, %v258_v57  ;;  %v2508_v20 = vld [vmem:[%s3177_s1 + $0x60] sm:$0xff] }
  0x88   :  { %2021 = vpow2.f32 %v149_v50 }
  0x89   :  { %v1625_v9 = vadd.f32 %v1624_v3, %v1623_v5  ;;  %v263_v3 = vadd.f32 1.0, %v2484_v37  ;;  %v1642_v5 = vsel %vm1544_vm3, %v833_v56, 0.0  ;;  %v262_v25 = vsel %vm2498_vm10, %v259_v7, %v256_v6  ;;  %v21_v6 = vld [vmem:[%s3176_s0 + $0x48] sm:$0xff] }
  0x8a   :  { %v269_v56 = vand.u32 2147483647, %v2484_v37  ;;  %vm1919_vm10 = vcmask 0  }
  0x8b   :  { %v1627_v24 = vadd.f32 %v1626_v10, %v1625_v9  ;;  %v572_v9 = vadd.f32 %v549_v47, %v456_v60  ;;  %2023 = vlog2.f32 %v263_v3 }
  0x8c   :  { %v2020_v36 = vpop.eup %2019  ;;  %vm2546_vm11 = vcmp.lt.f32.partialorder %v269_v56, 0.0004427343 }
  0x8d   :  { %v1629_v33 = vadd.f32 %v1628_v23, %v1627_v24  ;;  %v1646_v23 = vsel %vm1544_vm3, %v841_v53, 0.0  ;;  %v67_v24 = vmax.f32 %v2364_v4, 0.0  ;;  %v2516_v30 = vadd.f32 -0.5, %v572_v9 }
  0x8e   :  { %v857_v4 = vrot.slane %v2468_v35, %v2222_v46  ;;  %v420_v48 = vmul.f32 0.6931472, %v2020_v36 }
  0x8f   :  { %v1631_v43 = vadd.f32 %v1630_v26, %v1629_v33  ;;  %v503_v26 = vmul.f32 %v20_v11, %v20_v11  ;;  %v853_v33 = vrot.slane %v2468_v35, %v2201_v32  ;;  %v389_v8 = vadd.f32 %v262_v25, %v67_v24 }
  0x90   :  { %v1654_v35 = vsel %vm1544_vm3, %v857_v4, 0.0  ;;  %v457_v58 = vsub.f32 0.0, %v420_v48  ;;  %v869_v59 = vrot.slane %v2516_v30, %v2182_v15  ;;  %v873_v50 = vrot.slane %v2516_v30, %v2184_v17 }
  0x91   :  { %v1633_v49 = vadd.f32 %v1632_v38, %v1631_v43  ;;  %v93_v38 = vand.u32 2147483647, %v2508_v20  ;;  %v266_v43 = vmul.f32 -0.5, %v2484_v37  ;;  %v526_v18 = vadd.f32 %v503_v26, %v480_v29 }
  0x92   :  { %v1652_v51 = vsel %vm1544_vm3, %v853_v33, 0.0  ;;  %v2532_v62 = vpop.eup %2021  ;;  %2025 = vlog2.f32 %v389_v8  ;;  %v877_v11 = vrot.slane %v2516_v30, %v2194_v27  ;;  %v1660_v12 = vsel %vm1544_vm3, %v869_v59, 0.0 }
  0x93   :  { %v1635_v55 = vadd.f32 %v1634_v45, %v1633_v49  ;;  %v861_v49 = vrot.slane %v2516_v30, %v2178_v13  ;;  %v116_v44 = vsub.f32 0.0, %v93_v38  ;;  %v881_v16 = vrot.slane %v2516_v30, %v2199_v31 }
  0x94   :  { %v481_v25 = vmul.f32 %v389_v8, %v389_v8  ;;  %v1664_v29 = vsel %vm1544_vm3, %v877_v11, 0.0 }
  0x95   :  { %v1637_v42 = vadd.f32 %v1636_v54, %v1635_v55  ;;  %v865_v54 = vrot.slane %v2516_v30, %v2180_v14  ;;  %v267_v55 = vadd.f32 1.0, %v266_v43  ;;  %v2024_v57 = vpop.eup %2023  ;;  %v1656_v60 = vsel %vm1544_vm3, %v861_v49, 0.0 }
  0x96   :  { %v151_v47 = vmul.f32 1.442695, %v116_v44  ;;  %v265_v3 = vmul.f32 0.6931472, %v2024_v57  ;;  %v1666_v38 = vsel %vm1544_vm3, %v881_v16, 0.0 }
  0x97   :  { %v1639_v2 = vadd.f32 %v1638_v39, %v1637_v42  ;;  %v550_v42 = vmul.f32 0.5, %v526_v18  ;;  %v268_v53 = vmul.f32 %v2484_v37, %v267_v55  ;;  %v2556_v37 = vld [vmem:[%s3177_s1 + $0x68] sm:$0xff] }
  0x98   :  { %2027 = vpow2.f32 %v151_v47 }
  0x99   :  { %v1641_v10 = vadd.f32 %v1640_v0, %v1639_v2  ;;  %v272_v0 = vadd.f32 1.0, %v2532_v62  ;;  %v1658_v2 = vsel %vm1544_vm3, %v865_v54, 0.0  ;;  %v271_v22 = vsel %vm2546_vm11, %v268_v53, %v265_v3  ;;  %v22_v3 = vld [vmem:[%s3176_s0 + $0x50] sm:$0xff] }
  0x9a   :  { %v278_v54 = vand.u32 2147483647, %v2532_v62 }
  0x9b   :  { %v1643_v21 = vadd.f32 %v1642_v5, %v1641_v10  ;;  %v573_v10 = vadd.f32 %v550_v42, %v457_v58  ;;  %2029 = vlog2.f32 %v272_v0 }
  0x9c   :  { %v2026_v33 = vpop.eup %2025  ;;  %vm2594_vm12 = vcmp.lt.f32.partialorder %v278_v54, 0.0004427343 }
  0x9d   :  { %v1645_v28 = vadd.f32 %v1644_v19, %v1643_v21  ;;  %v1662_v19 = vsel %vm1544_vm3, %v873_v50, 0.0  ;;  %v68_v21 = vmax.f32 %v2412_v1, 0.0  ;;  %v2564_v26 = vadd.f32 -0.5, %v573_v10 }
  0x9e   :  { %v889_v1 = vrot.slane %v2516_v30, %v2222_v46  ;;  %v422_v43 = vmul.f32 0.6931472, %v2026_v33 }
  0x9f   :  { %v1647_v40 = vadd.f32 %v1646_v23, %v1645_v28  ;;  %v504_v23 = vmul.f32 %v21_v6, %v21_v6  ;;  %v885_v28 = vrot.slane %v2516_v30, %v2201_v32  ;;  %v390_v4 = vadd.f32 %v271_v22, %v68_v21 }
  0xa0   :  { %v1670_v30 = vsel %vm1544_vm3, %v889_v1, 0.0  ;;  %v458_v56 = vsub.f32 0.0, %v422_v43  ;;  %v901_v57 = vrot.slane %v2564_v26, %v2182_v15  ;;  %v905_v47 = vrot.slane %v2564_v26, %v2184_v17 }
  0xa1   :  { %v1649_v45 = vadd.f32 %v1648_v34, %v1647_v40  ;;  %v94_v34 = vand.u32 2147483647, %v2556_v37  ;;  %v275_v40 = vmul.f32 -0.5, %v2532_v62  ;;  %v527_v8 = vadd.f32 %v504_v23, %v481_v25 }
  0xa2   :  { %v1668_v48 = vsel %vm1544_vm3, %v885_v28, 0.0  ;;  %v2580_v44 = vpop.eup %2027  ;;  %2031 = vlog2.f32 %v390_v4  ;;  %v909_v6 = vrot.slane %v2564_v26, %v2194_v27  ;;  %v1676_v7 = vsel %vm1544_vm3, %v901_v57, 0.0 }
  0xa3   :  { %v1651_v52 = vadd.f32 %v1650_v41, %v1649_v45  ;;  %v893_v45 = vrot.slane %v2564_v26, %v2178_v13  ;;  %v117_v18 = vsub.f32 0.0, %v94_v34  ;;  %v913_v11 = vrot.slane %v2564_v26, %v2199_v31 }
  0xa4   :  { %v482_v22 = vmul.f32 %v390_v4, %v390_v4  ;;  %v1680_v25 = vsel %vm1544_vm3, %v909_v6, 0.0 }
  0xa5   :  { %v1653_v39 = vadd.f32 %v1652_v51, %v1651_v52  ;;  %v897_v51 = vrot.slane %v2564_v26, %v2180_v14  ;;  %v276_v52 = vadd.f32 1.0, %v275_v40  ;;  %v2030_v55 = vpop.eup %2029  ;;  %v1672_v58 = vsel %vm1544_vm3, %v893_v45, 0.0 }
  0xa6   :  { %v153_v42 = vmul.f32 1.442695, %v117_v18  ;;  %v274_v0 = vmul.f32 0.6931472, %v2030_v55  ;;  %v1682_v34 = vsel %vm1544_vm3, %v913_v11, 0.0 }
  0xa7   :  { %v1655_v63 = vadd.f32 %v1654_v35, %v1653_v39  ;;  %v551_v39 = vmul.f32 0.5, %v527_v8  ;;  %v277_v50 = vmul.f32 %v2532_v62, %v276_v52  ;;  %v2604_v62 = vld [vmem:[%s3177_s1 + $0x70] sm:$0xff] }
  0xa8   :  { %2033 = vpow2.f32 %v153_v42 }
  0xa9   :  { %v1657_v5 = vadd.f32 %v1656_v60, %v1655_v63  ;;  %v281_v60 = vadd.f32 1.0, %v2580_v44  ;;  %v1674_v63 = vsel %vm1544_vm3, %v897_v51, 0.0  ;;  %v280_v16 = vsel %vm2594_vm12, %v277_v50, %v274_v0  ;;  %v23_v0 = vld [vmem:[%s3176_s0 + $0x58] sm:$0xff] }
  0xaa   :  { %v287_v51 = vand.u32 2147483647, %v2580_v44 }
  0xab   :  { %v1659_v9 = vadd.f32 %v1658_v2, %v1657_v5  ;;  %v574_v5 = vadd.f32 %v551_v39, %v458_v56  ;;  %2035 = vlog2.f32 %v281_v60 }
  0xac   :  { %v2032_v28 = vpop.eup %2031  ;;  %vm2642_vm13 = vcmp.lt.f32.partialorder %v287_v51, 0.0004427343 }
  0xad   :  { %v1661_v24 = vadd.f32 %v1660_v12, %v1659_v9  ;;  %v1678_v12 = vsel %vm1544_vm3, %v905_v47, 0.0  ;;  %v69_v9 = vmax.f32 %v2460_v61, 0.0  ;;  %v2612_v23 = vadd.f32 -0.5, %v574_v5 }
  0xae   :  { %v921_v61 = vrot.slane %v2564_v26, %v2222_v46  ;;  %v424_v40 = vmul.f32 0.6931472, %v2032_v28 }
  0xaf   :  { %v1663_v36 = vadd.f32 %v1662_v19, %v1661_v24  ;;  %v505_v19 = vmul.f32 %v22_v3, %v22_v3  ;;  %v917_v24 = vrot.slane %v2564_v26, %v2201_v32  ;;  %v391_v1 = vadd.f32 %v280_v16, %v69_v9 }
  0xb0   :  { %v1686_v26 = vsel %vm1544_vm3, %v921_v61, 0.0  ;;  %v459_v54 = vsub.f32 0.0, %v424_v40  ;;  %v933_v55 = vrot.slane %v2612_v23, %v2182_v15  ;;  %v937_v42 = vrot.slane %v2612_v23, %v2184_v17 }
  0xb1   :  { %v1665_v41 = vadd.f32 %v1664_v29, %v1663_v36  ;;  %v95_v29 = vand.u32 2147483647, %v2604_v62  ;;  %v284_v36 = vmul.f32 -0.5, %v2580_v44  ;;  %v528_v4 = vadd.f32 %v505_v19, %v482_v22 }
  0xb2   :  { %v1684_v43 = vsel %vm1544_vm3, %v917_v24, 0.0  ;;  %v2628_v18 = vpop.eup %2033  ;;  %2037 = vlog2.f32 %v391_v1  ;;  %v941_v3 = vrot.slane %v2612_v23, %v2194_v27  ;;  %v1692_v53 = vsel %vm1544_vm3, %v933_v55, 0.0 }
  0xb3   :  { %v1667_v49 = vadd.f32 %v1666_v38, %v1665_v41  ;;  %v925_v41 = vrot.slane %v2612_v23, %v2178_v13  ;;  %v118_v8 = vsub.f32 0.0, %v95_v29  ;;  %v945_v6 = vrot.slane %v2612_v23, %v2199_v31 }
  0xb4   :  { %v483_v16 = vmul.f32 %v391_v1, %v391_v1  ;;  %v1696_v22 = vsel %vm1544_vm3, %v941_v3, 0.0 }
  0xb5   :  { %v1669_v35 = vadd.f32 %v1668_v48, %v1667_v49  ;;  %v929_v48 = vrot.slane %v2612_v23, %v2180_v14  ;;  %v285_v49 = vadd.f32 1.0, %v284_v36  ;;  %v2036_v52 = vpop.eup %2035  ;;  %v1688_v56 = vsel %vm1544_vm3, %v925_v41, 0.0 }
  0xb6   :  { %v155_v39 = vmul.f32 1.442695, %v118_v8  ;;  %v283_v60 = vmul.f32 0.6931472, %v2036_v52  ;;  %v1698_v29 = vsel %vm1544_vm3, %v945_v6, 0.0 }
  0xb7   :  { %v1671_v59 = vadd.f32 %v1670_v30, %v1669_v35  ;;  %v552_v35 = vmul.f32 0.5, %v528_v4  ;;  %v286_v47 = vmul.f32 %v2580_v44, %v285_v49  ;;  %v2652_v44 = vld [vmem:[%s3177_s1 + $0x78] sm:$0xff] }
  0xb8   :  { %2039 = vpow2.f32 %v155_v39 }
  0xb9   :  { %v1673_v2 = vadd.f32 %v1672_v58, %v1671_v59  ;;  %v290_v58 = vadd.f32 1.0, %v2628_v18  ;;  %v1690_v59 = vsel %vm1544_vm3, %v929_v48, 0.0  ;;  %v289_v11 = vsel %vm2642_vm13, %v286_v47, %v283_v60  ;;  %v24_v60 = vld [vmem:[%s3176_s0 + $0x60] sm:$0xff] }
  0xba   :  { %v296_v48 = vand.u32 2147483647, %v2628_v18 }
  0xbb   :  { %v1675_v10 = vadd.f32 %v1674_v63, %v1673_v2  ;;  %v575_v2 = vadd.f32 %v552_v35, %v459_v54  ;;  %2041 = vlog2.f32 %v290_v58 }
  0xbc   :  { %v2038_v24 = vpop.eup %2037  ;;  %vm2690_vm14 = vcmp.lt.f32.partialorder %v296_v48, 0.0004427343 }
  0xbd   :  { %v1677_v21 = vadd.f32 %v1676_v7, %v1675_v10  ;;  %v1694_v7 = vsel %vm1544_vm3, %v937_v42, 0.0  ;;  %v70_v10 = vmax.f32 %v2508_v20, 0.0  ;;  %v2660_v19 = vadd.f32 -0.5, %v575_v2 }
  0xbe   :  { %v953_v20 = vrot.slane %v2612_v23, %v2222_v46  ;;  %v426_v36 = vmul.f32 0.6931472, %v2038_v24 }
  0xbf   :  { %v1679_v33 = vadd.f32 %v1678_v12, %v1677_v21  ;;  %v506_v12 = vmul.f32 %v23_v0, %v23_v0  ;;  %v949_v21 = vrot.slane %v2612_v23, %v2201_v32  ;;  %v392_v61 = vadd.f32 %v289_v11, %v70_v10 }
  0xc0   :  { %v1702_v23 = vsel %vm1544_vm3, %v953_v20, 0.0  ;;  %v460_v51 = vsub.f32 0.0, %v426_v36  ;;  %v965_v52 = vrot.slane %v2660_v19, %v2182_v15  ;;  %v969_v39 = vrot.slane %v2660_v19, %v2184_v17 }
  0xc1   :  { %v1681_v38 = vadd.f32 %v1680_v25, %v1679_v33  ;;  %v96_v25 = vand.u32 2147483647, %v2652_v44  ;;  %v293_v33 = vmul.f32 -0.5, %v2628_v18  ;;  %v529_v1 = vadd.f32 %v506_v12, %v483_v16 }
  0xc2   :  { %v1700_v40 = vsel %vm1544_vm3, %v949_v21, 0.0  ;;  %v2676_v8 = vpop.eup %2039  ;;  %2043 = vlog2.f32 %v392_v61  ;;  %v973_v0 = vrot.slane %v2660_v19, %v2194_v27  ;;  %v1708_v50 = vsel %vm1544_vm3, %v965_v52, 0.0 }
  0xc3   :  { %v1683_v45 = vadd.f32 %v1682_v34, %v1681_v38  ;;  %v957_v38 = vrot.slane %v2660_v19, %v2178_v13  ;;  %v119_v4 = vsub.f32 0.0, %v96_v25  ;;  %v977_v3 = vrot.slane %v2660_v19, %v2199_v31 }
  0xc4   :  { %v484_v11 = vmul.f32 %v392_v61, %v392_v61  ;;  %v1712_v16 = vsel %vm1544_vm3, %v973_v0, 0.0 }
  0xc5   :  { %v1685_v30 = vadd.f32 %v1684_v43, %v1683_v45  ;;  %v961_v43 = vrot.slane %v2660_v19, %v2180_v14  ;;  %v294_v45 = vadd.f32 1.0, %v293_v33  ;;  %v2042_v49 = vpop.eup %2041  ;;  %v1704_v54 = vsel %vm1544_vm3, %v957_v38, 0.0 }
  0xc6   :  { %v157_v35 = vmul.f32 1.442695, %v119_v4  ;;  %v292_v58 = vmul.f32 0.6931472, %v2042_v49  ;;  %v1714_v25 = vsel %vm1544_vm3, %v977_v3, 0.0 }
  0xc7   :  { %v1687_v57 = vadd.f32 %v1686_v26, %v1685_v30  ;;  %v553_v30 = vmul.f32 0.5, %v529_v1  ;;  %v295_v42 = vmul.f32 %v2628_v18, %v294_v45  ;;  %v2700_v18 = vld [vmem:[%s3177_s1 + $0x80] sm:$0xff] }
  0xc8   :  { %2045 = vpow2.f32 %v157_v35 }
  0xc9   :  { %v1689_v63 = vadd.f32 %v1688_v56, %v1687_v57  ;;  %v299_v56 = vadd.f32 1.0, %v2676_v8  ;;  %v1706_v57 = vsel %vm1544_vm3, %v961_v43, 0.0  ;;  %v298_v6 = vsel %vm2690_vm14, %v295_v42, %v292_v58  ;;  %v25_v58 = vld [vmem:[%s3176_s0 + $0x68] sm:$0xff] }
  0xca   :  { %v305_v43 = vand.u32 2147483647, %v2676_v8 }
  0xcb   :  { %v1691_v5 = vadd.f32 %v1690_v59, %v1689_v63  ;;  %v576_v63 = vadd.f32 %v553_v30, %v460_v51  ;;  %2047 = vlog2.f32 %v299_v56 }
  0xcc   :  { %v2044_v21 = vpop.eup %2043  ;;  %vm2738_vm15 = vcmp.lt.f32.partialorder %v305_v43, 0.0004427343 }
  0xcd   :  { %v1693_v9 = vadd.f32 %v1692_v53, %v1691_v5  ;;  %v1710_v53 = vsel %vm1544_vm3, %v969_v39, 0.0  ;;  %v71_v5 = vmax.f32 %v2556_v37, 0.0  ;;  %v2708_v12 = vadd.f32 -0.5, %v576_v63 }
  0xce   :  { %v985_v37 = vrot.slane %v2660_v19, %v2222_v46  ;;  %v428_v33 = vmul.f32 0.6931472, %v2044_v21 }
  0xcf   :  { %v1695_v28 = vadd.f32 %v1694_v7, %v1693_v9  ;;  %v507_v7 = vmul.f32 %v24_v60, %v24_v60  ;;  %v981_v9 = vrot.slane %v2660_v19, %v2201_v32  ;;  %v393_v20 = vadd.f32 %v298_v6, %v71_v5 }
  0xd0   :  { %v1718_v19 = vsel %vm1544_vm3, %v985_v37, 0.0  ;;  %v461_v48 = vsub.f32 0.0, %v428_v33  ;;  %v997_v49 = vrot.slane %v2708_v12, %v2182_v15  ;;  %v1001_v35 = vrot.slane %v2708_v12, %v2184_v17 }
  0xd1   :  { %v1697_v34 = vadd.f32 %v1696_v22, %v1695_v28  ;;  %v97_v22 = vand.u32 2147483647, %v2700_v18  ;;  %v302_v28 = vmul.f32 -0.5, %v2676_v8  ;;  %v530_v61 = vadd.f32 %v507_v7, %v484_v11 }
  0xd2   :  { %v1716_v36 = vsel %vm1544_vm3, %v981_v9, 0.0  ;;  %v2724_v4 = vpop.eup %2045  ;;  %2049 = vlog2.f32 %v393_v20  ;;  %v1005_v60 = vrot.slane %v2708_v12, %v2194_v27  ;;  %v1724_v47 = vsel %vm1544_vm3, %v997_v49, 0.0 }
  0xd3   :  { %v1699_v41 = vadd.f32 %v1698_v29, %v1697_v34  ;;  %v989_v34 = vrot.slane %v2708_v12, %v2178_v13  ;;  %v120_v1 = vsub.f32 0.0, %v97_v22  ;;  %v1009_v0 = vrot.slane %v2708_v12, %v2199_v31 }
  0xd4   :  { %v485_v6 = vmul.f32 %v393_v20, %v393_v20  ;;  %v1728_v11 = vsel %vm1544_vm3, %v1005_v60, 0.0 }
  0xd5   :  { %v1701_v26 = vadd.f32 %v1700_v40, %v1699_v41  ;;  %v993_v40 = vrot.slane %v2708_v12, %v2180_v14  ;;  %v303_v41 = vadd.f32 1.0, %v302_v28  ;;  %v2048_v45 = vpop.eup %2047  ;;  %v1720_v51 = vsel %vm1544_vm3, %v989_v34, 0.0 }
  0xd6   :  { %v159_v30 = vmul.f32 1.442695, %v120_v1  ;;  %v301_v56 = vmul.f32 0.6931472, %v2048_v45  ;;  %v1730_v22 = vsel %vm1544_vm3, %v1009_v0, 0.0 }
  0xd7   :  { %v1703_v55 = vadd.f32 %v1702_v23, %v1701_v26  ;;  %v554_v26 = vmul.f32 0.5, %v530_v61  ;;  %v304_v39 = vmul.f32 %v2676_v8, %v303_v41  ;;  %v2748_v8 = vld [vmem:[%s3177_s1 + $0x88] sm:$0xff] }
  0xd8   :  { %2051 = vpow2.f32 %v159_v30 }
  0xd9   :  { %v1705_v59 = vadd.f32 %v1704_v54, %v1703_v55  ;;  %v308_v54 = vadd.f32 1.0, %v2724_v4  ;;  %v1722_v55 = vsel %vm1544_vm3, %v993_v40, 0.0  ;;  %v307_v3 = vsel %vm2738_vm15, %v304_v39, %v301_v56  ;;  %v26_v56 = vld [vmem:[%s3176_s0 + $0x70] sm:$0xff] }
  0xda   :  { %v314_v40 = vand.u32 2147483647, %v2724_v4 }
  0xdb   :  { %v1707_v2 = vadd.f32 %v1706_v57, %v1705_v59  ;;  %v577_v59 = vadd.f32 %v554_v26, %v461_v48  ;;  %2053 = vlog2.f32 %v308_v54 }
  0xdc   :  { %v2050_v9 = vpop.eup %2049  ;;  %vm2786_vm0 = vcmp.lt.f32.partialorder %v314_v40, 0.0004427343 }
  0xdd   :  { %v1709_v10 = vadd.f32 %v1708_v50, %v1707_v2  ;;  %v1726_v50 = vsel %vm1544_vm3, %v1001_v35, 0.0  ;;  %v72_v2 = vmax.f32 %v2604_v62, 0.0  ;;  %v2756_v7 = vadd.f32 -0.5, %v577_v59 }
  0xde   :  { %v1017_v62 = vrot.slane %v2708_v12, %v2222_v46  ;;  %v430_v28 = vmul.f32 0.6931472, %v2050_v9 }
  0xdf   :  { %v1711_v24 = vadd.f32 %v1710_v53, %v1709_v10  ;;  %v508_v53 = vmul.f32 %v25_v58, %v25_v58  ;;  %v1013_v10 = vrot.slane %v2708_v12, %v2201_v32  ;;  %v394_v37 = vadd.f32 %v307_v3, %v72_v2 }
  0xe0   :  { %v1734_v12 = vsel %vm1544_vm3, %v1017_v62, 0.0  ;;  %v462_v43 = vsub.f32 0.0, %v430_v28  ;;  %v1029_v45 = vrot.slane %v2756_v7, %v2182_v15  ;;  %v1033_v30 = vrot.slane %v2756_v7, %v2184_v17 }
  0xe1   :  { %v1713_v29 = vadd.f32 %v1712_v16, %v1711_v24  ;;  %v98_v16 = vand.u32 2147483647, %v2748_v8  ;;  %v311_v24 = vmul.f32 -0.5, %v2724_v4  ;;  %v531_v20 = vadd.f32 %v508_v53, %v485_v6 }
  0xe2   :  { %v1732_v33 = vsel %vm1544_vm3, %v1013_v10, 0.0  ;;  %v2772_v1 = vpop.eup %2051  ;;  %2055 = vlog2.f32 %v394_v37  ;;  %v1037_v58 = vrot.slane %v2756_v7, %v2194_v27  ;;  %v1740_v42 = vsel %vm1544_vm3, %v1029_v45, 0.0 }
  0xe3   :  { %v1715_v38 = vadd.f32 %v1714_v25, %v1713_v29  ;;  %v1021_v29 = vrot.slane %v2756_v7, %v2178_v13  ;;  %v121_v61 = vsub.f32 0.0, %v98_v16  ;;  %v1041_v60 = vrot.slane %v2756_v7, %v2199_v31 }
  0xe4   :  { %v486_v3 = vmul.f32 %v394_v37, %v394_v37  ;;  %v1744_v6 = vsel %vm1544_vm3, %v1037_v58, 0.0 }
  0xe5   :  { %v1717_v23 = vadd.f32 %v1716_v36, %v1715_v38  ;;  %v1025_v36 = vrot.slane %v2756_v7, %v2180_v14  ;;  %v312_v38 = vadd.f32 1.0, %v311_v24  ;;  %v2054_v41 = vpop.eup %2053  ;;  %v1736_v48 = vsel %vm1544_vm3, %v1021_v29, 0.0 }
  0xe6   :  { %v161_v26 = vmul.f32 1.442695, %v121_v61  ;;  %v310_v54 = vmul.f32 0.6931472, %v2054_v41  ;;  %v1746_v16 = vsel %vm1544_vm3, %v1041_v60, 0.0 }
  0xe7   :  { %v1719_v52 = vadd.f32 %v1718_v19, %v1717_v23  ;;  %v555_v23 = vmul.f32 0.5, %v531_v20  ;;  %v313_v35 = vmul.f32 %v2724_v4, %v312_v38  ;;  %v2796_v4 = vld [vmem:[%s3177_s1 + $0x90] sm:$0xff] }
  0xe8   :  { %2057 = vpow2.f32 %v161_v26 }
  0xe9   :  { %v1721_v57 = vadd.f32 %v1720_v51, %v1719_v52  ;;  %v317_v51 = vadd.f32 1.0, %v2772_v1  ;;  %v1738_v52 = vsel %vm1544_vm3, %v1025_v36, 0.0  ;;  %v316_v0 = vsel %vm2786_vm0, %v313_v35, %v310_v54  ;;  %v27_v54 = vld [vmem:[%s3176_s0 + $0x78] sm:$0xff] }
  0xea   :  { %v323_v36 = vand.u32 2147483647, %v2772_v1 }
  0xeb   :  { %v1723_v63 = vadd.f32 %v1722_v55, %v1721_v57  ;;  %v578_v57 = vadd.f32 %v555_v23, %v462_v43  ;;  %2059 = vlog2.f32 %v317_v51 }
  0xec   :  { %v2056_v10 = vpop.eup %2055  ;;  %vm2834_vm1 = vcmp.lt.f32.partialorder %v323_v36, 0.0004427343 }
  0xed   :  { %v1725_v5 = vadd.f32 %v1724_v47, %v1723_v63  ;;  %v1742_v47 = vsel %vm1544_vm3, %v1033_v30, 0.0  ;;  %v73_v63 = vmax.f32 %v2652_v44, 0.0  ;;  %v2804_v53 = vadd.f32 -0.5, %v578_v57 }
  0xee   :  { %v1049_v44 = vrot.slane %v2756_v7, %v2222_v46  ;;  %v432_v24 = vmul.f32 0.6931472, %v2056_v10 }
  0xef   :  { %v1727_v21 = vadd.f32 %v1726_v50, %v1725_v5  ;;  %v509_v50 = vmul.f32 %v26_v56, %v26_v56  ;;  %v1045_v5 = vrot.slane %v2756_v7, %v2201_v32  ;;  %v395_v62 = vadd.f32 %v316_v0, %v73_v63 }
  0xf0   :  { %v1750_v7 = vsel %vm1544_vm3, %v1049_v44, 0.0  ;;  %v463_v40 = vsub.f32 0.0, %v432_v24  ;;  %v1061_v41 = vrot.slane %v2804_v53, %v2182_v15  ;;  %v1065_v26 = vrot.slane %v2804_v53, %v2184_v17 }
  0xf1   :  { %v1729_v25 = vadd.f32 %v1728_v11, %v1727_v21  ;;  %v99_v11 = vand.u32 2147483647, %v2796_v4  ;;  %v320_v21 = vmul.f32 -0.5, %v2772_v1  ;;  %v532_v37 = vadd.f32 %v509_v50, %v486_v3 }
  0xf2   :  { %v1748_v28 = vsel %vm1544_vm3, %v1045_v5, 0.0  ;;  %v2820_v61 = vpop.eup %2057  ;;  %2061 = vlog2.f32 %v395_v62  ;;  %v1069_v56 = vrot.slane %v2804_v53, %v2194_v27  ;;  %v1756_v39 = vsel %vm1544_vm3, %v1061_v41, 0.0 }
  0xf3   :  { %v1731_v34 = vadd.f32 %v1730_v22, %v1729_v25  ;;  %v1053_v25 = vrot.slane %v2804_v53, %v2178_v13  ;;  %v122_v20 = vsub.f32 0.0, %v99_v11  ;;  %v1073_v58 = vrot.slane %v2804_v53, %v2199_v31 }
  0xf4   :  { %v487_v0 = vmul.f32 %v395_v62, %v395_v62  ;;  %v1760_v3 = vsel %vm1544_vm3, %v1069_v56, 0.0 }
  0xf5   :  { %v1733_v19 = vadd.f32 %v1732_v33, %v1731_v34  ;;  %v1057_v33 = vrot.slane %v2804_v53, %v2180_v14  ;;  %v321_v34 = vadd.f32 1.0, %v320_v21  ;;  %v2060_v38 = vpop.eup %2059  ;;  %v1752_v43 = vsel %vm1544_vm3, %v1053_v25, 0.0 }
  0xf6   :  { %v163_v23 = vmul.f32 1.442695, %v122_v20  ;;  %v319_v51 = vmul.f32 0.6931472, %v2060_v38  ;;  %v1762_v11 = vsel %vm1544_vm3, %v1073_v58, 0.0 }
  0xf7   :  { %v1735_v49 = vadd.f32 %v1734_v12, %v1733_v19  ;;  %v556_v19 = vmul.f32 0.5, %v532_v37  ;;  %v322_v30 = vmul.f32 %v2772_v1, %v321_v34  ;;  %v2844_v1 = vld [vmem:[%s3177_s1 + $0x98] sm:$0xff] }
  0xf8   :  { %2063 = vpow2.f32 %v163_v23 }
  0xf9   :  { %v1737_v55 = vadd.f32 %v1736_v48, %v1735_v49  ;;  %v326_v48 = vadd.f32 1.0, %v2820_v61  ;;  %v1754_v49 = vsel %vm1544_vm3, %v1057_v33, 0.0  ;;  %v325_v60 = vsel %vm2834_vm1, %v322_v30, %v319_v51  ;;  %v28_v51 = vld [vmem:[%s3176_s0 + $0x80] sm:$0xff] }
  0xfa   :  { %v332_v33 = vand.u32 2147483647, %v2820_v61 }
  0xfb   :  { %v1739_v59 = vadd.f32 %v1738_v52, %v1737_v55  ;;  %v579_v55 = vadd.f32 %v556_v19, %v463_v40  ;;  %2065 = vlog2.f32 %v326_v48 }
  0xfc   :  { %v2062_v5 = vpop.eup %2061  ;;  %vm2882_vm2 = vcmp.lt.f32.partialorder %v332_v33, 0.0004427343 }
  0xfd   :  { %v1741_v2 = vadd.f32 %v1740_v42, %v1739_v59  ;;  %v1758_v42 = vsel %vm1544_vm3, %v1065_v26, 0.0  ;;  %v74_v59 = vmax.f32 %v2700_v18, 0.0  ;;  %v2852_v50 = vadd.f32 -0.5, %v579_v55 }
  0xfe   :  { %v1081_v18 = vrot.slane %v2804_v53, %v2222_v46  ;;  %v434_v21 = vmul.f32 0.6931472, %v2062_v5 }
  0xff   :  { %v1743_v9 = vadd.f32 %v1742_v47, %v1741_v2  ;;  %v510_v47 = vmul.f32 %v27_v54, %v27_v54  ;;  %v1077_v2 = vrot.slane %v2804_v53, %v2201_v32  ;;  %v396_v44 = vadd.f32 %v325_v60, %v74_v59 }
 0x100   :  { %v1766_v53 = vsel %vm1544_vm3, %v1081_v18, 0.0  ;;  %v464_v36 = vsub.f32 0.0, %v434_v21  ;;  %v1093_v38 = vrot.slane %v2852_v50, %v2182_v15  ;;  %v1097_v23 = vrot.slane %v2852_v50, %v2184_v17 }
 0x101   :  { %v1745_v22 = vadd.f32 %v1744_v6, %v1743_v9  ;;  %v100_v6 = vand.u32 2147483647, %v2844_v1  ;;  %v329_v9 = vmul.f32 -0.5, %v2820_v61  ;;  %v533_v62 = vadd.f32 %v510_v47, %v487_v0 }
 0x102   :  { %v1764_v24 = vsel %vm1544_vm3, %v1077_v2, 0.0  ;;  %v2868_v20 = vpop.eup %2063  ;;  %2067 = vlog2.f32 %v396_v44  ;;  %v1101_v54 = vrot.slane %v2852_v50, %v2194_v27  ;;  %v1772_v35 = vsel %vm1544_vm3, %v1093_v38, 0.0 }
 0x103   :  { %v1747_v29 = vadd.f32 %v1746_v16, %v1745_v22  ;;  %v1085_v22 = vrot.slane %v2852_v50, %v2178_v13  ;;  %v123_v37 = vsub.f32 0.0, %v100_v6  ;;  %v1105_v56 = vrot.slane %v2852_v50, %v2199_v31 }
 0x104   :  { %v488_v60 = vmul.f32 %v396_v44, %v396_v44  ;;  %v1776_v0 = vsel %vm1544_vm3, %v1101_v54, 0.0 }
 0x105   :  { %v1749_v12 = vadd.f32 %v1748_v28, %v1747_v29  ;;  %v1089_v28 = vrot.slane %v2852_v50, %v2180_v14  ;;  %v330_v29 = vadd.f32 1.0, %v329_v9  ;;  %v2066_v34 = vpop.eup %2065  ;;  %v1768_v40 = vsel %vm1544_vm3, %v1085_v22, 0.0 }
 0x106   :  { %v165_v19 = vmul.f32 1.442695, %v123_v37  ;;  %v328_v48 = vmul.f32 0.6931472, %v2066_v34  ;;  %v1778_v6 = vsel %vm1544_vm3, %v1105_v56, 0.0 }
 0x107   :  { %v1751_v45 = vadd.f32 %v1750_v7, %v1749_v12  ;;  %v557_v12 = vmul.f32 0.5, %v533_v62  ;;  %v331_v26 = vmul.f32 %v2820_v61, %v330_v29  ;;  %v2892_v61 = vld [vmem:[%s3177_s1 + $0xa0] sm:$0xff] }
 0x108   :  { %2069 = vpow2.f32 %v165_v19 }
 0x109   :  { %v1753_v52 = vadd.f32 %v1752_v43, %v1751_v45  ;;  %v335_v43 = vadd.f32 1.0, %v2868_v20  ;;  %v1770_v45 = vsel %vm1544_vm3, %v1089_v28, 0.0  ;;  %v334_v58 = vsel %vm2882_vm2, %v331_v26, %v328_v48  ;;  %v29_v48 = vld [vmem:[%s3176_s0 + $0x88] sm:$0xff] }
 0x10a   :  { %v341_v28 = vand.u32 2147483647, %v2868_v20 }
 0x10b   :  { %v1755_v57 = vadd.f32 %v1754_v49, %v1753_v52  ;;  %v580_v52 = vadd.f32 %v557_v12, %v464_v36  ;;  %2071 = vlog2.f32 %v335_v43 }
 0x10c   :  { %v2068_v2 = vpop.eup %2067  ;;  %vm2930_vm4 = vcmp.lt.f32.partialorder %v341_v28, 0.0004427343 }
 0x10d   :  { %v1757_v63 = vadd.f32 %v1756_v39, %v1755_v57  ;;  %v1774_v39 = vsel %vm1544_vm3, %v1097_v23, 0.0  ;;  %v75_v57 = vmax.f32 %v2748_v8, 0.0  ;;  %v2900_v47 = vadd.f32 -0.5, %v580_v52 }
 0x10e   :  { %v1113_v8 = vrot.slane %v2852_v50, %v2222_v46  ;;  %v436_v9 = vmul.f32 0.6931472, %v2068_v2 }
 0x10f   :  { %v1759_v10 = vadd.f32 %v1758_v42, %v1757_v63  ;;  %v511_v42 = vmul.f32 %v28_v51, %v28_v51  ;;  %v1109_v63 = vrot.slane %v2852_v50, %v2201_v32  ;;  %v397_v18 = vadd.f32 %v334_v58, %v75_v57 }
 0x110   :  { %v1782_v50 = vsel %vm1544_vm3, %v1113_v8, 0.0  ;;  %v465_v33 = vsub.f32 0.0, %v436_v9  ;;  %v1125_v34 = vrot.slane %v2900_v47, %v2182_v15  ;;  %v1129_v19 = vrot.slane %v2900_v47, %v2184_v17 }
 0x111   :  { %v1761_v16 = vadd.f32 %v1760_v3, %v1759_v10  ;;  %v101_v3 = vand.u32 2147483647, %v2892_v61  ;;  %v338_v10 = vmul.f32 -0.5, %v2868_v20  ;;  %v534_v44 = vadd.f32 %v511_v42, %v488_v60 }
 0x112   :  { %v1780_v21 = vsel %vm1544_vm3, %v1109_v63, 0.0  ;;  %v2916_v37 = vpop.eup %2069  ;;  %2073 = vlog2.f32 %v397_v18  ;;  %v1133_v51 = vrot.slane %v2900_v47, %v2194_v27  ;;  %v1788_v30 = vsel %vm1544_vm3, %v1125_v34, 0.0 }
 0x113   :  { %v1763_v25 = vadd.f32 %v1762_v11, %v1761_v16  ;;  %v1117_v16 = vrot.slane %v2900_v47, %v2178_v13  ;;  %v124_v62 = vsub.f32 0.0, %v101_v3  ;;  %v1137_v54 = vrot.slane %v2900_v47, %v2199_v31 }
 0x114   :  { %v489_v58 = vmul.f32 %v397_v18, %v397_v18  ;;  %v1792_v60 = vsel %vm1544_vm3, %v1133_v51, 0.0 }
 0x115   :  { %v1765_v7 = vadd.f32 %v1764_v24, %v1763_v25  ;;  %v1121_v24 = vrot.slane %v2900_v47, %v2180_v14  ;;  %v339_v25 = vadd.f32 1.0, %v338_v10  ;;  %v2072_v29 = vpop.eup %2071  ;;  %v1784_v36 = vsel %vm1544_vm3, %v1117_v16, 0.0 }
 0x116   :  { %v167_v12 = vmul.f32 1.442695, %v124_v62  ;;  %v337_v43 = vmul.f32 0.6931472, %v2072_v29  ;;  %v1794_v3 = vsel %vm1544_vm3, %v1137_v54, 0.0 }
 0x117   :  { %v1767_v41 = vadd.f32 %v1766_v53, %v1765_v7  ;;  %v558_v7 = vmul.f32 0.5, %v534_v44  ;;  %v340_v23 = vmul.f32 %v2868_v20, %v339_v25  ;;  %v2940_v20 = vld [vmem:[%s3177_s1 + $0xa8] sm:$0xff] }
 0x118   :  { %2075 = vpow2.f32 %v167_v12 }
 0x119   :  { %v1769_v49 = vadd.f32 %v1768_v40, %v1767_v41  ;;  %v344_v40 = vadd.f32 1.0, %v2916_v37  ;;  %v1786_v41 = vsel %vm1544_vm3, %v1121_v24, 0.0  ;;  %v343_v56 = vsel %vm2930_vm4, %v340_v23, %v337_v43  ;;  %v30_v43 = vld [vmem:[%s3176_s0 + $0x90] sm:$0xff] }
 0x11a   :  { %v350_v24 = vand.u32 2147483647, %v2916_v37 }
 0x11b   :  { %v1771_v55 = vadd.f32 %v1770_v45, %v1769_v49  ;;  %v581_v49 = vadd.f32 %v558_v7, %v465_v33  ;;  %2077 = vlog2.f32 %v344_v40 }
 0x11c   :  { %v2074_v63 = vpop.eup %2073  ;;  %vm2978_vm5 = vcmp.lt.f32.partialorder %v350_v24, 0.0004427343 }
 0x11d   :  { %v1773_v59 = vadd.f32 %v1772_v35, %v1771_v55  ;;  %v1790_v35 = vsel %vm1544_vm3, %v1129_v19, 0.0  ;;  %v76_v55 = vmax.f32 %v2796_v4, 0.0  ;;  %v2948_v42 = vadd.f32 -0.5, %v581_v49 }
 0x11e   :  { %v1145_v4 = vrot.slane %v2900_v47, %v2222_v46  ;;  %v438_v10 = vmul.f32 0.6931472, %v2074_v63 }
 0x11f   :  { %v1775_v5 = vadd.f32 %v1774_v39, %v1773_v59  ;;  %v512_v39 = vmul.f32 %v29_v48, %v29_v48  ;;  %v1141_v59 = vrot.slane %v2900_v47, %v2201_v32  ;;  %v398_v8 = vadd.f32 %v343_v56, %v76_v55 }
 0x120   :  { %v1798_v47 = vsel %vm1544_vm3, %v1145_v4, 0.0  ;;  %v466_v28 = vsub.f32 0.0, %v438_v10  ;;  %v1157_v29 = vrot.slane %v2948_v42, %v2182_v15  ;;  %v1161_v12 = vrot.slane %v2948_v42, %v2184_v17 }
 0x121   :  { %v1777_v11 = vadd.f32 %v1776_v0, %v1775_v5  ;;  %v102_v0 = vand.u32 2147483647, %v2940_v20  ;;  %v347_v5 = vmul.f32 -0.5, %v2916_v37  ;;  %v535_v18 = vadd.f32 %v512_v39, %v489_v58 }
 0x122   :  { %v1796_v9 = vsel %vm1544_vm3, %v1141_v59, 0.0  ;;  %v2964_v62 = vpop.eup %2075  ;;  %2079 = vlog2.f32 %v398_v8  ;;  %v1165_v48 = vrot.slane %v2948_v42, %v2194_v27  ;;  %v1804_v26 = vsel %vm1544_vm3, %v1157_v29, 0.0 }
 0x123   :  { %v1779_v22 = vadd.f32 %v1778_v6, %v1777_v11  ;;  %v1149_v11 = vrot.slane %v2948_v42, %v2178_v13  ;;  %v125_v44 = vsub.f32 0.0, %v102_v0  ;;  %v1169_v51 = vrot.slane %v2948_v42, %v2199_v31 }
 0x124   :  { %v490_v56 = vmul.f32 %v398_v8, %v398_v8  ;;  %v1808_v58 = vsel %vm1544_vm3, %v1165_v48, 0.0 }
 0x125   :  { %v1781_v53 = vadd.f32 %v1780_v21, %v1779_v22  ;;  %v1153_v21 = vrot.slane %v2948_v42, %v2180_v14  ;;  %v348_v22 = vadd.f32 1.0, %v347_v5  ;;  %v2078_v25 = vpop.eup %2077  ;;  %v1800_v33 = vsel %vm1544_vm3, %v1149_v11, 0.0 }
 0x126   :  { %v169_v7 = vmul.f32 1.442695, %v125_v44  ;;  %v346_v40 = vmul.f32 0.6931472, %v2078_v25  ;;  %v1810_v0 = vsel %vm1544_vm3, %v1169_v51, 0.0 }
 0x127   :  { %v1783_v38 = vadd.f32 %v1782_v50, %v1781_v53  ;;  %v559_v53 = vmul.f32 0.5, %v535_v18  ;;  %v349_v19 = vmul.f32 %v2916_v37, %v348_v22  ;;  %v2988_v37 = vld [vmem:[%s3177_s1 + $0xb0] sm:$0x3f] }
 0x128   :  { %2081 = vpow2.f32 %v169_v7 }
 0x129   :  { %v1785_v45 = vadd.f32 %v1784_v36, %v1783_v38  ;;  %v353_v36 = vadd.f32 1.0, %v2964_v62  ;;  %v1802_v38 = vsel %vm1544_vm3, %v1153_v21, 0.0  ;;  %v352_v54 = vsel %vm2978_vm5, %v349_v19, %v346_v40  ;;  %v31_v40 = vld [vmem:[%s3176_s0 + $0x98] sm:$0xff] }
 0x12a   :  { %v359_v21 = vand.u32 2147483647, %v2964_v62  ;;  %v514_v51 = vmul.f32 %v31_v40, %v31_v40  ;;  %v79_v40 = vmax.f32 %v2940_v20, 0.0 }
 0x12b   :  { %v1787_v52 = vadd.f32 %v1786_v41, %v1785_v45  ;;  %v582_v45 = vadd.f32 %v559_v53, %v466_v28  ;;  %2083 = vlog2.f32 %v353_v36 }
 0x12c   :  { %v2080_v59 = vpop.eup %2079  ;;  %vm3026_vm6 = vcmp.lt.f32.partialorder %v359_v21, 0.0004427343 }
 0x12d   :  { %v1789_v57 = vadd.f32 %v1788_v30, %v1787_v52  ;;  %v1806_v30 = vsel %vm1544_vm3, %v1161_v12, 0.0  ;;  %v77_v52 = vmax.f32 %v2844_v1, 0.0  ;;  %v2996_v39 = vadd.f32 -0.5, %v582_v45 }
 0x12e   :  { %v1177_v1 = vrot.slane %v2948_v42, %v2222_v46  ;;  %v440_v5 = vmul.f32 0.6931472, %v2080_v59 }
 0x12f   :  { %v1791_v2 = vadd.f32 %v1790_v35, %v1789_v57  ;;  %v513_v35 = vmul.f32 %v30_v43, %v30_v43  ;;  %v1173_v57 = vrot.slane %v2948_v42, %v2201_v32  ;;  %v399_v4 = vadd.f32 %v352_v54, %v77_v52 }
 0x130   :  { %v1814_v42 = vsel %vm1544_vm3, %v1177_v1, 0.0  ;;  %v467_v24 = vsub.f32 0.0, %v440_v5  ;;  %v1189_v25 = vrot.slane %v2996_v39, %v2182_v15  ;;  %v1193_v7 = vrot.slane %v2996_v39, %v2184_v17 }
 0x131   :  { %v1793_v6 = vadd.f32 %v1792_v60, %v1791_v2  ;;  %v103_v60 = vand.u32 2147483647, %v2988_v37  ;;  %v356_v2 = vmul.f32 -0.5, %v2964_v62  ;;  %v536_v8 = vadd.f32 %v513_v35, %v490_v56 }
 0x132   :  { %v1812_v10 = vsel %vm1544_vm3, %v1173_v57, 0.0  ;;  %v3012_v44 = vpop.eup %2081  ;;  %2085 = vlog2.f32 %v399_v4  ;;  %v1197_v43 = vrot.slane %v2996_v39, %v2194_v27  ;;  %v1820_v23 = vsel %vm1544_vm3, %v1189_v25, 0.0 }
 0x133   :  { %v1795_v16 = vadd.f32 %v1794_v3, %v1793_v6  ;;  %v1181_v6 = vrot.slane %v2996_v39, %v2178_v13  ;;  %v126_v18 = vsub.f32 0.0, %v103_v60  ;;  %v1822_v48 = vsel %vm1544_vm3, %v1193_v7, 0.0 }
 0x134   :  { %v491_v52 = vmul.f32 %v399_v4, %v399_v4  ;;  %v1205_v35 = vrot.slane %v2996_v39, %v2201_v32  ;;  %v365_v59 = vmul.f32 -0.5, %v3012_v44 }
 0x135   :  { %v1797_v50 = vadd.f32 %v1796_v9, %v1795_v16  ;;  %v1185_v9 = vrot.slane %v2996_v39, %v2180_v14  ;;  %v357_v16 = vadd.f32 1.0, %v356_v2  ;;  %v2084_v22 = vpop.eup %2083  ;;  %v1816_v28 = vsel %vm1544_vm3, %v1181_v6, 0.0 }
 0x136   :  { %v171_v53 = vmul.f32 1.442695, %v126_v18  ;;  %v355_v36 = vmul.f32 0.6931472, %v2084_v22  ;;  %v1828_v4 = vsel %vm1544_vm3, %v1205_v35, 0.0  ;;  %v366_v6 = vadd.f32 1.0, %v365_v59 }
 0x137   :  { %v1799_v34 = vadd.f32 %v1798_v47, %v1797_v50  ;;  %v560_v50 = vmul.f32 0.5, %v536_v8  ;;  %v358_v12 = vmul.f32 %v2964_v62, %v357_v16  ;;  %v1201_v62 = vrot.slane %v2996_v39, %v2199_v31 }
 0x138   :  { %2087 = vpow2.f32 %v171_v53 }
 0x139   :  { %v1801_v41 = vadd.f32 %v1800_v33, %v1799_v34  ;;  %v362_v33 = vadd.f32 1.0, %v3012_v44  ;;  %v1818_v34 = vsel %vm1544_vm3, %v1185_v9, 0.0 }
 0x13b   :  { %v1803_v49 = vadd.f32 %v1802_v38, %v1801_v41  ;;  %v583_v41 = vadd.f32 %v560_v50, %v467_v24  ;;  %2089 = vlog2.f32 %v362_v33 }
 0x13c   :  { %v2086_v56 = vpop.eup %2085 }
 0x13d   :  { %v1805_v55 = vadd.f32 %v1804_v26, %v1803_v49  ;;  %v78_v26 = vmax.f32 %v2892_v61, 0.0  ;;  %v361_v49 = vsel %vm3026_vm6, %v358_v12, %v355_v36  ;;  %v3039_v54 = vadd.f32 -0.5, %v583_v41 }
 0x13e   :  { %v1826_v61 = vsel %vm1544_vm3, %v1201_v62, 0.0  ;;  %v442_v1 = vmul.f32 0.6931472, %v2086_v56 }
 0x13f   :  { %v1807_v63 = vadd.f32 %v1806_v30, %v1805_v55  ;;  %v1824_v55 = vsel %vm1544_vm3, %v1197_v43, 0.0  ;;  %v400_v60 = vadd.f32 %v361_v49, %v78_v26  ;;  %v1213_v2 = vrot.slane %v3039_v54, %v2178_v13 }
 0x140   :  { %v1217_v5 = vrot.slane %v3039_v54, %v2180_v14  ;;  %v468_v9 = vsub.f32 0.0, %v442_v1  ;;  %v1221_v16 = vrot.slane %v3039_v54, %v2182_v15  ;;  %v1225_v24 = vrot.slane %v3039_v54, %v2184_v17 }
 0x141   :  { %v1809_v3 = vadd.f32 %v1808_v58, %v1807_v63  ;;  %v1209_v58 = vrot.slane %v2996_v39, %v2222_v46  ;;  %2091 = vlog2.f32 %v400_v60  ;;  %v1832_v21 = vsel %vm1544_vm3, %v1213_v2, 0.0 }
 0x142   :  { %v3054_v39 = vpop.eup %2087  ;;  %v1834_v50 = vsel %vm1544_vm3, %v1217_v5, 0.0  ;;  %v1836_v36 = vsel %vm1544_vm3, %v1221_v16, 0.0  ;;  %v1237_v62 = vrot.slane %v3039_v54, %v2201_v32 }
 0x143   :  { %v1811_v11 = vadd.f32 %v1810_v0, %v1809_v3  ;;  %v537_v0 = vadd.f32 %v514_v51, %v491_v52  ;;  %v1830_v8 = vsel %vm1544_vm3, %v1209_v58, 0.0  ;;  %v371_v22 = vadd.f32 1.0, %v3054_v39 }
 0x144   :  { %v1241_v51 = vrot.slane %v3039_v54, %v2222_v46  ;;  %v374_v20 = vmul.f32 -0.5, %v3054_v39  ;;  %v1844_v58 = vsel %vm1544_vm3, %v1237_v62, 0.0 }
 0x145   :  { %v1813_v47 = vadd.f32 %v1812_v10, %v1811_v11  ;;  %v368_v10 = vand.u32 2147483647, %v3012_v44  ;;  %v2090_v11 = vpop.eup %2089  ;;  %2093 = vlog2.f32 %v371_v22 }
 0x146   :  { %v364_v25 = vmul.f32 0.6931472, %v2090_v11 }
 0x147   :  { %v1815_v29 = vadd.f32 %v1814_v42, %v1813_v47  ;;  %v561_v42 = vmul.f32 0.5, %v537_v0  ;;  %vm3068_vm7 = vcmp.lt.f32.partialorder %v368_v10, 0.0004427343 }
 0x149   :  { %v1817_v38 = vadd.f32 %v1816_v28, %v1815_v29  ;;  %v367_v28 = vmul.f32 %v3012_v44, %v366_v6  ;;  %v32_v29 = vld [vmem:[%s3176_s0 + $0xa0] sm:$0xff]  ;;  %v584_v7 = vadd.f32 %v561_v42, %v468_v9  ;;  %v1233_v44 = vrot.slane %v3039_v54, %v2199_v31  ;;  %v33_v42 = vld [vmem:[%s3176_s0 + $0xa8] sm:$0xff] }
 0x14a   :  { %v515_v41 = vmul.f32 %v32_v29, %v32_v29 }
 0x14b   :  { %v1819_v45 = vadd.f32 %v1818_v34, %v1817_v38  ;;  %v1229_v34 = vrot.slane %v3039_v54, %v2194_v27  ;;  %v1838_v38 = vsel %vm1544_vm3, %v1225_v24, 0.0  ;;  %v370_v19 = vsel %vm3068_vm7, %v367_v28, %v364_v25  ;;  %v2092_v26 = vpop.eup %2091 }
 0x14c   :  { %v401_v52 = vadd.f32 %v370_v19, %v79_v40  ;;  %v377_v54 = vand.u32 2147483647, %v3054_v39 }
 0x14d   :  { %v1821_v30 = vadd.f32 %v1820_v23, %v1819_v45  ;;  %v492_v23 = vmul.f32 %v400_v60, %v400_v60  ;;  %v1954_v45 = vadd.f32 -0.5, %v584_v7  ;;  %v1846_v60 = vsel %vm1544_vm3, %v1241_v51, 0.0 }
 0x14e   :  { %2095 = vlog2.f32 %v401_v52  ;;  %vm3101_vm8 = vcmp.lt.f32.partialorder %v377_v54, 0.0004427343  ;;  %v493_v33 = vmul.f32 %v401_v52, %v401_v52 }
 0x14f   :  { %v1823_v57 = vadd.f32 %v1822_v48, %v1821_v30  ;;  %v1840_v48 = vsel %vm1544_vm3, %v1229_v34, 0.0  ;;  %v1842_v30 = vsel %vm1544_vm3, %v1233_v44, 0.0  ;;  %v538_v56 = vadd.f32 %v515_v41, %v492_v23  ;;  %v2094_v0 = vpop.eup %2093 }
 0x150   :  { %v1249_v59 = vrot.slane %v1954_v45, %v2180_v14  ;;  %v1257_v6 = vrot.slane %v1954_v45, %v2184_v17  ;;  %v1269_v34 = vrot.slane %v1954_v45, %v2201_v32 }
 0x151   :  { %v1825_v63 = vadd.f32 %v1824_v55, %v1823_v57  ;;  %v444_v55 = vmul.f32 0.6931472, %v2092_v26  ;;  %v1245_v57 = vrot.slane %v1954_v45, %v2178_v13 }
 0x152   :  { %v1850_v10 = vsel %vm1544_vm3, %v1249_v59, 0.0  ;;  %v1854_v25 = vsel %vm1544_vm3, %v1257_v6, 0.0  ;;  %v1860_v62 = vsel %vm1544_vm3, %v1269_v34, 0.0 }
 0x153   :  { %v1827_v3 = vadd.f32 %v1826_v61, %v1825_v63  ;;  %v375_v63 = vadd.f32 1.0, %v374_v20  ;;  %v469_v2 = vsub.f32 0.0, %v444_v55  ;;  %v1848_v5 = vsel %vm1544_vm3, %v1245_v57, 0.0 }
 0x155   :  { %v1829_v18 = vadd.f32 %v1828_v4, %v1827_v3  ;;  %v562_v4 = vmul.f32 0.5, %v538_v56  ;;  %v1253_v3 = vrot.slane %v1954_v45, %v2182_v15  ;;  %v376_v11 = vmul.f32 %v3054_v39, %v375_v63 }
 0x156   :  { %v80_v39 = vmax.f32 %v2988_v37, 0.0 }
 0x157   :  { %v1831_v47 = vadd.f32 %v1830_v8, %v1829_v18  ;;  %v373_v18 = vmul.f32 0.6931472, %v2094_v0  ;;  %v1852_v22 = vsel %vm1544_vm3, %v1253_v3, 0.0 }
 0x159   :  { %v1833_v53 = vadd.f32 %v1832_v21, %v1831_v47  ;;  %v585_v21 = vadd.f32 %v562_v4, %v469_v2  ;;  %v1261_v47 = vrot.slane %v1954_v45, %v2194_v27  ;;  %v379_v28 = vsel %vm3101_vm8, %v376_v11, %v373_v18 }
 0x15a   :  { %v402_v19 = vadd.f32 %v379_v28, %v80_v39 }
 0x15b   :  { %v1835_v12 = vadd.f32 %v1834_v50, %v1833_v53  ;;  %v1265_v50 = vrot.slane %v1954_v45, %v2199_v31  ;;  %v516_v53 = vmul.f32 %v33_v42, %v33_v42  ;;  %v1955_v7 = vadd.f32 -0.5, %v585_v21 }
 0x15c   :  { %2097 = vlog2.f32 %v402_v19  ;;  %v494_v4 = vmul.f32 %v402_v19, %v402_v19 }
 0x15d   :  { %v1837_v43 = vadd.f32 %v1836_v36, %v1835_v12  ;;  %v1856_v36 = vsel %vm1544_vm3, %v1261_v47, 0.0  ;;  %v2096_v12 = vpop.eup %2095  ;;  %v1858_v40 = vsel %vm1544_vm3, %v1265_v50, 0.0  ;;  %v1277_v23 = vrot.slane %v1955_v7, %v2178_v13 }
 0x15e   :  { %v446_v37 = vmul.f32 0.6931472, %v2096_v12  ;;  %v1281_v26 = vrot.slane %v1955_v7, %v2180_v14  ;;  %v1289_v55 = vrot.slane %v1955_v7, %v2184_v17  ;;  %v1293_v59 = vrot.slane %v1955_v7, %v2194_v27 }
 0x15f   :  { %v1839_v49 = vadd.f32 %v1838_v38, %v1837_v43  ;;  %v1273_v38 = vrot.slane %v1954_v45, %v2222_v46  ;;  %v539_v43 = vadd.f32 %v516_v53, %v493_v33  ;;  %v1285_v45 = vrot.slane %v1955_v7, %v2182_v15 }
 0x160   :  { %v1864_v52 = vsel %vm1544_vm3, %v1277_v23, 0.0  ;;  %v1866_v56 = vsel %vm1544_vm3, %v1281_v26, 0.0  ;;  %v1297_v54 = vrot.slane %v1955_v7, %v2199_v31  ;;  %v1305_v18 = vrot.slane %v1955_v7, %v2222_v46 }
 0x161   :  { %v1841_v35 = vadd.f32 %v1840_v48, %v1839_v49  ;;  %v1862_v49 = vsel %vm1544_vm3, %v1273_v38, 0.0  ;;  %v563_v20 = vmul.f32 0.5, %v539_v43 }
 0x162   :  { %v1874_v11 = vsel %vm1544_vm3, %v1297_v54, 0.0  ;;  %v1878_v50 = vsel %vm1544_vm3, %v1305_v18, 0.0 }
 0x163   :  { %v1843_v61 = vadd.f32 %v1842_v30, %v1841_v35  ;;  %v470_v30 = vsub.f32 0.0, %v446_v37 }
 0x165   :  { %v1845_v1 = vadd.f32 %v1844_v58, %v1843_v61  ;;  %v34_v58 = vld [vmem:[%s3176_s0 + $0xb0] sm:$0x3f]  ;;  %v586_v61 = vadd.f32 %v563_v20, %v470_v30  ;;  %s2123_s0 = smov [#allocation2]  }
 0x166   :  { %v517_v0 = vmul.f32 %v34_v58, %v34_v58  ;;  %v2098_v6 = vpop.eup %2097  ;;  %s1927_s16 = sshll.u32 %s2123_s0, 4  ;;  %s1928_s16 = int_to_ptr.vmem [resolvable:$true] %s1927_s16 }
 0x167   :  { %v1847_v8 = vadd.f32 %v1846_v60, %v1845_v1  ;;  %v1868_v60 = vsel %vm1544_vm3, %v1285_v45, 0.0  ;;  %v1870_v1 = vsel %vm1544_vm3, %v1289_v55, 0.0  ;;  %v1956_v3 = vadd.f32 -0.5, %v586_v61  ;;  %s2099_s18 = scalar_lea.vmem %s1928_s16, 16  ;;  %s2103_s19 = scalar_lea.vmem %s1928_s16, 32 }
 0x168   :  { %v448_v42 = vmul.f32 0.6931472, %v2098_v6  ;;  %v540_v16 = vadd.f32 %v517_v0, %v494_v4  ;;  %p2100_p0 = scmp.ne.s32.totalorder %s1928_s16, %s2099_s18  ;;  %p2104_p1 = scmp.lt.s32.totalorder %s1928_s16, %s1928_s16 }
 0x169   :  { %v1849_v9 = vadd.f32 %v1848_v5, %v1847_v8  ;;  %v1301_v5 = vrot.slane %v1955_v7, %v2201_v32  ;;  %v1872_v8 = vsel %vm1544_vm3, %v1293_v59, 0.0  ;;  %v1309_v21 = vrot.slane %v1956_v3, %v2178_v13  ;;  %p2105_p2 = scmp.lt.s32.totalorder %s2103_s19, %s2099_s18 }
 0x16a   :  { %v471_v39 = vsub.f32 0.0, %v448_v42  ;;  %v564_v28 = vmul.f32 0.5, %v540_v16  ;;  %v1317_v53 = vrot.slane %v1956_v3, %v2182_v15  ;;  %v1321_v7 = vrot.slane %v1956_v3, %v2184_v17 }
 0x16b   :  { %v1851_v24 = vadd.f32 %v1850_v10, %v1849_v9  ;;  %v1876_v47 = vsel %vm1544_vm3, %v1301_v5, 0.0  ;;  %v1329_v19 = vrot.slane %v1956_v3, %v2199_v31  ;;  %v1333_v23 = vrot.slane %v1956_v3, %v2201_v32  ;;  %p2106_p3 = por %p2105_p2, %p2104_p1 }
 0x16c   :  { %v587_v12 = vadd.f32 %v564_v28, %v471_v39  ;;  %v1884_v38 = vsel %vm1544_vm3, %v1317_v53, 0.0  ;;  %v1337_v26 = vrot.slane %v1956_v3, %v2222_v46 }
 0x16d   :  { %v1853_v29 = vadd.f32 %v1852_v22, %v1851_v24  ;;  %v1313_v24 = vrot.slane %v1956_v3, %v2180_v14  ;;  %v1892_v20 = vsel %vm1544_vm3, %v1333_v23, 0.0  ;;  %p2107_p4 = pnand %p2106_p3, %p2100_p0 }
 0x16e   :  { %v1957_v43 = vadd.f32 -0.5, %v587_v12 }
 0x16f   :  { %v1855_v44 = vadd.f32 %v1854_v25, %v1853_v29  ;;  %v1880_v29 = vsel %vm1544_vm3, %v1309_v21, 0.0  ;;  %v1882_v34 = vsel %vm1544_vm3, %v1313_v24, 0.0 }
 0x170   :  { %v1341_v30 = vrot.slane %v1957_v43, %v2178_v13  ;;  %v1349_v32 = vrot.slane %v1957_v43, %v2182_v15  ;;  %v1353_v46 = vrot.slane %v1957_v43, %v2184_v17  ;;  %v1357_v13 = vrot.slane %v1957_v43, %v2194_v27 }
 0x171   :  { %v1857_v41 = vadd.f32 %v1856_v36, %v1855_v44  ;;  %v1325_v44 = vrot.slane %v1956_v3, %v2194_v27 }
 0x172   :  { %v1900_v59 = vsel %vm1544_vm3, %v1349_v32, 0.0  ;;  %v1904_v15 = vsel %vm1544_vm3, %v1357_v13, 0.0 }
 0x173   :  { %v1859_v48 = vadd.f32 %v1858_v40, %v1857_v41  ;;  %v1886_v41 = vsel %vm1544_vm3, %v1321_v7, 0.0 }
 0x175   :  { %v1861_v51 = vadd.f32 %v1860_v62, %v1859_v48  ;;  %v1888_v62 = vsel %vm1544_vm3, %v1325_v44, 0.0 }
 0x177   :  { %v1863_v35 = vadd.f32 %v1862_v49, %v1861_v51  ;;  %v1890_v49 = vsel %vm1544_vm3, %v1329_v19, 0.0 }
 0x179   :  { %v1865_v57 = vadd.f32 %v1864_v52, %v1863_v35  ;;  %v1345_v52 = vrot.slane %v1957_v43, %v2180_v14  ;;  %v1894_v35 = vsel %vm1544_vm3, %v1337_v26, 0.0  ;;  %v1361_v14 = vrot.slane %v1957_v43, %v2199_v31 }
 0x17b   :  { %v1867_v63 = vadd.f32 %v1866_v56, %v1865_v57  ;;  %v1896_v56 = vsel %vm1544_vm3, %v1341_v30, 0.0  ;;  %v1898_v58 = vsel %vm1544_vm3, %v1345_v52, 0.0  ;;  %v1907_v0 = vsel %vm1906_vm9, %v1361_v14, 0.0 }
 0x17d   :  { %v1869_v2 = vadd.f32 %v1868_v60, %v1867_v63  ;;  %v1902_v63 = vsel %vm1544_vm3, %v1353_v46, 0.0 }
 0x17f   :  { %v1871_v10 = vadd.f32 %v1870_v1, %v1869_v2 }
 0x181   :  { %v1873_v9 = vadd.f32 %v1872_v8, %v1871_v10 }
 0x183   :  { %v1875_v22 = vadd.f32 %v1874_v11, %v1873_v9 }
 0x185   :  { %v1877_v25 = vadd.f32 %v1876_v47, %v1875_v22 }
 0x187   :  { %v1879_v33 = vadd.f32 %v1878_v50, %v1877_v25 }
 0x189   :  { %v1881_v36 = vadd.f32 %v1880_v29, %v1879_v33 }
 0x18b   :  { %v1883_v40 = vadd.f32 %v1882_v34, %v1881_v36 }
 0x18d   :  { %v1885_v37 = vadd.f32 %v1884_v38, %v1883_v40 }
 0x18f   :  { %v1887_v48 = vadd.f32 %v1886_v41, %v1885_v37 }
 0x191   :  { %v1889_v51 = vadd.f32 %v1888_v62, %v1887_v48 }
 0x193   :  { %v1891_v45 = vadd.f32 %v1890_v49, %v1889_v51 }
 0x195   :  { %v1893_v55 = vadd.f32 %v1892_v20, %v1891_v45 }
 0x197   :  { %v1895_v57 = vadd.f32 %v1894_v35, %v1893_v55 }
 0x199   :  { %v1897_v61 = vadd.f32 %v1896_v56, %v1895_v57 }
 0x19b   :  { %v1899_v60 = vadd.f32 %v1898_v58, %v1897_v61 }
 0x19d   :  { %v1901_v54 = vadd.f32 %v1900_v59, %v1899_v60 }
 0x19f   :  { %v1903_v1 = vadd.f32 %v1902_v63, %v1901_v54 }
 0x1a1   :  { %v1905_v2 = vadd.f32 %v1904_v15, %v1903_v1 }
 0x1a3   :  { %v1908_v17 = vadd.f32 %v1907_v0, %v1905_v2 }
 0x1a5   :  { %1909 = vadd.xlane.f32.xlu0 %v1908_v17 }
 0x232   :  { %v1910_v4 = vpop.xlane.xlu0 %1909 }
 0x233   :  { %v1911_v3 = vrot.slane %v1910_v4, 4 }
 0x235   :  { %v1912_v5 = vadd.f32 %v1911_v3, %v1910_v4 }
 0x237   :  { %v1913_v27 = vrot.slane %v1912_v5, 2 }
 0x239   :  { %v1914_v8 = vadd.f32 %v1913_v27, %v1912_v5 }
 0x23b   :  { %v1915_v6 = vrot.slane %v1914_v8, 1 }
 0x23d   :  { %v1916_v10 = vadd.f32 %v1915_v6, %v1914_v8 }
 0x23f   :  { %1958 = vpush %v1916_v10 }
 0x270   :  { %s1959_s17 = spop %1958 }
 0x271   :  { %v1918_v31 = vstv %s1959_s17 }
 0x272   :  { %1920 = vst.msk [vmem:[#allocation2] sm:$0x1] %vm1919_vm10, %v1918_v31 }
 0x273   :  { %2110 = shalt.err (!%p2107_p4)
}
 0x274   :  { %s2111_s22 = scalar_lea.hbm %s3178_s2, 16 }
 0x275   :  { %p2112_p5 = scmp.ne.s32.totalorder %s3178_s2, %s2111_s22  ;;  %p2115_p6 = scmp.lt.u32.totalorder %s2111_s22, %s3178_s2 }
 0x277   :  { %p2117_p7 = pnand %p2115_p6, %p2112_p5 }
 0x279   :  { %2120 = shalt.err (!%p2117_p7)
}
 0x27a   :  { %1930 = dma.vmem_to_hbm [thread:$0]  %s1928_s16, 16, %s3178_s2, [#allocation3]  }
 0x27b   :  { %2121 = dma.done.wait [#allocation3], 16  }
 0x27c   :  { %2122 = vsyncadd [#allocation3], 4294967280 }
 0x27d   :  { %1934 = vsyncpa [#allocation3], 1 }

// kernel: sdgp_additive_forward.12
= control target key start
LH: loop header
LB: loop body
LE: loop exit
PB: predicated region body
PF: predicated region fallthrough
CT: control target
= control target key end

     0   :  { %vm53_vm0 = vcmask 1043456   ;;  %v3050_v1 = vmov 0.0   ;;  %vm49_vm1 = vcmask 31744   ;;  %v131_v20 = vlaneseq  ;;  %s3747_s1 = inlined_call_operand.vmem [shape: f32[4,256], index: 1, kind: input, shape index: {}]   ;;  %s3748_s0 = inlined_call_operand.vmem [shape: f32[8,4], index: 0, kind: input, shape index: {}]   ;;  %s3749_s3 = inlined_call_operand.vmem [shape: bf16[256,16], index: 3, kind: input, shape index: {}]   ;;  %s3750_s2 = inlined_call_operand.vmem [shape: f32[1,256], index: 2, kind: input, shape index: {}]   ;;  %s3751_s5 = inlined_call_operand.vmem [shape: f32[16,1024], index: 5, kind: input, shape index: {}, may-alias: {5,9}]   ;;  %s3752_s7 = inlined_call_operand.vmem [shape: bf16[1024,16], index: 7, kind: input, shape index: {}]   ;;  %s3753_s4 = inlined_call_operand.vmem [shape: f32[1,16], index: 4, kind: input, shape index: {}]   ;;  %s3754_s6 = inlined_call_operand.vmem [shape: f32[1,1024], index: 6, kind: input, shape index: {}, may-alias: {6,10}]   ;;  %s3755_s9 = inlined_call_operand.vmem [shape: f32[16,1024], index: 9, kind: input, shape index: {}, may-alias: {5,9}]   ;;  %s3756_s11 = inlined_call_operand.vmem [shape: bf16[1024,3], index: 11, kind: input, shape index: {}]   ;;  %s3757_s8 = inlined_call_operand.vmem [shape: f32[1,16], index: 8, kind: input, shape index: {}]   ;;  %s3758_s10 = inlined_call_operand.vmem [shape: f32[1,1024], index: 10, kind: input, shape index: {}, may-alias: {6,10}]   ;;  %s3759_s12 = inlined_call_operand.vmem [shape: f32[1,3], index: 12, kind: input, shape index: {}]   ;;  %s3760_s13 = inlined_call_operand.vmem [shape: f32[8,3], index: 13, kind: output, shape index: {}]  }
   0x1   :  { %v46_v0 = vld [vmem:[%s3747_s1] sm:$0xff]  ;;  %122 = vmatprep.mubr.f32.mxu1 %v3050_v1  ;;  %412 = vmatprep.mubr.f32.mxu0 %v3050_v1  ;;  %v2872_v6 = vld [vmem:[%s3749_s3 + $0x48] sm:$0xff]   ;;  %v2874_v8 = vld [vmem:[%s3749_s3 + $0x50] sm:$0xff]   ;;  %vm344_vm2 = vcmask 130048   ;;  %vm2474_vm3 = vcmask 23552  }
   0x2   :  { %v45_v2 = vld [vmem:[%s3748_s0] sm:$0xff]  ;;  %v48_v3 = vcombine.high %v46_v0, %v46_v0  ;;  %v2873_v7 = vld [vmem:[%s3749_s3 + $0x8] sm:$0xff]   ;;  %v2875_v9 = vld [vmem:[%s3749_s3 + $0x10] sm:$0xff]   ;;  %v3177_v21 = vshrl.u32 %v131_v20, 7 }
   0x3   :  { %v2870_v4 = vld [vmem:[%s3749_s3 + $0x40] sm:$0xff]   ;;  %v2876_v10 = vld [vmem:[%s3749_s3 + $0x58] sm:$0xff]   ;;  %v2880_v14 = vld [vmem:[%s3749_s3 + $0x68] sm:$0xff]  }
   0x4   :  { %v2871_v5 = vld [vmem:[%s3749_s3] sm:$0xff]   ;;  %2480 = vmatprep.subr.msk.mxu1 %vm53_vm0, %v48_v3  ;;  %v2877_v11 = vld [vmem:[%s3749_s3 + $0x18] sm:$0xff]   ;;  %v2881_v15 = vld [vmem:[%s3749_s3 + $0x28] sm:$0xff]   ;;  %v3180_v22 = vsub.s32 0, %v3177_v21  ;;  %v3186_v24 = vsub.s32 1, %v3177_v21 }
   0x5   :  { %2481 = vmatpush1.msk.msra.mxu1 %vm53_vm0, %v46_v0  ;;  %v2878_v12 = vld [vmem:[%s3749_s3 + $0x60] sm:$0xff]   ;;  %v2882_v16 = vld [vmem:[%s3749_s3 + $0x70] sm:$0xff]   ;;  %v2884_v18 = vld [vmem:[%s3749_s3 + $0x78] sm:$0xff]  }
   0x6   :  { %2482 = vmatmul.mubr.msk.f32.vlgmr.msra.gmra.mrb[0].mxu1 %vm49_vm1, %v45_v2  ;;  %2638 = vmatprep.subr.bf16.mxu1 %v2870_v4  ;;  %v2879_v13 = vld [vmem:[%s3749_s3 + $0x20] sm:$0xff]   ;;  %v2883_v17 = vld [vmem:[%s3749_s3 + $0x30] sm:$0xff]   ;;  %v2885_v19 = vld [vmem:[%s3749_s3 + $0x38] sm:$0xff]  }
   0x7   :  { %2639 = vmatpush3.bf16.msra.mxu1 %v2871_v5  ;;  %v129_v23 = vld [vmem:[%s3750_s2] sm:$0x3]  ;;  %v329_v41 = vld [vmem:[%s3751_s5 + $0x8] sm:$0xff]  ;;  %v331_v47 = vld [vmem:[%s3751_s5 + $0x18] sm:$0xff] }
   0x8   :  { %2640 = vmatprep.subr.bf16.mxu1 %v2872_v6  ;;  %v134_v25 = vrot.slane %v129_v23, %v3180_v22  ;;  %v138_v26 = vrot.slane %v129_v23, %v3186_v24  ;;  %v337_v42 = vld [vmem:[%s3751_s5 + $0x48] sm:$0xff]  ;;  %v328_v44 = vld [vmem:[%s3751_s5] sm:$0xff]  ;;  %v339_v48 = vld [vmem:[%s3751_s5 + $0x58] sm:$0xff] }
   0x9   :  { %v2836_v43 = vpack.c.bf16 %v337_v42, %v329_v41  ;;  %v336_v45 = vld [vmem:[%s3751_s5 + $0x40] sm:$0xff]  ;;  %v2840_v49 = vpack.c.bf16 %v339_v48, %v331_v47  ;;  %v2893_v52 = vld [vmem:[%s3752_s7 + $0xc8] sm:$0xff]   ;;  %v330_v54 = vld [vmem:[%s3751_s5 + $0x10] sm:$0xff]  ;;  %v644_v48 = vsub.s32 2, %v3177_v21 }
   0xa   :  { %v2838_v46 = vpack.c.bf16 %v336_v45, %v328_v44  ;;  %v2889_v50 = vld [vmem:[%s3752_s7 + $0xc0] sm:$0xff]   ;;  %v338_v55 = vld [vmem:[%s3751_s5 + $0x50] sm:$0xff]  ;;  %v333_v58 = vld [vmem:[%s3751_s5 + $0x28] sm:$0xff] }
   0xb   :  { %2641 = vmatpush3.bf16.msra.mxu1 %v2873_v7  ;;  %2837 = vmatprep.subr.bf16.mxu0 %v2836_v43  ;;  %v2891_v51 = vld [vmem:[%s3752_s7 + $0x80] sm:$0xff]   ;;  %v341_v59 = vld [vmem:[%s3751_s5 + $0x68] sm:$0xff]  ;;  %v2842_v63 = vpack.c.bf16 %v338_v55, %v330_v54  ;;  %v335_v5 = vld [vmem:[%s3751_s5 + $0x38] sm:$0xff] }
   0xc   :  { %2642 = vmatprep.subr.bf16.mxu1 %v2874_v8  ;;  %2839 = vmatpush1.bf16.msra.mxu0 %v2838_v46  ;;  %v2483_v56 = vld [vmem:[%s3753_s4] ss:$0 sm:$0xff]  ;;  %v2844_v2 = vpack.c.bf16 %v341_v59, %v333_v58  ;;  %v343_v6 = vld [vmem:[%s3751_s5 + $0x78] sm:$0xff]  ;;  %v2897_v20 = vld [vmem:[%s3752_s7 + $0xd0] sm:$0xff]  }
   0xd   :  { %2841 = vmatprep.subr.bf16.mxu0 %v2840_v49  ;;  %v332_v3 = vld [vmem:[%s3751_s5 + $0x20] sm:$0xff]  ;;  %v2848_v8 = vpack.c.bf16 %v343_v6, %v335_v5  ;;  %v2898_v23 = vld [vmem:[%s3752_s7 + $0x18] sm:$0xff]   ;;  %v2915_v41 = vld [vmem:[%s3752_s7 + $0xb0] sm:$0xff]  }
   0xe   :  { %v340_v4 = vld [vmem:[%s3751_s5 + $0x60] sm:$0xff]  ;;  %v2916_v42 = vld [vmem:[%s3752_s7 + $0xf8] sm:$0xff]  }
   0xf   :  { %2643 = vmatpush3.bf16.msra.mxu1 %v2875_v9  ;;  %v2846_v7 = vpack.c.bf16 %v340_v4, %v332_v3  ;;  %v334_v9 = vld [vmem:[%s3751_s5 + $0x30] sm:$0xff]  ;;  %v2917_v43 = vld [vmem:[%s3752_s7 + $0x140] sm:$0xff]   ;;  %v2918_v44 = vld [vmem:[%s3752_s7 + $0xb8] sm:$0xff]   ;;  %v664_v4 = vsub.s32 7, %v3177_v21 }
  0x10   :  { %2644 = vmatprep.subr.bf16.mxu1 %v2876_v10  ;;  %v342_v10 = vld [vmem:[%s3751_s5 + $0x70] sm:$0xff]  ;;  %v2921_v45 = vld [vmem:[%s3752_s7 + $0x1c0] sm:$0xff]  }
  0x11   :  { %v3353_v46 = vld [vmem:[%s3754_s6] sm:$0xff] }
  0x12   :  { %v637_v47 = vrot.slane %v3353_v46, %v3180_v22  ;;  %v641_v49 = vrot.slane %v3353_v46, %v3186_v24  ;;  %v645_v54 = vrot.slane %v3353_v46, %v644_v48 }
  0x13   :  { %2645 = vmatpush3.bf16.msra.mxu1 %v2877_v11  ;;  %v2850_v11 = vpack.c.bf16 %v342_v10, %v334_v9 }
  0x14   :  { %2646 = vmatprep.subr.bf16.mxu1 %v2878_v12  ;;  %v2886_v12 = vld [vmem:[%s3752_s7 + $0x40] sm:$0xff]  }
  0x17   :  { %2647 = vmatpush3.bf16.msra.mxu1 %v2879_v13  ;;  %v2887_v13 = vld [vmem:[%s3752_s7] sm:$0xff]  }
  0x18   :  { %2648 = vmatprep.subr.bf16.mxu1 %v2880_v14  ;;  %v2888_v14 = vld [vmem:[%s3752_s7 + $0x48] sm:$0xff]  }
  0x1b   :  { %2649 = vmatpush3.bf16.msra.mxu1 %v2881_v15  ;;  %v2890_v15 = vld [vmem:[%s3752_s7 + $0x8] sm:$0xff]  }
  0x1c   :  { %2650 = vmatprep.subr.bf16.mxu1 %v2882_v16  ;;  %v2892_v16 = vld [vmem:[%s3752_s7 + $0x50] sm:$0xff]  }
  0x1f   :  { %2651 = vmatpush3.bf16.msra.mxu1 %v2883_v17  ;;  %v2894_v17 = vld [vmem:[%s3752_s7 + $0x10] sm:$0xff]  }
  0x20   :  { %2652 = vmatprep.subr.bf16.mxu1 %v2884_v18  ;;  %v2895_v18 = vld [vmem:[%s3752_s7 + $0x88] sm:$0xff]  }
  0x23   :  { %2653 = vmatpush3.bf16.msra.mxu1 %v2885_v19  ;;  %v2896_v19 = vld [vmem:[%s3752_s7 + $0x58] sm:$0xff]  }
  0x24   :  { %2682 = vmatprep.subr.bf16.mxu1 %v2889_v50  ;;  %v648_v50 = vsub.s32 3, %v3177_v21 }
  0xd9   :  { %v124_v27 = vpop.f32.mrb[0].mxu1 }
  0xda   :  { %v141_v28 = vsub.f32 %v124_v27, %v134_v25  ;;  %v126_v29 = vpop.f32.mrb[1].mxu1  ;;  %v2899_v25 = vld [vmem:[%s3752_s7 + $0x90] sm:$0xff]   ;;  %v2901_v27 = vld [vmem:[%s3752_s7 + $0xd8] sm:$0xff]  }
  0xdb   :  { %v142_v30 = vsub.f32 %v126_v29, %v138_v26  ;;  %v2900_v26 = vld [vmem:[%s3752_s7 + $0x60] sm:$0xff]   ;;  %v2903_v29 = vld [vmem:[%s3752_s7 + $0x98] sm:$0xff]  }
  0xdc   :  { %v143_v31 = vand.u32 2147483647, %v141_v28  ;;  %v2902_v28 = vld [vmem:[%s3752_s7 + $0x20] sm:$0xff]  }
  0xdd   :  { %v144_v32 = vand.u32 2147483647, %v142_v30  ;;  %v2904_v30 = vld [vmem:[%s3752_s7 + $0x68] sm:$0xff]  }
  0xde   :  { %v145_v33 = vsub.f32 0.0, %v143_v31  ;;  %v2905_v31 = vld [vmem:[%s3752_s7 + $0xe0] sm:$0xff]  }
  0xdf   :  { %v146_v34 = vsub.f32 0.0, %v144_v32  ;;  %v2906_v32 = vld [vmem:[%s3752_s7 + $0x28] sm:$0xff]  }
  0xe0   :  { %v147_v35 = vmul.f32 1.442695, %v145_v33  ;;  %v2907_v33 = vld [vmem:[%s3752_s7 + $0xa0] sm:$0xff]  }
  0xe1   :  { %v149_v36 = vmul.f32 1.442695, %v146_v34  ;;  %v2908_v34 = vld [vmem:[%s3752_s7 + $0x70] sm:$0xff]  }
  0xe2   :  { %3014 = vpow2.f32 %v147_v35  ;;  %v2909_v35 = vld [vmem:[%s3752_s7 + $0xe8] sm:$0xff]  }
  0xe3   :  { %3016 = vpow2.f32 %v149_v36  ;;  %v2910_v36 = vld [vmem:[%s3752_s7 + $0x30] sm:$0xff]  }
  0xec   :  { %v3015_v37 = vpop.eup %3014 }
  0xed   :  { %v3017_v38 = vpop.eup %3016  ;;  %v151_v40 = vpack.c.bf16 %v3015_v37, %v3015_v37  ;;  %v2911_v37 = vld [vmem:[%s3752_s7 + $0xa8] sm:$0xff]  }
  0xee   :  { %v152_v39 = vpack.c.bf16 %v3017_v38, %v3017_v38  ;;  %v2912_v38 = vld [vmem:[%s3752_s7 + $0x78] sm:$0xff]  }
  0xf0   :  { %320 = vmatprep.mubr.bf16.mxu1 %v152_v39  ;;  %v2913_v39 = vld [vmem:[%s3752_s7 + $0xf0] sm:$0xff]  }
  0xf1   :  { %321 = vmatmul.mubr.bf16.vlgmr.msra.gmra.mrb[4].mxu1 %v151_v40  ;;  %v2914_v40 = vld [vmem:[%s3752_s7 + $0x38] sm:$0xff]  }
  0xf2   :  { %2683 = vmatpush3.bf16.msra.mxu1 %v2891_v51 }
  0xf3   :  { %2684 = vmatprep.subr.bf16.mxu1 %v2893_v52 }
  0xf6   :  { %2685 = vmatpush3.bf16.msra.mxu1 %v2895_v18 }
  0xf7   :  { %2686 = vmatprep.subr.bf16.mxu1 %v2897_v20 }
  0xfa   :  { %2687 = vmatpush3.bf16.msra.mxu1 %v2899_v25 }
  0xfb   :  { %2688 = vmatprep.subr.bf16.mxu1 %v2901_v27  ;;  %v652_v27 = vsub.s32 4, %v3177_v21 }
  0xfe   :  { %2689 = vmatpush3.bf16.msra.mxu1 %v2903_v29 }
  0xff   :  { %2690 = vmatprep.subr.bf16.mxu1 %v2905_v31 }
 0x102   :  { %2691 = vmatpush3.bf16.msra.mxu1 %v2907_v33  ;;  %v660_v33 = vsub.s32 6, %v3177_v21 }
 0x103   :  { %2692 = vmatprep.subr.bf16.mxu1 %v2909_v35  ;;  %v2919_v35 = vld [vmem:[%s3752_s7 + $0x100] sm:$0xff]  }
 0x106   :  { %2693 = vmatpush3.bf16.msra.mxu1 %v2911_v37  ;;  %v2920_v37 = vld [vmem:[%s3752_s7 + $0x148] sm:$0xff]  }
 0x107   :  { %2694 = vmatprep.subr.bf16.mxu1 %v2913_v39 }
 0x10a   :  { %2695 = vmatpush3.bf16.msra.mxu1 %v2915_v41  ;;  %v661_v41 = vrot.slane %v3353_v46, %v660_v33 }
 0x10b   :  { %2696 = vmatprep.subr.bf16.mxu1 %v2916_v42 }
 0x10e   :  { %2697 = vmatpush3.bf16.msra.mxu1 %v2918_v44  ;;  %v2923_v44 = vld [vmem:[%s3752_s7 + $0x180] sm:$0xff]  }
 0x10f   :  { %2726 = vmatprep.subr.bf16.mxu1 %v2921_v45 }
 0x1c4   :  { %v2654_v53 = vpop.f32.mrb[4].mxu1 }
 0x1c5   :  { %v2655_v57 = vpop.f32.mrb[5].mxu1 }
 0x1c6   :  { %v2656_v60 = vadd.f32 %v2655_v57, %v2654_v53  ;;  %v2657_v61 = vpop.f32.mrb[6].mxu1  ;;  %v656_v57 = vsub.s32 5, %v3177_v21  ;;  %v2989_v21 = vld [vmem:[%s3756_s11 + $0x1c8] sm:$0xff]  }
 0x1c7   :  { %v2658_v62 = vpop.f32.mrb[7].mxu1 }
 0x1c8   :  { %v323_v0 = vadd.f32 %v2656_v60, %v2483_v56  ;;  %v649_v56 = vrot.slane %v3353_v46, %v648_v50  ;;  %v657_v3 = vrot.slane %v3353_v46, %v656_v57 }
 0x1ca   :  { %2500 = vmatmul.mubr.msk.f32.vlgmr.msra.gmra.mrb[0].mxu0 %vm344_vm2, %v323_v0 }
 0x1cb   :  { %2843 = vmatpush1.bf16.msra.mxu0 %v2842_v63  ;;  %483 = vmatprep.mubr.f32.mxu0 %v3050_v1 }
 0x1cc   :  { %2845 = vmatprep.subr.bf16.mxu0 %v2844_v2 }
 0x1ce   :  { %2501 = vmatmul.mubr.msk.f32.vlgmr.msra.gmra.mrb[2].mxu0 %vm344_vm2, %v323_v0 }
 0x1cf   :  { %2847 = vmatpush1.bf16.msra.mxu0 %v2846_v7  ;;  %554 = vmatprep.mubr.f32.mxu0 %v3050_v1 }
 0x1d0   :  { %2849 = vmatprep.subr.bf16.mxu0 %v2848_v8 }
 0x1d2   :  { %2502 = vmatmul.mubr.msk.f32.vlgmr.msra.gmra.mrb[4].mxu0 %vm344_vm2, %v323_v0 }
 0x1d3   :  { %2851 = vmatpush1.bf16.msra.mxu0 %v2850_v11  ;;  %625 = vmatprep.mubr.f32.mxu0 %v3050_v1 }
 0x1d4   :  { %2660 = vmatprep.subr.bf16.mxu0 %v2886_v12 }
 0x1d6   :  { %2503 = vmatmul.mubr.msk.f32.vlgmr.msra.gmra.mrb[6].mxu0 %vm344_vm2, %v323_v0 }
 0x1d7   :  { %2661 = vmatpush3.bf16.msra.mxu0 %v2887_v13 }
 0x1d8   :  { %2662 = vmatprep.subr.bf16.mxu0 %v2888_v14  ;;  %v665_v14 = vrot.slane %v3353_v46, %v664_v4 }
 0x1db   :  { %2663 = vmatpush3.bf16.msra.mxu0 %v2890_v15 }
 0x1dc   :  { %2664 = vmatprep.subr.bf16.mxu0 %v2892_v16 }
 0x1df   :  { %2665 = vmatpush3.bf16.msra.mxu0 %v2894_v17 }
 0x1e0   :  { %2666 = vmatprep.subr.bf16.mxu0 %v2896_v19 }
 0x1e3   :  { %2667 = vmatpush3.bf16.msra.mxu0 %v2898_v23 }
 0x1e4   :  { %2668 = vmatprep.subr.bf16.mxu0 %v2900_v26 }
 0x1e7   :  { %2669 = vmatpush3.bf16.msra.mxu0 %v2902_v28 }
 0x1e8   :  { %2670 = vmatprep.subr.bf16.mxu0 %v2904_v30 }
 0x1eb   :  { %2671 = vmatpush3.bf16.msra.mxu0 %v2906_v32  ;;  %v653_v32 = vrot.slane %v3353_v46, %v652_v27  ;;  %v2925_v46 = vld [vmem:[%s3752_s7 + $0x1c8] sm:$0xff]  }
 0x1ec   :  { %2672 = vmatprep.subr.bf16.mxu0 %v2908_v34 }
 0x1ef   :  { %2673 = vmatpush3.bf16.msra.mxu0 %v2910_v36 }
 0x1f0   :  { %2674 = vmatprep.subr.bf16.mxu0 %v2912_v38 }
 0x1f3   :  { %2675 = vmatpush3.bf16.msra.mxu0 %v2914_v40 }
 0x1f4   :  { %2704 = vmatprep.subr.bf16.mxu0 %v2917_v43  ;;  %v2922_v43 = vld [vmem:[%s3752_s7 + $0x108] sm:$0xff]  }
 0x29d   :  { %v414_v51 = vpop.f32.mrb[0].mxu0 }
 0x29e   :  { %v674_v52 = vsub.f32 %v414_v51, %v637_v47  ;;  %v416_v53 = vpop.f32.mrb[1].mxu0  ;;  %v2924_v47 = vld [vmem:[%s3752_s7 + $0x150] sm:$0xff]  }
 0x29f   :  { %v675_v55 = vsub.f32 %v416_v53, %v641_v49 }
 0x2a0   :  { %v682_v58 = vand.u32 2147483647, %v674_v52 }
 0x2a1   :  { %v683_v59 = vand.u32 2147483647, %v675_v55  ;;  %v485_v60 = vpop.f32.mrb[2].mxu0  ;;  %v2927_v55 = vld [vmem:[%s3752_s7 + $0x188] sm:$0xff]  }
 0x2a2   :  { %v690_v61 = vsub.f32 0.0, %v682_v58  ;;  %v676_v62 = vsub.f32 %v485_v60, %v645_v54  ;;  %v487_v63 = vpop.f32.mrb[3].mxu0  ;;  %v2926_v54 = vld [vmem:[%s3752_s7 + $0x110] sm:$0xff]  }
 0x2a3   :  { %v691_v0 = vsub.f32 0.0, %v683_v59  ;;  %v677_v2 = vsub.f32 %v487_v63, %v649_v56  ;;  %v2928_v56 = vld [vmem:[%s3752_s7 + $0x158] sm:$0xff]   ;;  %v2929_v58 = vld [vmem:[%s3752_s7 + $0x1d0] sm:$0xff]  }
 0x2a4   :  { %v698_v5 = vmul.f32 1.442695, %v690_v61  ;;  %v684_v6 = vand.u32 2147483647, %v676_v62  ;;  %v2930_v63 = vld [vmem:[%s3752_s7 + $0x118] sm:$0xff]  }
 0x2a5   :  { %v700_v7 = vmul.f32 1.442695, %v691_v0  ;;  %v685_v8 = vand.u32 2147483647, %v677_v2  ;;  %v556_v9 = vpop.f32.mrb[4].mxu0  ;;  %v2931_v0 = vld [vmem:[%s3752_s7 + $0x190] sm:$0xff]  }
 0x2a6   :  { %3018 = vpow2.f32 %v698_v5  ;;  %v692_v10 = vsub.f32 0.0, %v684_v6  ;;  %v558_v11 = vpop.f32.mrb[5].mxu0  ;;  %v678_v40 = vsub.f32 %v556_v9, %v653_v32  ;;  %v2932_v2 = vld [vmem:[%s3752_s7 + $0x160] sm:$0xff]   ;;  %v2936_v9 = vld [vmem:[%s3752_s7 + $0x168] sm:$0xff]  }
 0x2a7   :  { %3020 = vpow2.f32 %v700_v7  ;;  %v693_v12 = vsub.f32 0.0, %v685_v8  ;;  %v679_v13 = vsub.f32 %v558_v11, %v657_v3  ;;  %v2933_v3 = vld [vmem:[%s3752_s7 + $0x1d8] sm:$0xff]   ;;  %v2934_v7 = vld [vmem:[%s3752_s7 + $0x120] sm:$0xff]   ;;  %v1402_v32 = vld [vmem:[%s3755_s9 + $0x8] sm:$0xff] }
 0x2a8   :  { %v702_v15 = vmul.f32 1.442695, %v692_v10  ;;  %v686_v51 = vand.u32 2147483647, %v678_v40  ;;  %v2935_v8 = vld [vmem:[%s3752_s7 + $0x198] sm:$0xff]   ;;  %v2937_v10 = vld [vmem:[%s3752_s7 + $0x1e0] sm:$0xff]  }
 0x2a9   :  { %v704_v16 = vmul.f32 1.442695, %v693_v12  ;;  %v687_v17 = vand.u32 2147483647, %v679_v13  ;;  %v627_v18 = vpop.f32.mrb[6].mxu0  ;;  %v2938_v12 = vld [vmem:[%s3752_s7 + $0x128] sm:$0xff]  }
 0x2aa   :  { %3022 = vpow2.f32 %v702_v15  ;;  %v629_v19 = vpop.f32.mrb[7].mxu0  ;;  %v680_v52 = vsub.f32 %v627_v18, %v661_v41  ;;  %v694_v60 = vsub.f32 0.0, %v686_v51  ;;  %v2939_v13 = vld [vmem:[%s3752_s7 + $0x1a0] sm:$0xff]   ;;  %v2941_v15 = vld [vmem:[%s3752_s7 + $0x1e8] sm:$0xff]   ;;  %v2944_v18 = vld [vmem:[%s3752_s7 + $0x178] sm:$0xff]  }
 0x2ab   :  { %3024 = vpow2.f32 %v704_v16  ;;  %v695_v20 = vsub.f32 0.0, %v687_v17  ;;  %v681_v23 = vsub.f32 %v629_v19, %v665_v14  ;;  %v2940_v14 = vld [vmem:[%s3752_s7 + $0x170] sm:$0xff]   ;;  %v2943_v17 = vld [vmem:[%s3752_s7 + $0x1a8] sm:$0xff]   ;;  %v1412_v40 = vld [vmem:[%s3755_s9 + $0x58] sm:$0xff] }
 0x2ac   :  { %v688_v61 = vand.u32 2147483647, %v680_v52  ;;  %v706_v5 = vmul.f32 1.442695, %v694_v60  ;;  %v2942_v16 = vld [vmem:[%s3752_s7 + $0x130] sm:$0xff]  }
 0x2ad   :  { %v708_v25 = vmul.f32 1.442695, %v695_v20  ;;  %v689_v26 = vand.u32 2147483647, %v681_v23  ;;  %v2945_v19 = vld [vmem:[%s3752_s7 + $0x1f0] sm:$0xff]   ;;  %v2946_v20 = vld [vmem:[%s3752_s7 + $0x138] sm:$0xff]  }
 0x2ae   :  { %v696_v6 = vsub.f32 0.0, %v688_v61  ;;  %v2947_v23 = vld [vmem:[%s3752_s7 + $0x1b0] sm:$0xff]  }
 0x2af   :  { %3026 = vpow2.f32 %v708_v25  ;;  %v697_v28 = vsub.f32 0.0, %v689_v26  ;;  %v2948_v25 = vld [vmem:[%s3752_s7 + $0x1f8] sm:$0xff]  }
 0x2b0   :  { %v3019_v29 = vpop.eup %3018  ;;  %v710_v11 = vmul.f32 1.442695, %v696_v6 }
 0x2b1   :  { %v3021_v30 = vpop.eup %3020  ;;  %v712_v31 = vmul.f32 1.442695, %v697_v28  ;;  %v714_v36 = vpack.c.bf16 %v3019_v29, %v3019_v29  ;;  %v2949_v28 = vld [vmem:[%s3752_s7 + $0x1b8] sm:$0xff]  }
 0x2b2   :  { %v715_v34 = vpack.c.bf16 %v3021_v30, %v3021_v30 }
 0x2b3   :  { %3028 = vpow2.f32 %v712_v31 }
 0x2b4   :  { %v3023_v38 = vpop.eup %3022  ;;  %1273 = vmatprep.mubr.bf16.mxu0 %v715_v34  ;;  %3030 = vpow2.f32 %v706_v5  ;;  %v1410_v34 = vld [vmem:[%s3755_s9 + $0x48] sm:$0xff] }
 0x2b5   :  { %v3025_v39 = vpop.eup %3024  ;;  %1274 = vmatmul.mubr.bf16.vlgmr.msra.gmra.mrb[8].mxu0 %v714_v36  ;;  %v716_v45 = vpack.c.bf16 %v3023_v38, %v3023_v38  ;;  %3032 = vpow2.f32 %v710_v11  ;;  %v1401_v36 = vld [vmem:[%s3755_s9] sm:$0xff]  ;;  %v1406_v11 = vld [vmem:[%s3755_s9 + $0x28] sm:$0xff] }
 0x2b6   :  { %2705 = vmatpush3.bf16.msra.mxu0 %v2919_v35  ;;  %v717_v42 = vpack.c.bf16 %v3025_v39, %v3025_v39  ;;  %v2852_v35 = vpack.c.bf16 %v1410_v34, %v1402_v32  ;;  %v1404_v39 = vld [vmem:[%s3755_s9 + $0x18] sm:$0xff]  ;;  %v2953_v32 = vld [vmem:[%s3756_s11 + $0xc0] sm:$0xff]  }
 0x2b7   :  { %2706 = vmatprep.subr.bf16.mxu0 %v2920_v37  ;;  %v1409_v37 = vld [vmem:[%s3755_s9 + $0x40] sm:$0xff]  ;;  %v2856_v41 = vpack.c.bf16 %v1412_v40, %v1404_v39  ;;  %v2962_v39 = vld [vmem:[%s3756_s11 + $0x18] sm:$0xff]   ;;  %v2963_v40 = vld [vmem:[%s3756_s11 + $0x90] sm:$0xff]  }
 0x2b8   :  { %1313 = vmatprep.mubr.bf16.mxu1 %v717_v42  ;;  %v2854_v38 = vpack.c.bf16 %v1409_v37, %v1401_v36  ;;  %v2950_v42 = vld [vmem:[%s3756_s11 + $0x40] sm:$0xff]   ;;  %v2958_v36 = vld [vmem:[%s3756_s11 + $0x10] sm:$0xff]   ;;  %v2960_v37 = vld [vmem:[%s3756_s11 + $0x58] sm:$0xff]  }
 0x2b9   :  { %v3027_v49 = vpop.eup %3026  ;;  %1314 = vmatmul.mubr.bf16.vlgmr.msra.gmra.mrb[8].mxu1 %v716_v45  ;;  %v2954_v45 = vld [vmem:[%s3756_s11 + $0x8] sm:$0xff]   ;;  %v2955_v34 = vld [vmem:[%s3756_s11 + $0x80] sm:$0xff]  }
 0x2ba   :  { %2707 = vmatpush3.bf16.msra.mxu0 %v2922_v43  ;;  %2727 = vmatpush3.bf16.msra.mxu1 %v2923_v44  ;;  %v719_v53 = vpack.c.bf16 %v3027_v49, %v3027_v49  ;;  %v2951_v43 = vld [vmem:[%s3756_s11] sm:$0xff]   ;;  %v2952_v44 = vld [vmem:[%s3756_s11 + $0x48] sm:$0xff]  }
 0x2bb   :  { %2708 = vmatprep.subr.bf16.mxu0 %v2924_v47  ;;  %2728 = vmatprep.subr.bf16.mxu1 %v2925_v46  ;;  %v2956_v47 = vld [vmem:[%s3756_s11 + $0x50] sm:$0xff]  }
 0x2bc   :  { %1353 = vmatprep.mubr.bf16.mxu0 %v719_v53  ;;  %v2504_v53 = vld [vmem:[%s3757_s8] ss:$0 sm:$0xff] }
 0x2bd   :  { %v3029_v59 = vpop.eup %3028 }
 0x2be   :  { %2709 = vmatpush3.bf16.msra.mxu0 %v2926_v54  ;;  %2729 = vmatpush3.bf16.msra.mxu1 %v2927_v55  ;;  %v721_v62 = vpack.c.bf16 %v3029_v59, %v3029_v59  ;;  %v3031_v26 = vpop.eup %3030 }
 0x2bf   :  { %2710 = vmatprep.subr.bf16.mxu0 %v2928_v56  ;;  %2730 = vmatprep.subr.bf16.mxu1 %v2929_v58  ;;  %v718_v29 = vpack.c.bf16 %v3031_v26, %v3031_v26  ;;  %v3033_v30 = vpop.eup %3032 }
 0x2c0   :  { %1393 = vmatprep.mubr.bf16.mxu1 %v721_v62  ;;  %v720_v31 = vpack.c.bf16 %v3033_v30, %v3033_v30  ;;  %v1415_v30 = vld [vmem:[%s3755_s9 + $0x70] sm:$0xff] }
 0x2c2   :  { %2711 = vmatpush3.bf16.msra.mxu0 %v2930_v63  ;;  %2731 = vmatpush3.bf16.msra.mxu1 %v2931_v0 }
 0x2c3   :  { %2712 = vmatprep.subr.bf16.mxu0 %v2932_v2  ;;  %2732 = vmatprep.subr.bf16.mxu1 %v2933_v3 }
 0x2c6   :  { %2713 = vmatpush3.bf16.msra.mxu0 %v2934_v7  ;;  %2733 = vmatpush3.bf16.msra.mxu1 %v2935_v8  ;;  %v1403_v8 = vld [vmem:[%s3755_s9 + $0x10] sm:$0xff] }
 0x2c7   :  { %2714 = vmatprep.subr.bf16.mxu0 %v2936_v9  ;;  %2734 = vmatprep.subr.bf16.mxu1 %v2937_v10  ;;  %v1411_v9 = vld [vmem:[%s3755_s9 + $0x50] sm:$0xff] }
 0x2ca   :  { %2715 = vmatpush3.bf16.msra.mxu0 %v2938_v12  ;;  %2735 = vmatpush3.bf16.msra.mxu1 %v2939_v13  ;;  %v1414_v12 = vld [vmem:[%s3755_s9 + $0x68] sm:$0xff] }
 0x2cb   :  { %2716 = vmatprep.subr.bf16.mxu0 %v2940_v14  ;;  %2736 = vmatprep.subr.bf16.mxu1 %v2941_v15 }
 0x2ce   :  { %2717 = vmatpush3.bf16.msra.mxu0 %v2942_v16  ;;  %2737 = vmatpush3.bf16.msra.mxu1 %v2943_v17  ;;  %v2858_v16 = vpack.c.bf16 %v1411_v9, %v1403_v8 }
 0x2cf   :  { %2718 = vmatprep.subr.bf16.mxu0 %v2944_v18  ;;  %2738 = vmatprep.subr.bf16.mxu1 %v2945_v19  ;;  %v2860_v18 = vpack.c.bf16 %v1414_v12, %v1406_v11  ;;  %v1405_v19 = vld [vmem:[%s3755_s9 + $0x20] sm:$0xff] }
 0x2d2   :  { %2719 = vmatpush3.bf16.msra.mxu0 %v2946_v20  ;;  %2739 = vmatpush3.bf16.msra.mxu1 %v2947_v23  ;;  %v1413_v20 = vld [vmem:[%s3755_s9 + $0x60] sm:$0xff]  ;;  %v1408_v23 = vld [vmem:[%s3755_s9 + $0x38] sm:$0xff] }
 0x2d3   :  { %2740 = vmatprep.subr.bf16.mxu1 %v2948_v25  ;;  %2853 = vmatprep.subr.bf16.mxu0 %v2852_v35  ;;  %v1416_v25 = vld [vmem:[%s3755_s9 + $0x78] sm:$0xff]  ;;  %v2862_v26 = vpack.c.bf16 %v1413_v20, %v1405_v19  ;;  %v2957_v35 = vld [vmem:[%s3756_s11 + $0xc8] sm:$0xff]  }
 0x2d5   :  { %1354 = vmatmul.mubr.bf16.vlgmr.msra.gmra.mrb[12].mxu0 %v718_v29  ;;  %v1407_v29 = vld [vmem:[%s3755_s9 + $0x30] sm:$0xff] }
 0x2d6   :  { %2741 = vmatpush3.bf16.msra.mxu1 %v2949_v28  ;;  %1484 = vmatprep.mubr.f32.mxu0 %v3050_v1  ;;  %v2864_v28 = vpack.c.bf16 %v1416_v25, %v1408_v23 }
 0x2d7   :  { %2855 = vmatpush1.bf16.msra.mxu0 %v2854_v38  ;;  %2748 = vmatprep.subr.bf16.mxu1 %v2950_v42  ;;  %v2961_v38 = vld [vmem:[%s3756_s11 + $0xd0] sm:$0xff]   ;;  %v2965_v42 = vld [vmem:[%s3756_s11 + $0xd8] sm:$0xff]  }
 0x2d8   :  { %2857 = vmatprep.subr.bf16.mxu0 %v2856_v41  ;;  %v2964_v41 = vld [vmem:[%s3756_s11 + $0x60] sm:$0xff]  }
 0x2d9   :  { %1394 = vmatmul.mubr.bf16.vlgmr.msra.gmra.mrb[12].mxu1 %v720_v31  ;;  %v2866_v31 = vpack.c.bf16 %v1415_v30, %v1407_v29 }
 0x2da   :  { %2749 = vmatpush3.bf16.msra.mxu1 %v2951_v43  ;;  %v2966_v43 = vld [vmem:[%s3756_s11 + $0x20] sm:$0xff]  }
 0x2db   :  { %2750 = vmatprep.subr.bf16.mxu1 %v2952_v44  ;;  %v2967_v44 = vld [vmem:[%s3756_s11 + $0x98] sm:$0xff]  }
 0x2de   :  { %2751 = vmatpush3.bf16.msra.mxu1 %v2954_v45  ;;  %v2968_v45 = vld [vmem:[%s3756_s11 + $0x68] sm:$0xff]  }
 0x2df   :  { %2752 = vmatprep.subr.bf16.mxu1 %v2956_v47  ;;  %v2969_v47 = vld [vmem:[%s3756_s11 + $0xe0] sm:$0xff]  }
 0x2e2   :  { %2753 = vmatpush3.bf16.msra.mxu1 %v2958_v36 }
 0x2e3   :  { %2754 = vmatprep.subr.bf16.mxu1 %v2960_v37 }
 0x2e6   :  { %2755 = vmatpush3.bf16.msra.mxu1 %v2962_v39 }
 0x2e7   :  { %2756 = vmatprep.subr.bf16.mxu1 %v2964_v41 }
 0x2ea   :  { %2757 = vmatpush3.bf16.msra.mxu1 %v2966_v43  ;;  %v2983_v43 = vld [vmem:[%s3756_s11 + $0x100] sm:$0xff]  }
 0x2eb   :  { %2758 = vmatprep.subr.bf16.mxu1 %v2968_v45  ;;  %v2984_v45 = vld [vmem:[%s3756_s11 + $0x148] sm:$0xff]  }
 0x388   :  { %v2676_v46 = vpop.f32.mrb[8].mxu0 }
 0x389   :  { %v2677_v49 = vpop.f32.mrb[9].mxu0 }
 0x38a   :  { %v2678_v51 = vadd.f32 %v2677_v49, %v2676_v46  ;;  %v2679_v52 = vpop.f32.mrb[10].mxu0  ;;  %v2970_v46 = vld [vmem:[%s3756_s11 + $0x28] sm:$0xff]   ;;  %v2971_v49 = vld [vmem:[%s3756_s11 + $0xa0] sm:$0xff]  }
 0x38b   :  { %v2680_v54 = vpop.f32.mrb[11].mxu0  ;;  %2759 = vmatpush3.bf16.msra.mxu1 %v2970_v46  ;;  %v2973_v52 = vld [vmem:[%s3756_s11 + $0xe8] sm:$0xff]  }
 0x38c   :  { %v2698_v55 = vpop.f32.mrb[8].mxu1  ;;  %v1276_v58 = vadd.f32 %v2678_v51, %v2504_v53  ;;  %v2972_v51 = vld [vmem:[%s3756_s11 + $0x70] sm:$0xff]   ;;  %v2975_v54 = vld [vmem:[%s3756_s11 + $0xa8] sm:$0xff]  }
 0x38d   :  { %v2699_v56 = vpop.f32.mrb[9].mxu1  ;;  %v2974_v53 = vld [vmem:[%s3756_s11 + $0x30] sm:$0xff]   ;;  %2760 = vmatprep.subr.bf16.mxu1 %v2972_v51 }
 0x38e   :  { %v2700_v59 = vadd.f32 %v2699_v56, %v2698_v55  ;;  %v2701_v60 = vpop.f32.mrb[10].mxu1  ;;  %v2976_v55 = vld [vmem:[%s3756_s11 + $0x78] sm:$0xff]   ;;  %v2977_v56 = vld [vmem:[%s3756_s11 + $0xf0] sm:$0xff]  }
 0x38f   :  { %v2702_v61 = vpop.f32.mrb[11].mxu1  ;;  %2761 = vmatpush3.bf16.msra.mxu1 %v2974_v53  ;;  %v2980_v60 = vld [vmem:[%s3756_s11 + $0xf8] sm:$0xff]   ;;  %v2987_v53 = vld [vmem:[%s3756_s11 + $0x180] sm:$0xff]  }
 0x390   :  { %v1316_v62 = vadd.f32 %v2700_v59, %v1276_v58  ;;  %v2978_v58 = vld [vmem:[%s3756_s11 + $0x38] sm:$0xff]   ;;  %v2979_v59 = vld [vmem:[%s3756_s11 + $0xb0] sm:$0xff]   ;;  %2762 = vmatprep.subr.bf16.mxu1 %v2976_v55  ;;  %v2981_v61 = vld [vmem:[%s3756_s11 + $0x140] sm:$0xff]  }
 0x391   :  { %v2988_v55 = vld [vmem:[%s3756_s11 + $0x150] sm:$0xff]  }
 0x393   :  { %2763 = vmatpush3.bf16.msra.mxu1 %v2978_v58 }
 0x394   :  { %2792 = vmatprep.subr.bf16.mxu1 %v2981_v61  ;;  %v2991_v61 = vld [vmem:[%s3756_s11 + $0x188] sm:$0xff]  }
 0x3a8   :  { %v2720_v63 = vpop.f32.mrb[12].mxu0 }
 0x3a9   :  { %v2721_v0 = vpop.f32.mrb[13].mxu0 }
 0x3aa   :  { %v2722_v2 = vadd.f32 %v2721_v0, %v2720_v63  ;;  %v2723_v3 = vpop.f32.mrb[14].mxu0  ;;  %v2985_v63 = vld [vmem:[%s3756_s11 + $0x1c0] sm:$0xff]  }
 0x3ab   :  { %v2724_v5 = vpop.f32.mrb[15].mxu0  ;;  %v1704_v0 = vld [vmem:[%s3758_s10] sm:$0xff] }
 0x3ac   :  { %v1356_v6 = vadd.f32 %v2722_v2, %v1316_v62  ;;  %v2742_v7 = vpop.f32.mrb[12].mxu1  ;;  %v2982_v62 = vld [vmem:[%s3756_s11 + $0xb8] sm:$0xff]   ;;  %v1709_v2 = vrot.slane %v1704_v0, %v3180_v22  ;;  %v1713_v3 = vrot.slane %v1704_v0, %v3186_v24  ;;  %v1717_v8 = vrot.slane %v1704_v0, %v644_v48 }
 0x3ad   :  { %v2743_v10 = vpop.f32.mrb[13].mxu1  ;;  %v1729_v24 = vrot.slane %v1704_v0, %v656_v57  ;;  %v1737_v29 = vrot.slane %v1704_v0, %v664_v4  ;;  %v1733_v51 = vrot.slane %v1704_v0, %v660_v33 }
 0x3ae   :  { %v2744_v13 = vadd.f32 %v2743_v10, %v2742_v7  ;;  %v2745_v14 = vpop.f32.mrb[14].mxu1  ;;  %v1721_v10 = vrot.slane %v1704_v0, %v648_v50 }
 0x3af   :  { %v2746_v15 = vpop.f32.mrb[15].mxu1 }
 0x3b0   :  { %v1396_v17 = vadd.f32 %v2744_v13, %v1356_v6 }
 0x3b2   :  { %2569 = vmatmul.mubr.msk.f32.vlgmr.msra.gmra.mrb[16].mxu0 %vm344_vm2, %v1396_v17 }
 0x3b3   :  { %2859 = vmatpush1.bf16.msra.mxu0 %v2858_v16  ;;  %1555 = vmatprep.mubr.f32.mxu0 %v3050_v1 }
 0x3b4   :  { %2861 = vmatprep.subr.bf16.mxu0 %v2860_v18 }
 0x3b6   :  { %2570 = vmatmul.mubr.msk.f32.vlgmr.msra.gmra.mrb[18].mxu0 %vm344_vm2, %v1396_v17 }
 0x3b7   :  { %2863 = vmatpush1.bf16.msra.mxu0 %v2862_v26  ;;  %1626 = vmatprep.mubr.f32.mxu0 %v3050_v1 }
 0x3b8   :  { %2865 = vmatprep.subr.bf16.mxu0 %v2864_v28 }
 0x3ba   :  { %2571 = vmatmul.mubr.msk.f32.vlgmr.msra.gmra.mrb[20].mxu0 %vm344_vm2, %v1396_v17 }
 0x3bb   :  { %2867 = vmatpush1.bf16.msra.mxu0 %v2866_v31  ;;  %1697 = vmatprep.mubr.f32.mxu0 %v3050_v1  ;;  %v2959_v1 = vld [vmem:[%s3756_s11 + $0x88] sm:$0xff]  }
 0x3bc   :  { %2770 = vmatprep.subr.bf16.mxu0 %v2953_v32 }
 0x3be   :  { %2572 = vmatmul.mubr.msk.f32.vlgmr.msra.gmra.mrb[22].mxu0 %vm344_vm2, %v1396_v17 }
 0x3bf   :  { %2771 = vmatpush3.bf16.msra.mxu0 %v2955_v34 }
 0x3c0   :  { %2772 = vmatprep.subr.bf16.mxu0 %v2957_v35 }
 0x3c3   :  { %2773 = vmatpush3.bf16.msra.mxu0 %v2959_v1 }
 0x3c4   :  { %2774 = vmatprep.subr.bf16.mxu0 %v2961_v38 }
 0x3c7   :  { %2775 = vmatpush3.bf16.msra.mxu0 %v2963_v40 }
 0x3c8   :  { %2776 = vmatprep.subr.bf16.mxu0 %v2965_v42  ;;  %v1725_v42 = vrot.slane %v1704_v0, %v652_v27 }
 0x3cb   :  { %2777 = vmatpush3.bf16.msra.mxu0 %v2967_v44 }
 0x3cc   :  { %2778 = vmatprep.subr.bf16.mxu0 %v2969_v47 }
 0x3cf   :  { %2779 = vmatpush3.bf16.msra.mxu0 %v2971_v49 }
 0x3d0   :  { %2780 = vmatprep.subr.bf16.mxu0 %v2973_v52  ;;  %v2986_v52 = vld [vmem:[%s3756_s11 + $0x108] sm:$0xff]  }
 0x3d3   :  { %2781 = vmatpush3.bf16.msra.mxu0 %v2975_v54 }
 0x3d4   :  { %2782 = vmatprep.subr.bf16.mxu0 %v2977_v56 }
 0x3d7   :  { %2783 = vmatpush3.bf16.msra.mxu0 %v2979_v59 }
 0x3d8   :  { %2784 = vmatprep.subr.bf16.mxu0 %v2980_v60  ;;  %v2990_v60 = vld [vmem:[%s3756_s11 + $0x110] sm:$0xff]  }
 0x3db   :  { %2785 = vmatpush3.bf16.msra.mxu0 %v2982_v62  ;;  %v2992_v62 = vld [vmem:[%s3756_s11 + $0x158] sm:$0xff]  }
 0x3dc   :  { %2814 = vmatprep.subr.bf16.mxu0 %v2985_v63  ;;  %v2993_v63 = vld [vmem:[%s3756_s11 + $0x1d0] sm:$0xff]  }
 0x485   :  { %v1486_v5 = vpop.f32.mrb[16].mxu0 }
 0x486   :  { %v1746_v6 = vsub.f32 %v1486_v5, %v1709_v2  ;;  %v1488_v7 = vpop.f32.mrb[17].mxu0 }
 0x487   :  { %v1747_v9 = vsub.f32 %v1488_v7, %v1713_v3  ;;  %v2995_v7 = vld [vmem:[%s3756_s11 + $0x190] sm:$0xff]  }
 0x488   :  { %v1754_v11 = vand.u32 2147483647, %v1746_v6  ;;  %v2994_v6 = vld [vmem:[%s3756_s11 + $0x118] sm:$0xff]  }
 0x489   :  { %v1755_v12 = vand.u32 2147483647, %v1747_v9  ;;  %v1557_v13 = vpop.f32.mrb[18].mxu0  ;;  %v2997_v9 = vld [vmem:[%s3756_s11 + $0x1d8] sm:$0xff]  }
 0x48a   :  { %v1762_v14 = vsub.f32 0.0, %v1754_v11  ;;  %v1748_v15 = vsub.f32 %v1557_v13, %v1717_v8  ;;  %v1559_v16 = vpop.f32.mrb[19].mxu0  ;;  %v2996_v8 = vld [vmem:[%s3756_s11 + $0x160] sm:$0xff]   ;;  %v2999_v13 = vld [vmem:[%s3756_s11 + $0x198] sm:$0xff]  }
 0x48b   :  { %v1763_v17 = vsub.f32 0.0, %v1755_v12  ;;  %v1749_v22 = vsub.f32 %v1559_v16, %v1721_v10  ;;  %v2998_v12 = vld [vmem:[%s3756_s11 + $0x120] sm:$0xff]  }
 0x48c   :  { %v1770_v18 = vmul.f32 1.442695, %v1762_v14  ;;  %v1756_v19 = vand.u32 2147483647, %v1748_v15  ;;  %v3000_v14 = vld [vmem:[%s3756_s11 + $0x168] sm:$0xff]   ;;  %v3001_v15 = vld [vmem:[%s3756_s11 + $0x1e0] sm:$0xff]  }
 0x48d   :  { %v1772_v20 = vmul.f32 1.442695, %v1763_v17  ;;  %v1757_v23 = vand.u32 2147483647, %v1749_v22  ;;  %v1628_v48 = vpop.f32.mrb[20].mxu0  ;;  %v3002_v17 = vld [vmem:[%s3756_s11 + $0x128] sm:$0xff]  }
 0x48e   :  { %3034 = vpow2.f32 %v1770_v18  ;;  %v1764_v25 = vsub.f32 0.0, %v1756_v19  ;;  %v1630_v26 = vpop.f32.mrb[21].mxu0  ;;  %v1750_v49 = vsub.f32 %v1628_v48, %v1725_v42  ;;  %v3003_v22 = vld [vmem:[%s3756_s11 + $0x1a0] sm:$0xff]   ;;  %v3005_v18 = vld [vmem:[%s3756_s11 + $0x1e8] sm:$0xff]   ;;  %v3006_v19 = vld [vmem:[%s3756_s11 + $0x130] sm:$0xff]  }
 0x48f   :  { %3036 = vpow2.f32 %v1772_v20  ;;  %v1765_v50 = vsub.f32 0.0, %v1757_v23  ;;  %v1751_v28 = vsub.f32 %v1630_v26, %v1729_v24  ;;  %v3004_v24 = vld [vmem:[%s3756_s11 + $0x170] sm:$0xff]   ;;  %v3007_v20 = vld [vmem:[%s3756_s11 + $0x1a8] sm:$0xff]   ;;  %v3008_v23 = vld [vmem:[%s3756_s11 + $0x178] sm:$0xff]  }
 0x490   :  { %v1774_v30 = vmul.f32 1.442695, %v1764_v25  ;;  %v1758_v56 = vand.u32 2147483647, %v1750_v49  ;;  %v3009_v48 = vld [vmem:[%s3756_s11 + $0x1f0] sm:$0xff]   ;;  %v3010_v25 = vld [vmem:[%s3756_s11 + $0x138] sm:$0xff]  }
 0x491   :  { %v1776_v31 = vmul.f32 1.442695, %v1765_v50  ;;  %v1759_v32 = vand.u32 2147483647, %v1751_v28  ;;  %v1699_v34 = vpop.f32.mrb[22].mxu0  ;;  %v3011_v26 = vld [vmem:[%s3756_s11 + $0x1b0] sm:$0xff]  }
 0x492   :  { %3038 = vpow2.f32 %v1774_v30  ;;  %v1701_v57 = vpop.f32.mrb[23].mxu0  ;;  %v1752_v58 = vsub.f32 %v1699_v34, %v1733_v51  ;;  %v1766_v2 = vsub.f32 0.0, %v1758_v56  ;;  %v3012_v50 = vld [vmem:[%s3756_s11 + $0x1f8] sm:$0xff]  }
 0x493   :  { %3040 = vpow2.f32 %v1776_v31  ;;  %v1767_v35 = vsub.f32 0.0, %v1759_v32  ;;  %v1753_v36 = vsub.f32 %v1701_v57, %v1737_v29  ;;  %v3013_v29 = vld [vmem:[%s3756_s11 + $0x1b8] sm:$0xff]  }
 0x494   :  { %v1760_v3 = vand.u32 2147483647, %v1752_v58  ;;  %v1778_v10 = vmul.f32 1.442695, %v1766_v2 }
 0x495   :  { %v1780_v1 = vmul.f32 1.442695, %v1767_v35  ;;  %v1761_v37 = vand.u32 2147483647, %v1753_v36 }
 0x496   :  { %v1768_v11 = vsub.f32 0.0, %v1760_v3 }
 0x497   :  { %3042 = vpow2.f32 %v1780_v1  ;;  %v1769_v38 = vsub.f32 0.0, %v1761_v37  ;;  %v2573_v1 = vld [vmem:[%s3759_s12] ss:$0 sm:$0xff] }
 0x498   :  { %v3035_v39 = vpop.eup %3034  ;;  %v1782_v16 = vmul.f32 1.442695, %v1768_v11 }
 0x499   :  { %v3037_v40 = vpop.eup %3036  ;;  %v1784_v41 = vmul.f32 1.442695, %v1769_v38  ;;  %v1786_v44 = vpack.c.bf16 %v3035_v39, %v3035_v39 }
 0x49a   :  { %v1787_v4 = vpack.c.bf16 %v3037_v40, %v3037_v40 }
 0x49b   :  { %3044 = vpow2.f32 %v1784_v41 }
 0x49c   :  { %v3039_v47 = vpop.eup %3038  ;;  %2345 = vmatprep.mubr.bf16.mxu1 %v1787_v4  ;;  %3046 = vpow2.f32 %v1778_v10 }
 0x49d   :  { %v3041_v46 = vpop.eup %3040  ;;  %2346 = vmatmul.mubr.bf16.vlgmr.msra.gmra.mrb[16].mxu1 %v1786_v44  ;;  %v1788_v54 = vpack.c.bf16 %v3039_v47, %v3039_v47  ;;  %3048 = vpow2.f32 %v1782_v16 }
 0x49e   :  { %2793 = vmatpush3.bf16.msra.mxu1 %v2983_v43  ;;  %v1789_v27 = vpack.c.bf16 %v3041_v46, %v3041_v46 }
 0x49f   :  { %2794 = vmatprep.subr.bf16.mxu1 %v2984_v45 }
 0x4a0   :  { %2385 = vmatprep.mubr.bf16.mxu0 %v1789_v27 }
 0x4a1   :  { %v3043_v33 = vpop.eup %3042  ;;  %2386 = vmatmul.mubr.bf16.vlgmr.msra.gmra.mrb[24].mxu0 %v1788_v54 }
 0x4a2   :  { %2795 = vmatpush3.bf16.msra.mxu1 %v2986_v52  ;;  %2815 = vmatpush3.bf16.msra.mxu0 %v2987_v53  ;;  %v1791_v59 = vpack.c.bf16 %v3043_v33, %v3043_v33 }
 0x4a3   :  { %2796 = vmatprep.subr.bf16.mxu1 %v2988_v55  ;;  %2816 = vmatprep.subr.bf16.mxu0 %v2989_v21 }
 0x4a4   :  { %2425 = vmatprep.mubr.bf16.mxu1 %v1791_v59 }
 0x4a5   :  { %v3045_v0 = vpop.eup %3044 }
 0x4a6   :  { %2797 = vmatpush3.bf16.msra.mxu1 %v2990_v60  ;;  %2817 = vmatpush3.bf16.msra.mxu0 %v2991_v61  ;;  %v1793_v5 = vpack.c.bf16 %v3045_v0, %v3045_v0  ;;  %v3047_v28 = vpop.eup %3046 }
 0x4a7   :  { %2798 = vmatprep.subr.bf16.mxu1 %v2992_v62  ;;  %2818 = vmatprep.subr.bf16.mxu0 %v2993_v63  ;;  %v1790_v30 = vpack.c.bf16 %v3047_v28, %v3047_v28  ;;  %v3049_v31 = vpop.eup %3048 }
 0x4a8   :  { %2465 = vmatprep.mubr.bf16.mxu0 %v1793_v5  ;;  %v1792_v32 = vpack.c.bf16 %v3049_v31, %v3049_v31 }
 0x4aa   :  { %2799 = vmatpush3.bf16.msra.mxu1 %v2994_v6  ;;  %2819 = vmatpush3.bf16.msra.mxu0 %v2995_v7 }
 0x4ab   :  { %2800 = vmatprep.subr.bf16.mxu1 %v2996_v8  ;;  %2820 = vmatprep.subr.bf16.mxu0 %v2997_v9 }
 0x4ae   :  { %2801 = vmatpush3.bf16.msra.mxu1 %v2998_v12  ;;  %2821 = vmatpush3.bf16.msra.mxu0 %v2999_v13 }
 0x4af   :  { %2802 = vmatprep.subr.bf16.mxu1 %v3000_v14  ;;  %2822 = vmatprep.subr.bf16.mxu0 %v3001_v15 }
 0x4b2   :  { %2803 = vmatpush3.bf16.msra.mxu1 %v3002_v17  ;;  %2823 = vmatpush3.bf16.msra.mxu0 %v3003_v22 }
 0x4b3   :  { %2804 = vmatprep.subr.bf16.mxu1 %v3004_v24  ;;  %2824 = vmatprep.subr.bf16.mxu0 %v3005_v18 }
 0x4b6   :  { %2805 = vmatpush3.bf16.msra.mxu1 %v3006_v19  ;;  %2825 = vmatpush3.bf16.msra.mxu0 %v3007_v20 }
 0x4b7   :  { %2806 = vmatprep.subr.bf16.mxu1 %v3008_v23  ;;  %2826 = vmatprep.subr.bf16.mxu0 %v3009_v48 }
 0x4ba   :  { %2807 = vmatpush3.bf16.msra.mxu1 %v3010_v25  ;;  %2827 = vmatpush3.bf16.msra.mxu0 %v3011_v26 }
 0x4bb   :  { %2828 = vmatprep.subr.bf16.mxu0 %v3012_v50 }
 0x4bd   :  { %2426 = vmatmul.mubr.bf16.vlgmr.msra.gmra.mrb[20].mxu1 %v1790_v30 }
 0x4be   :  { %2829 = vmatpush3.bf16.msra.mxu0 %v3013_v29 }
 0x4c1   :  { %2466 = vmatmul.mubr.bf16.vlgmr.msra.gmra.mrb[28].mxu0 %v1792_v32 }
 0x570   :  { %v2764_v34 = vpop.f32.mrb[16].mxu1 }
 0x571   :  { %v2765_v57 = vpop.f32.mrb[17].mxu1 }
 0x572   :  { %v2766_v35 = vadd.f32 %v2765_v57, %v2764_v34  ;;  %v2767_v36 = vpop.f32.mrb[18].mxu1 }
 0x573   :  { %v2768_v37 = vpop.f32.mrb[19].mxu1 }
 0x574   :  { %v2786_v38 = vpop.f32.mrb[24].mxu0  ;;  %v2348_v40 = vadd.f32 %v2766_v35, %v2573_v1 }
 0x575   :  { %v2787_v39 = vpop.f32.mrb[25].mxu0 }
 0x576   :  { %v2788_v41 = vadd.f32 %v2787_v39, %v2786_v38  ;;  %v2789_v42 = vpop.f32.mrb[26].mxu0 }
 0x577   :  { %v2790_v4 = vpop.f32.mrb[27].mxu0 }
 0x578   :  { %v2388_v43 = vadd.f32 %v2788_v41, %v2348_v40 }
 0x590   :  { %v2808_v44 = vpop.f32.mrb[20].mxu1 }
 0x591   :  { %v2809_v45 = vpop.f32.mrb[21].mxu1 }
 0x592   :  { %v2810_v47 = vadd.f32 %v2809_v45, %v2808_v44  ;;  %v2811_v46 = vpop.f32.mrb[22].mxu1 }
 0x593   :  { %v2812_v49 = vpop.f32.mrb[23].mxu1 }
 0x594   :  { %v2428_v51 = vadd.f32 %v2810_v47, %v2388_v43  ;;  %v2830_v27 = vpop.f32.mrb[28].mxu0 }
 0x595   :  { %v2831_v52 = vpop.f32.mrb[29].mxu0 }
 0x596   :  { %v2832_v53 = vadd.f32 %v2831_v52, %v2830_v27  ;;  %v2833_v54 = vpop.f32.mrb[30].mxu0 }
 0x597   :  { %v2834_v55 = vpop.f32.mrb[31].mxu0 }
 0x598   :  { %v2468_v21 = vadd.f32 %v2832_v53, %v2428_v51 }
 0x59a   :  { %v2473_v33 = vmax.f32 %v2468_v21, 0.0 }
 0x59c   :  { %2475 = vst.msk [vmem:[%s3760_s13] sm:$0xff] %vm2474_vm3, %v2473_v33 }

</bundles_post_ra>
